<compile_context>
chip_gen: v6e
topology: v6e:2x2x1
jax: 0.10.0
libtpu: 0.0.40
codegen_flags: <defaults>
</compile_context>

<pallas_src>
import jax
import jax.numpy as jnp
import numpy as np
from jax.experimental import pallas as pl
from jax.experimental.pallas import tpu as pltpu

LANE = 128


def _round_up(c, m=LANE):
    return ((c + m - 1) // m) * m


# ---------------------------------------------------------------------------
# Fused BasicBlock kernel (one batch element per grid step)
# ---------------------------------------------------------------------------
def _make_block_kernel(P, Hin, Win, Ho, Wo, Cp, Mp, Cop, tap_plan, equal):
    """tap_plan[k] = (plane_index, row_offset, col_offset) for 3x3 tap k=kh*3+kw."""

    def kernel(*refs):
        if equal:
            (planes_ref, s1_ref, b1_ref, w1_ref, s2_ref, b2_ref, w2_ref,
             o_ref, h_scr, t_scr) = refs
            wsc_ref = None
        else:
            (planes_ref, s1_ref, b1_ref, w1_ref, s2_ref, b2_ref, w2_ref,
             wsc_ref, o_ref, h_scr, t_scr) = refs

        # ---- BN1 + ReLU prologue into a zero-padded VMEM scratch (the zero
        #      border implements conv padding=1 applied to h, not to x) ----
        h_scr[...] = jnp.zeros(h_scr.shape, h_scr.dtype)
        xp = planes_ref[...]                                    # (P, Hin, Win, Cp) f32
        h = jnp.maximum(xp * s1_ref[...] + b1_ref[...], 0.0)
        h_scr[:, 1:1 + Hin, 1:1 + Win, :] = h

        # ---- conv1: 3x3 (stride baked into tap_plan) = 9 accumulated dots ----
        acc1 = jnp.zeros((Ho * Wo, Mp), jnp.float32)
        for k, (pi, ro, co) in enumerate(tap_plan):
            a = h_scr[pi, ro:ro + Ho, co:co + Wo, :]
            a = a.reshape(Ho * Wo, Cp).astype(jnp.bfloat16)
            acc1 = acc1 + jnp.dot(a, w1_ref[k],
                                  preferred_element_type=jnp.float32)

        # ---- BN2 + ReLU, staged into a zero-padded scratch for conv2 ----
        t = jnp.maximum(acc1 * s2_ref[...] + b2_ref[...], 0.0)
        t_scr[...] = jnp.zeros(t_scr.shape, t_scr.dtype)
        t_scr[1:1 + Ho, 1:1 + Wo, :] = t.reshape(Ho, Wo, Mp)

        # ---- conv2: 3x3, stride 1 ----
        acc2 = jnp.zeros((Ho * Wo, Cop), jnp.float32)
        for kh in range(3):
            for kw in range(3):
                a = t_scr[kh:kh + Ho, kw:kw + Wo, :]
                a = a.reshape(Ho * Wo, Mp).astype(jnp.bfloat16)
                acc2 = acc2 + jnp.dot(a, w2_ref[kh * 3 + kw],
                                      preferred_element_type=jnp.float32)

        # ---- shortcut + residual add epilogue (fused) ----
        if equal:
            sc = planes_ref[0].reshape(Ho * Wo, Cp)             # identity: raw x
        else:
            hh = h_scr[0, 1:1 + Ho, 1:1 + Wo, :]                # h at strided positions
            hh = hh.reshape(Ho * Wo, Cp).astype(jnp.bfloat16)
            sc = jnp.dot(hh, wsc_ref[...], preferred_element_type=jnp.float32)

        o_ref[...] = (acc2 + sc).reshape(1, Ho, Wo, Cop)

    return kernel


# stride-2 tap mapping: 3x3 tap coordinate -> (input parity, padded-scratch offset)
_S2_TAP = {0: (1, 0), 1: (0, 1), 2: (1, 1)}


def basic_block_forward(p, x):
    """x: (N, H, W, Cp) NHWC float32, channels already zero-padded to 128-multiple."""
    N, H, W, Cp = x.shape
    s, equal = p['stride'], p['equal']
    Mp, Cop = p['w1'].shape[2], p['w2'].shape[2]
    assert p['w1'].shape[1] == Cp

    if s == 1:
        Ho, Wo = H, W
        P, Hin, Win = 1, H, W
        planes = x                                              # (N*1, H, W, Cp)
        h_scr_shape = (1, H + 2, W + 2, Cp)
        tap_plan = [(0, kh, kw) for kh in range(3) for kw in range(3)]
    else:
        assert s == 2 and H % 2 == 0 and W % 2 == 0
        Ho, Wo = H // 2, W // 2
        P, Hin, Win = 4, Ho, Wo
        # spatial-parity split of x: one cheap rearrangement (replaces 9x im2col);
        # inside the kernel every strided tap becomes a unit-stride slice.
        planes = jnp.stack(
            [x[:, ph::2, pw::2, :] for ph in (0, 1) for pw in (0, 1)],
            axis=1).reshape(N * 4, Ho, Wo, Cp)
        h_scr_shape = (4, Ho + 1, Wo + 1, Cp)
        tap_plan = []
        for kh in range(3):
            ph, ro = _S2_TAP[kh]
            for kw in range(3):
                pw, co = _S2_TAP[kw]
                tap_plan.append((ph * 2 + pw, ro, co))

    kernel = _make_block_kernel(P, Hin, Win, Ho, Wo, Cp, Mp, Cop, tap_plan, equal)

    in_specs = [
        pl.BlockSpec((P, Hin, Win, Cp), lambda n: (n, 0, 0, 0)),
        pl.BlockSpec((1, Cp), lambda n: (0, 0)),
        pl.BlockSpec((1, Cp), lambda n: (0, 0)),
        pl.BlockSpec((9, Cp, Mp), lambda n: (0, 0, 0)),
        pl.BlockSpec((1, Mp), lambda n: (0, 0)),
        pl.BlockSpec((1, Mp), lambda n: (0, 0)),
        pl.BlockSpec((9, Mp, Cop), lambda n: (0, 0, 0)),
    ]
    args = [planes, p['s1'], p['b1'], p['w1'], p['s2'], p['b2'], p['w2']]
    if not equal:
        in_specs.append(pl.BlockSpec((Cp, Cop), lambda n: (0, 0)))
        args.append(p['wsc'])

    return pl.pallas_call(
        kernel,
        out_shape=jax.ShapeDtypeStruct((N, Ho, Wo, Cop), jnp.float32),
        grid=(N,),
        in_specs=in_specs,
        out_specs=pl.BlockSpec((1, Ho, Wo, Cop), lambda n: (n, 0, 0, 0)),
        scratch_shapes=[pltpu.VMEM(h_scr_shape, jnp.float32),
                        pltpu.VMEM((Ho + 2, Wo + 2, Mp), jnp.float32)],
        compiler_params=pltpu.CompilerParams(
            dimension_semantics=("parallel",),     # v7x: shard batch over 2 TCs
            vmem_limit_bytes=32 * 1024 * 1024),
    )(*args)


def network_block_forward(params, x_nchw):
    x = jnp.transpose(x_nchw, (0, 2, 3, 1)).astype(jnp.float32)   # NCHW -> NHWC
    cin = x.shape[-1]
    cp = params[0]['w1'].shape[1]
    x = jnp.pad(x, ((0, 0), (0, 0), (0, 0), (0, cp - cin)))       # pad channels once
    for p in params:
        x = basic_block_forward(p, x)
    x = x[..., :params[-1]['cout']]                                # strip padding once
    return jnp.transpose(x, (0, 3, 1, 2))                          # NHWC -> NCHW


# ---------------------------------------------------------------------------
# Parameter construction (synthetic, deterministic)
# ---------------------------------------------------------------------------
def kaiming_conv(key, cout, cin, k):
    n = k * k * cout
    return jax.random.normal(key, (cout, cin, k, k), jnp.float32) * np.sqrt(2.0 / n)


def conv3x3_kernel_weights(key, cout, cin, cp_in, cp_out):
    w = kaiming_conv(key, cout, cin, 3)                            # (cout, cin, 3, 3)
    wk = jnp.transpose(w, (2, 3, 1, 0)).reshape(9, cin, cout)      # k = kh*3 + kw
    wk = jnp.zeros((9, cp_in, cp_out), jnp.float32).at[:, :cin, :cout].set(wk)
    return wk.astype(jnp.bfloat16)


def conv1x1_kernel_weights(key, cout, cin, cp_in, cp_out):
    w = kaiming_conv(key, cout, cin, 1)[:, :, 0, 0]                # (cout, cin)
    wk = jnp.zeros((cp_in, cp_out), jnp.float32).at[:cin, :cout].set(w.T)
    return wk.astype(jnp.bfloat16)


def init_bn_folded(key, c, cp):
    k1, k2, k3, k4 = jax.random.split(key, 4)
    gamma = 1.0 + 0.1 * jax.random.normal(k1, (c,), jnp.float32)
    beta = 0.1 * jax.random.normal(k2, (c,), jnp.float32)
    mean = 0.1 * jax.random.normal(k3, (c,), jnp.float32)
    var = jax.random.uniform(k4, (c,), jnp.float32, 0.5, 1.5)
    eps = 1e-5
    scale = gamma / jnp.sqrt(var + eps)
    bias = beta - mean * scale
    s = jnp.zeros((1, cp), jnp.float32).at[0, :c].set(scale)
    b = jnp.zeros((1, cp), jnp.float32).at[0, :c].set(bias)
    return s, b


def init_basic_block(key, in_planes, out_planes, mid, stride):
    equal = (in_planes == out_planes)
    if equal and stride != 1:
        # Same implicit assumption as the PyTorch module (identity shortcut
        # cannot change spatial resolution) - make it explicit.
        raise ValueError("identity shortcut requires stride == 1")
    ks = jax.random.split(key, 5)
    cp_in, cp_mid, cp_out = _round_up(in_planes), _round_up(mid), _round_up(out_planes)
    p = dict(stride=stride, equal=equal,
             cin=in_planes, mid=mid, cout=out_planes,
             w1=conv3x3_kernel_weights(ks[0], mid, in_planes, cp_in, cp_mid),
             w2=conv3x3_kernel_weights(ks[1], out_planes, mid, cp_mid, cp_out))
    p['s1'], p['b1'] = init_bn_folded(ks[2], in_planes, cp_in)
    p['s2'], p['b2'] = init_bn_folded(ks[3], mid, cp_mid)
    if not equal:
        p['wsc'] = conv1x1_kernel_weights(ks[4], out_planes, in_planes, cp_in, cp_out)
    return p


def init_network_block(key, nb_layers, in_planes, out_planes, cfg, stride):
    keys = jax.random.split(key, nb_layers)
    params = []
    for i in range(nb_layers):
        ip = in_planes if i == 0 else out_planes
        st = stride if i == 0 else 1
        params.append(init_basic_block(keys[i], ip, out_planes, cfg[i], st))
    return params


# ---------------------------------------------------------------------------
# Pure-JAX f32 reference (uses the same bf16-rounded weight values)
# ---------------------------------------------------------------------------
def _ref_conv(x, w_hwio, stride, pad):
    return jax.lax.conv_general_dilated(
        x, w_hwio, window_strides=(stride, stride),
        padding=[(pad, pad), (pad, pad)],
        dimension_numbers=('NHWC', 'HWIO', 'NHWC'),
        precision=jax.lax.Precision.HIGHEST)


def ref_network_block(params, x_nchw):
    x = jnp.transpose(x_nchw, (0, 2, 3, 1)).astype(jnp.float32)
    for p in params:
        cin, mid, cout, s = p['cin'], p['mid'], p['cout'], p['stride']
        s1, b1 = p['s1'][0, :cin], p['b1'][0, :cin]
        s2, b2 = p['s2'][0, :mid], p['b2'][0, :mid]
        w1 = p['w1'][:, :cin, :mid].astype(jnp.float32).reshape(3, 3, cin, mid)
        w2 = p['w2'][:, :mid, :cout].astype(jnp.float32).reshape(3, 3, mid, cout)
        h = jnp.maximum(x * s1 + b1, 0.0)
        if p['equal']:
            shortcut = x
        else:
            wsc = p['wsc'][:cin, :cout].astype(jnp.float32).reshape(1, 1, cin, cout)
            shortcut = _ref_conv(h, wsc, s, 0)
        t = _ref_conv(h, w1, s, 1)
        t = jnp.maximum(t * s2 + b2, 0.0)
        t = _ref_conv(t, w2, 1, 1)
        x = shortcut + t
    return jnp.transpose(x, (0, 3, 1, 2))


# ---------------------------------------------------------------------------
if __name__ == "__main__":
    key = jax.random.PRNGKey(0)
    k_x, k_p = jax.random.split(key)

    # NetworkBlock(nb_layers=2, in_planes=4, out_planes=8, cfg=[6, 6], stride=2)
    nb_layers, in_planes, out_planes, cfg, stride = 2, 4, 8, [6, 6], 2
    x = jax.random.normal(k_x, (2, in_planes, 16, 16), jnp.float32)   # NCHW

    params = init_network_block(k_p, nb_layers, in_planes, out_planes, cfg, stride)

    fwd = jax.jit(lambda xx: network_block_forward(params, xx))
    out = jax.block_until_ready(fwd(x))

    ref = ref_network_block(params, x)
    # Kernel uses bf16 matmul operands (f32 accumulate); deviation from the
    # pure-f32 reference is a few 1e-3 absolute -> 3e-2 is a safe bound.
    np.testing.assert_allclose(np.asarray(out), np.asarray(ref),
                               rtol=3e-2, atol=3e-2)
    assert out.shape == (2, out_planes, 8, 8)

    print("KERNEL_OK")
</pallas_src>

<mosaic_0001>
module attributes {stable_mosaic.version = 11 : i64} {
  func.func @kernel(%arg0: i32, %arg1: memref<1x8x8x128xf32, #tpu.memory_space<vmem>>, %arg2: memref<1x128xf32, #tpu.memory_space<vmem>>, %arg3: memref<1x128xf32, #tpu.memory_space<vmem>>, %arg4: memref<9x128x128xbf16, #tpu.memory_space<vmem>>, %arg5: memref<1x128xf32, #tpu.memory_space<vmem>>, %arg6: memref<1x128xf32, #tpu.memory_space<vmem>>, %arg7: memref<9x128x128xbf16, #tpu.memory_space<vmem>>, %arg8: memref<1x8x8x128xf32, #tpu.memory_space<vmem>>, %arg9: memref<1x10x10x128xf32, #tpu.memory_space<vmem>>, %arg10: memref<10x10x128xf32, #tpu.memory_space<vmem>>) attributes {dimension_semantics = [#tpu.dimension_semantics<parallel>], iteration_bounds = array<i64: 2>, scalar_prefetch = 0 : i64, scratch_operands = 2 : i64, tpu.core_type = #tpu.core_type<tc>, window_params = [{transform_indices = @transform_0, window_bounds = array<i64: 1, 8, 8, 128>}, {pipeline_mode = #tpu.pipeline_mode<synchronous>, transform_indices = @transform_1, window_bounds = array<i64: 1, 128>}, {pipeline_mode = #tpu.pipeline_mode<synchronous>, transform_indices = @transform_2, window_bounds = array<i64: 1, 128>}, {pipeline_mode = #tpu.pipeline_mode<synchronous>, transform_indices = @transform_3, window_bounds = array<i64: 9, 128, 128>}, {pipeline_mode = #tpu.pipeline_mode<synchronous>, transform_indices = @transform_4, window_bounds = array<i64: 1, 128>}, {pipeline_mode = #tpu.pipeline_mode<synchronous>, transform_indices = @transform_5, window_bounds = array<i64: 1, 128>}, {pipeline_mode = #tpu.pipeline_mode<synchronous>, transform_indices = @transform_6, window_bounds = array<i64: 9, 128, 128>}, {transform_indices = @transform_7, window_bounds = array<i64: 1, 8, 8, 128>}]} {
    %cst = arith.constant 0.000000e+00 : f32
    %0 = vector.broadcast %cst : f32 to vector<1x10x10x128xf32>
    %c0 = arith.constant 0 : index
    %c0_0 = arith.constant 0 : index
    %c0_1 = arith.constant 0 : index
    %c0_2 = arith.constant 0 : index
    %1 = vector.load %arg9[%c0, %c0_0, %c0_1, %c0_2] : memref<1x10x10x128xf32, #tpu.memory_space<vmem>>, vector<1x10x10x128xf32>
    tpu.vector_store %arg9[%c0, %c0_0, %c0_1, %c0_2], %0 {strides = array<i32>} : memref<1x10x10x128xf32, #tpu.memory_space<vmem>>, vector<1x10x10x128xf32>,
    %c0_3 = arith.constant 0 : index
    %c0_4 = arith.constant 0 : index
    %c0_5 = arith.constant 0 : index
    %c0_6 = arith.constant 0 : index
    %2 = vector.load %arg1[%c0_3, %c0_4, %c0_5, %c0_6] : memref<1x8x8x128xf32, #tpu.memory_space<vmem>>, vector<1x8x8x128xf32>
    %c0_7 = arith.constant 0 : index
    %c0_8 = arith.constant 0 : index
    %3 = vector.load %arg2[%c0_7, %c0_8] : memref<1x128xf32, #tpu.memory_space<vmem>>, vector<1x128xf32>
    %4 = vector.shape_cast %3 : vector<1x128xf32> to vector<1x1x1x128xf32>
    %5 = vector.broadcast %4 : vector<1x1x1x128xf32> to vector<1x8x8x128xf32>
    %6 = arith.mulf %2, %5 : vector<1x8x8x128xf32>
    %c0_9 = arith.constant 0 : index
    %c0_10 = arith.constant 0 : index
    %7 = vector.load %arg3[%c0_9, %c0_10] : memref<1x128xf32, #tpu.memory_space<vmem>>, vector<1x128xf32>
    %8 = vector.shape_cast %7 : vector<1x128xf32> to vector<1x1x1x128xf32>
    %9 = vector.broadcast %8 : vector<1x1x1x128xf32> to vector<1x8x8x128xf32>
    %10 = arith.addf %6, %9 : vector<1x8x8x128xf32>
    %cst_11 = arith.constant 0.000000e+00 : f32
    %11 = vector.broadcast %cst_11 : f32 to vector<1x8x8x128xf32>
    %12 = arith.maximumf %10, %11 : vector<1x8x8x128xf32>
    %c0_12 = arith.constant 0 : index
    %c1 = arith.constant 1 : index
    %c1_13 = arith.constant 1 : index
    %c0_14 = arith.constant 0 : index
    %13 = vector.load %arg9[%c0_12, %c1, %c1_13, %c0_14] : memref<1x10x10x128xf32, #tpu.memory_space<vmem>>, vector<1x8x8x128xf32>
    tpu.vector_store %arg9[%c0_12, %c1, %c1_13, %c0_14], %12 {strides = array<i32>} : memref<1x10x10x128xf32, #tpu.memory_space<vmem>>, vector<1x8x8x128xf32>,
    %cst_15 = arith.constant 0.000000e+00 : f32
    %14 = vector.broadcast %cst_15 : f32 to vector<64x128xf32>
    %c0_16 = arith.constant 0 : index
    %c0_17 = arith.constant 0 : index
    %c0_18 = arith.constant 0 : index
    %c0_19 = arith.constant 0 : index
    %15 = vector.load %arg9[%c0_16, %c0_17, %c0_18, %c0_19] : memref<1x10x10x128xf32, #tpu.memory_space<vmem>>, vector<1x8x8x128xf32>
    %16 = vector.shape_cast %15 : vector<1x8x8x128xf32> to vector<8x8x128xf32>
    %17 = vector.shape_cast %16 : vector<8x8x128xf32> to vector<64x128xf32>
    %18 = arith.truncf %17 : vector<64x128xf32> to vector<64x128xbf16>
    %c0_20 = arith.constant 0 : index
    %c0_21 = arith.constant 0 : index
    %c0_22 = arith.constant 0 : index
    %19 = vector.load %arg4[%c0_20, %c0_21, %c0_22] : memref<9x128x128xbf16, #tpu.memory_space<vmem>>, vector<1x128x128xbf16>
    %20 = vector.shape_cast %19 : vector<1x128x128xbf16> to vector<128x128xbf16>
    %cst_23 = arith.constant dense<0.000000e+00> : vector<64x128xf32>
    %21 = tpu.matmul %18, %20, %cst_23 {dimension_numbers = #tpu.dot_dimension_numbers<[1], [0], [0], [1], [0, 0, 1, 1], [], []>} : vector<64x128xbf16>, vector<128x128xbf16>, vector<64x128xf32> -> vector<64x128xf32>
    %22 = arith.addf %14, %21 : vector<64x128xf32>
    %c0_24 = arith.constant 0 : index
    %c0_25 = arith.constant 0 : index
    %c1_26 = arith.constant 1 : index
    %c0_27 = arith.constant 0 : index
    %23 = vector.load %arg9[%c0_24, %c0_25, %c1_26, %c0_27] : memref<1x10x10x128xf32, #tpu.memory_space<vmem>>, vector<1x8x8x128xf32>
    %24 = vector.shape_cast %23 : vector<1x8x8x128xf32> to vector<8x8x128xf32>
    %25 = vector.shape_cast %24 : vector<8x8x128xf32> to vector<64x128xf32>
    %26 = arith.truncf %25 : vector<64x128xf32> to vector<64x128xbf16>
    %c1_28 = arith.constant 1 : index
    %c0_29 = arith.constant 0 : index
    %c0_30 = arith.constant 0 : index
    %27 = vector.load %arg4[%c1_28, %c0_29, %c0_30] : memref<9x128x128xbf16, #tpu.memory_space<vmem>>, vector<1x128x128xbf16>
    %28 = vector.shape_cast %27 : vector<1x128x128xbf16> to vector<128x128xbf16>
    %cst_31 = arith.constant dense<0.000000e+00> : vector<64x128xf32>
    %29 = tpu.matmul %26, %28, %cst_31 {dimension_numbers = #tpu.dot_dimension_numbers<[1], [0], [0], [1], [0, 0, 1, 1], [], []>} : vector<64x128xbf16>, vector<128x128xbf16>, vector<64x128xf32> -> vector<64x128xf32>
    %30 = arith.addf %22, %29 : vector<64x128xf32>
    %c0_32 = arith.constant 0 : index
    %c0_33 = arith.constant 0 : index
    %c2 = arith.constant 2 : index
    %c0_34 = arith.constant 0 : index
    %31 = vector.load %arg9[%c0_32, %c0_33, %c2, %c0_34] : memref<1x10x10x128xf32, #tpu.memory_space<vmem>>, vector<1x8x8x128xf32>
    %32 = vector.shape_cast %31 : vector<1x8x8x128xf32> to vector<8x8x128xf32>
    %33 = vector.shape_cast %32 : vector<8x8x128xf32> to vector<64x128xf32>
    %34 = arith.truncf %33 : vector<64x128xf32> to vector<64x128xbf16>
    %c2_35 = arith.constant 2 : index
    %c0_36 = arith.constant 0 : index
    %c0_37 = arith.constant 0 : index
    %35 = vector.load %arg4[%c2_35, %c0_36, %c0_37] : memref<9x128x128xbf16, #tpu.memory_space<vmem>>, vector<1x128x128xbf16>
    %36 = vector.shape_cast %35 : vector<1x128x128xbf16> to vector<128x128xbf16>
    %cst_38 = arith.constant dense<0.000000e+00> : vector<64x128xf32>
    %37 = tpu.matmul %34, %36, %cst_38 {dimension_numbers = #tpu.dot_dimension_numbers<[1], [0], [0], [1], [0, 0, 1, 1], [], []>} : vector<64x128xbf16>, vector<128x128xbf16>, vector<64x128xf32> -> vector<64x128xf32>
    %38 = arith.addf %30, %37 : vector<64x128xf32>
    %c0_39 = arith.constant 0 : index
    %c1_40 = arith.constant 1 : index
    %c0_41 = arith.constant 0 : index
    %c0_42 = arith.constant 0 : index
    %39 = vector.load %arg9[%c0_39, %c1_40, %c0_41, %c0_42] : memref<1x10x10x128xf32, #tpu.memory_space<vmem>>, vector<1x8x8x128xf32>
    %40 = vector.shape_cast %39 : vector<1x8x8x128xf32> to vector<8x8x128xf32>
    %41 = vector.shape_cast %40 : vector<8x8x128xf32> to vector<64x128xf32>
    %42 = arith.truncf %41 : vector<64x128xf32> to vector<64x128xbf16>
    %c3 = arith.constant 3 : index
    %c0_43 = arith.constant 0 : index
    %c0_44 = arith.constant 0 : index
    %43 = vector.load %arg4[%c3, %c0_43, %c0_44] : memref<9x128x128xbf16, #tpu.memory_space<vmem>>, vector<1x128x128xbf16>
    %44 = vector.shape_cast %43 : vector<1x128x128xbf16> to vector<128x128xbf16>
    %cst_45 = arith.constant dense<0.000000e+00> : vector<64x128xf32>
    %45 = tpu.matmul %42, %44, %cst_45 {dimension_numbers = #tpu.dot_dimension_numbers<[1], [0], [0], [1], [0, 0, 1, 1], [], []>} : vector<64x128xbf16>, vector<128x128xbf16>, vector<64x128xf32> -> vector<64x128xf32>
    %46 = arith.addf %38, %45 : vector<64x128xf32>
    %c0_46 = arith.constant 0 : index
    %c1_47 = arith.constant 1 : index
    %c1_48 = arith.constant 1 : index
    %c0_49 = arith.constant 0 : index
    %47 = vector.load %arg9[%c0_46, %c1_47, %c1_48, %c0_49] : memref<1x10x10x128xf32, #tpu.memory_space<vmem>>, vector<1x8x8x128xf32>
    %48 = vector.shape_cast %47 : vector<1x8x8x128xf32> to vector<8x8x128xf32>
    %49 = vector.shape_cast %48 : vector<8x8x128xf32> to vector<64x128xf32>
    %50 = arith.truncf %49 : vector<64x128xf32> to vector<64x128xbf16>
    %c4 = arith.constant 4 : index
    %c0_50 = arith.constant 0 : index
    %c0_51 = arith.constant 0 : index
    %51 = vector.load %arg4[%c4, %c0_50, %c0_51] : memref<9x128x128xbf16, #tpu.memory_space<vmem>>, vector<1x128x128xbf16>
    %52 = vector.shape_cast %51 : vector<1x128x128xbf16> to vector<128x128xbf16>
    %cst_52 = arith.constant dense<0.000000e+00> : vector<64x128xf32>
    %53 = tpu.matmul %50, %52, %cst_52 {dimension_numbers = #tpu.dot_dimension_numbers<[1], [0], [0], [1], [0, 0, 1, 1], [], []>} : vector<64x128xbf16>, vector<128x128xbf16>, vector<64x128xf32> -> vector<64x128xf32>
    %54 = arith.addf %46, %53 : vector<64x128xf32>
    %c0_53 = arith.constant 0 : index
    %c1_54 = arith.constant 1 : index
    %c2_55 = arith.constant 2 : index
    %c0_56 = arith.constant 0 : index
    %55 = vector.load %arg9[%c0_53, %c1_54, %c2_55, %c0_56] : memref<1x10x10x128xf32, #tpu.memory_space<vmem>>, vector<1x8x8x128xf32>
    %56 = vector.shape_cast %55 : vector<1x8x8x128xf32> to vector<8x8x128xf32>
    %57 = vector.shape_cast %56 : vector<8x8x128xf32> to vector<64x128xf32>
    %58 = arith.truncf %57 : vector<64x128xf32> to vector<64x128xbf16>
    %c5 = arith.constant 5 : index
    %c0_57 = arith.constant 0 : index
    %c0_58 = arith.constant 0 : index
    %59 = vector.load %arg4[%c5, %c0_57, %c0_58] : memref<9x128x128xbf16, #tpu.memory_space<vmem>>, vector<1x128x128xbf16>
    %60 = vector.shape_cast %59 : vector<1x128x128xbf16> to vector<128x128xbf16>
    %cst_59 = arith.constant dense<0.000000e+00> : vector<64x128xf32>
    %61 = tpu.matmul %58, %60, %cst_59 {dimension_numbers = #tpu.dot_dimension_numbers<[1], [0], [0], [1], [0, 0, 1, 1], [], []>} : vector<64x128xbf16>, vector<128x128xbf16>, vector<64x128xf32> -> vector<64x128xf32>
    %62 = arith.addf %54, %61 : vector<64x128xf32>
    %c0_60 = arith.constant 0 : index
    %c2_61 = arith.constant 2 : index
    %c0_62 = arith.constant 0 : index
    %c0_63 = arith.constant 0 : index
    %63 = vector.load %arg9[%c0_60, %c2_61, %c0_62, %c0_63] : memref<1x10x10x128xf32, #tpu.memory_space<vmem>>, vector<1x8x8x128xf32>
    %64 = vector.shape_cast %63 : vector<1x8x8x128xf32> to vector<8x8x128xf32>
    %65 = vector.shape_cast %64 : vector<8x8x128xf32> to vector<64x128xf32>
    %66 = arith.truncf %65 : vector<64x128xf32> to vector<64x128xbf16>
    %c6 = arith.constant 6 : index
    %c0_64 = arith.constant 0 : index
    %c0_65 = arith.constant 0 : index
    %67 = vector.load %arg4[%c6, %c0_64, %c0_65] : memref<9x128x128xbf16, #tpu.memory_space<vmem>>, vector<1x128x128xbf16>
    %68 = vector.shape_cast %67 : vector<1x128x128xbf16> to vector<128x128xbf16>
    %cst_66 = arith.constant dense<0.000000e+00> : vector<64x128xf32>
    %69 = tpu.matmul %66, %68, %cst_66 {dimension_numbers = #tpu.dot_dimension_numbers<[1], [0], [0], [1], [0, 0, 1, 1], [], []>} : vector<64x128xbf16>, vector<128x128xbf16>, vector<64x128xf32> -> vector<64x128xf32>
    %70 = arith.addf %62, %69 : vector<64x128xf32>
    %c0_67 = arith.constant 0 : index
    %c2_68 = arith.constant 2 : index
    %c1_69 = arith.constant 1 : index
    %c0_70 = arith.constant 0 : index
    %71 = vector.load %arg9[%c0_67, %c2_68, %c1_69, %c0_70] : memref<1x10x10x128xf32, #tpu.memory_space<vmem>>, vector<1x8x8x128xf32>
    %72 = vector.shape_cast %71 : vector<1x8x8x128xf32> to vector<8x8x128xf32>
    %73 = vector.shape_cast %72 : vector<8x8x128xf32> to vector<64x128xf32>
    %74 = arith.truncf %73 : vector<64x128xf32> to vector<64x128xbf16>
    %c7 = arith.constant 7 : index
    %c0_71 = arith.constant 0 : index
    %c0_72 = arith.constant 0 : index
    %75 = vector.load %arg4[%c7, %c0_71, %c0_72] : memref<9x128x128xbf16, #tpu.memory_space<vmem>>, vector<1x128x128xbf16>
    %76 = vector.shape_cast %75 : vector<1x128x128xbf16> to vector<128x128xbf16>
    %cst_73 = arith.constant dense<0.000000e+00> : vector<64x128xf32>
    %77 = tpu.matmul %74, %76, %cst_73 {dimension_numbers = #tpu.dot_dimension_numbers<[1], [0], [0], [1], [0, 0, 1, 1], [], []>} : vector<64x128xbf16>, vector<128x128xbf16>, vector<64x128xf32> -> vector<64x128xf32>
    %78 = arith.addf %70, %77 : vector<64x128xf32>
    %c0_74 = arith.constant 0 : index
    %c2_75 = arith.constant 2 : index
    %c2_76 = arith.constant 2 : index
    %c0_77 = arith.constant 0 : index
    %79 = vector.load %arg9[%c0_74, %c2_75, %c2_76, %c0_77] : memref<1x10x10x128xf32, #tpu.memory_space<vmem>>, vector<1x8x8x128xf32>
    %80 = vector.shape_cast %79 : vector<1x8x8x128xf32> to vector<8x8x128xf32>
    %81 = vector.shape_cast %80 : vector<8x8x128xf32> to vector<64x128xf32>
    %82 = arith.truncf %81 : vector<64x128xf32> to vector<64x128xbf16>
    %c8 = arith.constant 8 : index
    %c0_78 = arith.constant 0 : index
    %c0_79 = arith.constant 0 : index
    %83 = vector.load %arg4[%c8, %c0_78, %c0_79] : memref<9x128x128xbf16, #tpu.memory_space<vmem>>, vector<1x128x128xbf16>
    %84 = vector.shape_cast %83 : vector<1x128x128xbf16> to vector<128x128xbf16>
    %cst_80 = arith.constant dense<0.000000e+00> : vector<64x128xf32>
    %85 = tpu.matmul %82, %84, %cst_80 {dimension_numbers = #tpu.dot_dimension_numbers<[1], [0], [0], [1], [0, 0, 1, 1], [], []>} : vector<64x128xbf16>, vector<128x128xbf16>, vector<64x128xf32> -> vector<64x128xf32>
    %86 = arith.addf %78, %85 : vector<64x128xf32>
    %c0_81 = arith.constant 0 : index
    %c0_82 = arith.constant 0 : index
    %87 = vector.load %arg5[%c0_81, %c0_82] : memref<1x128xf32, #tpu.memory_space<vmem>>, vector<1x128xf32>
    %88 = vector.broadcast %87 : vector<1x128xf32> to vector<64x128xf32>
    %89 = arith.mulf %86, %88 : vector<64x128xf32>
    %c0_83 = arith.constant 0 : index
    %c0_84 = arith.constant 0 : index
    %90 = vector.load %arg6[%c0_83, %c0_84] : memref<1x128xf32, #tpu.memory_space<vmem>>, vector<1x128xf32>
    %91 = vector.broadcast %90 : vector<1x128xf32> to vector<64x128xf32>
    %92 = arith.addf %89, %91 : vector<64x128xf32>
    %cst_85 = arith.constant 0.000000e+00 : f32
    %93 = vector.broadcast %cst_85 : f32 to vector<64x128xf32>
    %94 = arith.maximumf %92, %93 : vector<64x128xf32>
    %cst_86 = arith.constant 0.000000e+00 : f32
    %95 = vector.broadcast %cst_86 : f32 to vector<10x10x128xf32>
    %c0_87 = arith.constant 0 : index
    %c0_88 = arith.constant 0 : index
    %c0_89 = arith.constant 0 : index
    %96 = vector.load %arg10[%c0_87, %c0_88, %c0_89] : memref<10x10x128xf32, #tpu.memory_space<vmem>>, vector<10x10x128xf32>
    tpu.vector_store %arg10[%c0_87, %c0_88, %c0_89], %95 {strides = array<i32>} : memref<10x10x128xf32, #tpu.memory_space<vmem>>, vector<10x10x128xf32>,
    %97 = vector.shape_cast %94 : vector<64x128xf32> to vector<8x8x128xf32>
    %c1_90 = arith.constant 1 : index
    %c1_91 = arith.constant 1 : index
    %c0_92 = arith.constant 0 : index
    %98 = vector.load %arg10[%c1_90, %c1_91, %c0_92] : memref<10x10x128xf32, #tpu.memory_space<vmem>>, vector<8x8x128xf32>
    tpu.vector_store %arg10[%c1_90, %c1_91, %c0_92], %97 {strides = array<i32>} : memref<10x10x128xf32, #tpu.memory_space<vmem>>, vector<8x8x128xf32>,
    %cst_93 = arith.constant 0.000000e+00 : f32
    %99 = vector.broadcast %cst_93 : f32 to vector<64x128xf32>
    %c0_94 = arith.constant 0 : index
    %c0_95 = arith.constant 0 : index
    %c0_96 = arith.constant 0 : index
    %100 = vector.load %arg10[%c0_94, %c0_95, %c0_96] : memref<10x10x128xf32, #tpu.memory_space<vmem>>, vector<8x8x128xf32>
    %101 = vector.shape_cast %100 : vector<8x8x128xf32> to vector<64x128xf32>
    %102 = arith.truncf %101 : vector<64x128xf32> to vector<64x128xbf16>
    %c0_97 = arith.constant 0 : index
    %c0_98 = arith.constant 0 : index
    %c0_99 = arith.constant 0 : index
    %103 = vector.load %arg7[%c0_97, %c0_98, %c0_99] : memref<9x128x128xbf16, #tpu.memory_space<vmem>>, vector<1x128x128xbf16>
    %104 = vector.shape_cast %103 : vector<1x128x128xbf16> to vector<128x128xbf16>
    %cst_100 = arith.constant dense<0.000000e+00> : vector<64x128xf32>
    %105 = tpu.matmul %102, %104, %cst_100 {dimension_numbers = #tpu.dot_dimension_numbers<[1], [0], [0], [1], [0, 0, 1, 1], [], []>} : vector<64x128xbf16>, vector<128x128xbf16>, vector<64x128xf32> -> vector<64x128xf32>
    %106 = arith.addf %99, %105 : vector<64x128xf32>
    %c0_101 = arith.constant 0 : index
    %c1_102 = arith.constant 1 : index
    %c0_103 = arith.constant 0 : index
    %107 = vector.load %arg10[%c0_101, %c1_102, %c0_103] : memref<10x10x128xf32, #tpu.memory_space<vmem>>, vector<8x8x128xf32>
    %108 = vector.shape_cast %107 : vector<8x8x128xf32> to vector<64x128xf32>
    %109 = arith.truncf %108 : vector<64x128xf32> to vector<64x128xbf16>
    %c1_104 = arith.constant 1 : index
    %c0_105 = arith.constant 0 : index
    %c0_106 = arith.constant 0 : index
    %110 = vector.load %arg7[%c1_104, %c0_105, %c0_106] : memref<9x128x128xbf16, #tpu.memory_space<vmem>>, vector<1x128x128xbf16>
    %111 = vector.shape_cast %110 : vector<1x128x128xbf16> to vector<128x128xbf16>
    %cst_107 = arith.constant dense<0.000000e+00> : vector<64x128xf32>
    %112 = tpu.matmul %109, %111, %cst_107 {dimension_numbers = #tpu.dot_dimension_numbers<[1], [0], [0], [1], [0, 0, 1, 1], [], []>} : vector<64x128xbf16>, vector<128x128xbf16>, vector<64x128xf32> -> vector<64x128xf32>
    %113 = arith.addf %106, %112 : vector<64x128xf32>
    %c0_108 = arith.constant 0 : index
    %c2_109 = arith.constant 2 : index
    %c0_110 = arith.constant 0 : index
    %114 = vector.load %arg10[%c0_108, %c2_109, %c0_110] : memref<10x10x128xf32, #tpu.memory_space<vmem>>, vector<8x8x128xf32>
    %115 = vector.shape_cast %114 : vector<8x8x128xf32> to vector<64x128xf32>
    %116 = arith.truncf %115 : vector<64x128xf32> to vector<64x128xbf16>
    %c2_111 = arith.constant 2 : index
    %c0_112 = arith.constant 0 : index
    %c0_113 = arith.constant 0 : index
    %117 = vector.load %arg7[%c2_111, %c0_112, %c0_113] : memref<9x128x128xbf16, #tpu.memory_space<vmem>>, vector<1x128x128xbf16>
    %118 = vector.shape_cast %117 : vector<1x128x128xbf16> to vector<128x128xbf16>
    %cst_114 = arith.constant dense<0.000000e+00> : vector<64x128xf32>
    %119 = tpu.matmul %116, %118, %cst_114 {dimension_numbers = #tpu.dot_dimension_numbers<[1], [0], [0], [1], [0, 0, 1, 1], [], []>} : vector<64x128xbf16>, vector<128x128xbf16>, vector<64x128xf32> -> vector<64x128xf32>
    %120 = arith.addf %113, %119 : vector<64x128xf32>
    %c1_115 = arith.constant 1 : index
    %c0_116 = arith.constant 0 : index
    %c0_117 = arith.constant 0 : index
    %121 = vector.load %arg10[%c1_115, %c0_116, %c0_117] : memref<10x10x128xf32, #tpu.memory_space<vmem>>, vector<8x8x128xf32>
    %122 = vector.shape_cast %121 : vector<8x8x128xf32> to vector<64x128xf32>
    %123 = arith.truncf %122 : vector<64x128xf32> to vector<64x128xbf16>
    %c3_118 = arith.constant 3 : index
    %c0_119 = arith.constant 0 : index
    %c0_120 = arith.constant 0 : index
    %124 = vector.load %arg7[%c3_118, %c0_119, %c0_120] : memref<9x128x128xbf16, #tpu.memory_space<vmem>>, vector<1x128x128xbf16>
    %125 = vector.shape_cast %124 : vector<1x128x128xbf16> to vector<128x128xbf16>
    %cst_121 = arith.constant dense<0.000000e+00> : vector<64x128xf32>
    %126 = tpu.matmul %123, %125, %cst_121 {dimension_numbers = #tpu.dot_dimension_numbers<[1], [0], [0], [1], [0, 0, 1, 1], [], []>} : vector<64x128xbf16>, vector<128x128xbf16>, vector<64x128xf32> -> vector<64x128xf32>
    %127 = arith.addf %120, %126 : vector<64x128xf32>
    %c1_122 = arith.constant 1 : index
    %c1_123 = arith.constant 1 : index
    %c0_124 = arith.constant 0 : index
    %128 = vector.load %arg10[%c1_122, %c1_123, %c0_124] : memref<10x10x128xf32, #tpu.memory_space<vmem>>, vector<8x8x128xf32>
    %129 = vector.shape_cast %128 : vector<8x8x128xf32> to vector<64x128xf32>
    %130 = arith.truncf %129 : vector<64x128xf32> to vector<64x128xbf16>
    %c4_125 = arith.constant 4 : index
    %c0_126 = arith.constant 0 : index
    %c0_127 = arith.constant 0 : index
    %131 = vector.load %arg7[%c4_125, %c0_126, %c0_127] : memref<9x128x128xbf16, #tpu.memory_space<vmem>>, vector<1x128x128xbf16>
    %132 = vector.shape_cast %131 : vector<1x128x128xbf16> to vector<128x128xbf16>
    %cst_128 = arith.constant dense<0.000000e+00> : vector<64x128xf32>
    %133 = tpu.matmul %130, %132, %cst_128 {dimension_numbers = #tpu.dot_dimension_numbers<[1], [0], [0], [1], [0, 0, 1, 1], [], []>} : vector<64x128xbf16>, vector<128x128xbf16>, vector<64x128xf32> -> vector<64x128xf32>
    %134 = arith.addf %127, %133 : vector<64x128xf32>
    %c1_129 = arith.constant 1 : index
    %c2_130 = arith.constant 2 : index
    %c0_131 = arith.constant 0 : index
    %135 = vector.load %arg10[%c1_129, %c2_130, %c0_131] : memref<10x10x128xf32, #tpu.memory_space<vmem>>, vector<8x8x128xf32>
    %136 = vector.shape_cast %135 : vector<8x8x128xf32> to vector<64x128xf32>
    %137 = arith.truncf %136 : vector<64x128xf32> to vector<64x128xbf16>
    %c5_132 = arith.constant 5 : index
    %c0_133 = arith.constant 0 : index
    %c0_134 = arith.constant 0 : index
    %138 = vector.load %arg7[%c5_132, %c0_133, %c0_134] : memref<9x128x128xbf16, #tpu.memory_space<vmem>>, vector<1x128x128xbf16>
    %139 = vector.shape_cast %138 : vector<1x128x128xbf16> to vector<128x128xbf16>
    %cst_135 = arith.constant dense<0.000000e+00> : vector<64x128xf32>
    %140 = tpu.matmul %137, %139, %cst_135 {dimension_numbers = #tpu.dot_dimension_numbers<[1], [0], [0], [1], [0, 0, 1, 1], [], []>} : vector<64x128xbf16>, vector<128x128xbf16>, vector<64x128xf32> -> vector<64x128xf32>
    %141 = arith.addf %134, %140 : vector<64x128xf32>
    %c2_136 = arith.constant 2 : index
    %c0_137 = arith.constant 0 : index
    %c0_138 = arith.constant 0 : index
    %142 = vector.load %arg10[%c2_136, %c0_137, %c0_138] : memref<10x10x128xf32, #tpu.memory_space<vmem>>, vector<8x8x128xf32>
    %143 = vector.shape_cast %142 : vector<8x8x128xf32> to vector<64x128xf32>
    %144 = arith.truncf %143 : vector<64x128xf32> to vector<64x128xbf16>
    %c6_139 = arith.constant 6 : index
    %c0_140 = arith.constant 0 : index
    %c0_141 = arith.constant 0 : index
    %145 = vector.load %arg7[%c6_139, %c0_140, %c0_141] : memref<9x128x128xbf16, #tpu.memory_space<vmem>>, vector<1x128x128xbf16>
    %146 = vector.shape_cast %145 : vector<1x128x128xbf16> to vector<128x128xbf16>
    %cst_142 = arith.constant dense<0.000000e+00> : vector<64x128xf32>
    %147 = tpu.matmul %144, %146, %cst_142 {dimension_numbers = #tpu.dot_dimension_numbers<[1], [0], [0], [1], [0, 0, 1, 1], [], []>} : vector<64x128xbf16>, vector<128x128xbf16>, vector<64x128xf32> -> vector<64x128xf32>
    %148 = arith.addf %141, %147 : vector<64x128xf32>
    %c2_143 = arith.constant 2 : index
    %c1_144 = arith.constant 1 : index
    %c0_145 = arith.constant 0 : index
    %149 = vector.load %arg10[%c2_143, %c1_144, %c0_145] : memref<10x10x128xf32, #tpu.memory_space<vmem>>, vector<8x8x128xf32>
    %150 = vector.shape_cast %149 : vector<8x8x128xf32> to vector<64x128xf32>
    %151 = arith.truncf %150 : vector<64x128xf32> to vector<64x128xbf16>
    %c7_146 = arith.constant 7 : index
    %c0_147 = arith.constant 0 : index
    %c0_148 = arith.constant 0 : index
    %152 = vector.load %arg7[%c7_146, %c0_147, %c0_148] : memref<9x128x128xbf16, #tpu.memory_space<vmem>>, vector<1x128x128xbf16>
    %153 = vector.shape_cast %152 : vector<1x128x128xbf16> to vector<128x128xbf16>
    %cst_149 = arith.constant dense<0.000000e+00> : vector<64x128xf32>
    %154 = tpu.matmul %151, %153, %cst_149 {dimension_numbers = #tpu.dot_dimension_numbers<[1], [0], [0], [1], [0, 0, 1, 1], [], []>} : vector<64x128xbf16>, vector<128x128xbf16>, vector<64x128xf32> -> vector<64x128xf32>
    %155 = arith.addf %148, %154 : vector<64x128xf32>
    %c2_150 = arith.constant 2 : index
    %c2_151 = arith.constant 2 : index
    %c0_152 = arith.constant 0 : index
    %156 = vector.load %arg10[%c2_150, %c2_151, %c0_152] : memref<10x10x128xf32, #tpu.memory_space<vmem>>, vector<8x8x128xf32>
    %157 = vector.shape_cast %156 : vector<8x8x128xf32> to vector<64x128xf32>
    %158 = arith.truncf %157 : vector<64x128xf32> to vector<64x128xbf16>
    %c8_153 = arith.constant 8 : index
    %c0_154 = arith.constant 0 : index
    %c0_155 = arith.constant 0 : index
    %159 = vector.load %arg7[%c8_153, %c0_154, %c0_155] : memref<9x128x128xbf16, #tpu.memory_space<vmem>>, vector<1x128x128xbf16>
    %160 = vector.shape_cast %159 : vector<1x128x128xbf16> to vector<128x128xbf16>
    %cst_156 = arith.constant dense<0.000000e+00> : vector<64x128xf32>
    %161 = tpu.matmul %158, %160, %cst_156 {dimension_numbers = #tpu.dot_dimension_numbers<[1], [0], [0], [1], [0, 0, 1, 1], [], []>} : vector<64x128xbf16>, vector<128x128xbf16>, vector<64x128xf32> -> vector<64x128xf32>
    %162 = arith.addf %155, %161 : vector<64x128xf32>
    %c0_157 = arith.constant 0 : index
    %c0_158 = arith.constant 0 : index
    %c0_159 = arith.constant 0 : index
    %c0_160 = arith.constant 0 : index
    %163 = vector.load %arg1[%c0_157, %c0_158, %c0_159, %c0_160] : memref<1x8x8x128xf32, #tpu.memory_space<vmem>>, vector<1x8x8x128xf32>
    %164 = vector.shape_cast %163 : vector<1x8x8x128xf32> to vector<8x8x128xf32>
    %165 = vector.shape_cast %164 : vector<8x8x128xf32> to vector<64x128xf32>
    %166 = arith.addf %162, %165 : vector<64x128xf32>
    %167 = vector.shape_cast %166 : vector<64x128xf32> to vector<1x8x8x128xf32>
    %c0_161 = arith.constant 0 : index
    %c0_162 = arith.constant 0 : index
    %c0_163 = arith.constant 0 : index
    %c0_164 = arith.constant 0 : index
    %168 = vector.load %arg8[%c0_161, %c0_162, %c0_163, %c0_164] : memref<1x8x8x128xf32, #tpu.memory_space<vmem>>, vector<1x8x8x128xf32>
    tpu.vector_store %arg8[%c0_161, %c0_162, %c0_163, %c0_164], %167 {strides = array<i32>} : memref<1x8x8x128xf32, #tpu.memory_space<vmem>>, vector<1x8x8x128xf32>,
    return
  }
  func.func @transform_0(%arg0: i32) -> (i32, i32, i32, i32) {
    %c0_i32 = arith.constant 0 : i32
    %c0_i32_0 = arith.constant 0 : i32
    %c0_i32_1 = arith.constant 0 : i32
    %c0_i32_2 = arith.constant 0 : i32
    return %arg0, %c0_i32, %c0_i32_0, %c0_i32_1 : i32, i32, i32, i32
  }
  func.func @transform_1(%arg0: i32) -> (i32, i32) {
    %c0_i32 = arith.constant 0 : i32
    %c0_i32_0 = arith.constant 0 : i32
    %c0_i32_1 = arith.constant 0 : i32
    return %c0_i32, %c0_i32_0 : i32, i32
  }
  func.func @transform_2(%arg0: i32) -> (i32, i32) {
    %c0_i32 = arith.constant 0 : i32
    %c0_i32_0 = arith.constant 0 : i32
    %c0_i32_1 = arith.constant 0 : i32
    return %c0_i32, %c0_i32_0 : i32, i32
  }
  func.func @transform_3(%arg0: i32) -> (i32, i32, i32) {
    %c0_i32 = arith.constant 0 : i32
    %c0_i32_0 = arith.constant 0 : i32
    %c0_i32_1 = arith.constant 0 : i32
    %c0_i32_2 = arith.constant 0 : i32
    return %c0_i32, %c0_i32_0, %c0_i32_1 : i32, i32, i32
  }
  func.func @transform_4(%arg0: i32) -> (i32, i32) {
    %c0_i32 = arith.constant 0 : i32
    %c0_i32_0 = arith.constant 0 : i32
    %c0_i32_1 = arith.constant 0 : i32
    return %c0_i32, %c0_i32_0 : i32, i32
  }
  func.func @transform_5(%arg0: i32) -> (i32, i32) {
    %c0_i32 = arith.constant 0 : i32
    %c0_i32_0 = arith.constant 0 : i32
    %c0_i32_1 = arith.constant 0 : i32
    return %c0_i32, %c0_i32_0 : i32, i32
  }
  func.func @transform_6(%arg0: i32) -> (i32, i32, i32) {
    %c0_i32 = arith.constant 0 : i32
    %c0_i32_0 = arith.constant 0 : i32
    %c0_i32_1 = arith.constant 0 : i32
    %c0_i32_2 = arith.constant 0 : i32
    return %c0_i32, %c0_i32_0, %c0_i32_1 : i32, i32, i32
  }
  func.func @transform_7(%arg0: i32) -> (i32, i32, i32, i32) {
    %c0_i32 = arith.constant 0 : i32
    %c0_i32_0 = arith.constant 0 : i32
    %c0_i32_1 = arith.constant 0 : i32
    %c0_i32_2 = arith.constant 0 : i32
    return %arg0, %c0_i32, %c0_i32_0, %c0_i32_1 : i32, i32, i32, i32
  }
}

module attributes {stable_mosaic.version = 11 : i64} {
  func.func @kernel(%arg0: i32, %arg1: memref<4x8x8x128xf32, #tpu.memory_space<vmem>>, %arg2: memref<1x128xf32, #tpu.memory_space<vmem>>, %arg3: memref<1x128xf32, #tpu.memory_space<vmem>>, %arg4: memref<9x128x128xbf16, #tpu.memory_space<vmem>>, %arg5: memref<1x128xf32, #tpu.memory_space<vmem>>, %arg6: memref<1x128xf32, #tpu.memory_space<vmem>>, %arg7: memref<9x128x128xbf16, #tpu.memory_space<vmem>>, %arg8: memref<128x128xbf16, #tpu.memory_space<vmem>>, %arg9: memref<1x8x8x128xf32, #tpu.memory_space<vmem>>, %arg10: memref<4x9x9x128xf32, #tpu.memory_space<vmem>>, %arg11: memref<10x10x128xf32, #tpu.memory_space<vmem>>) attributes {dimension_semantics = [#tpu.dimension_semantics<parallel>], iteration_bounds = array<i64: 2>, scalar_prefetch = 0 : i64, scratch_operands = 2 : i64, tpu.core_type = #tpu.core_type<tc>, window_params = [{transform_indices = @transform_0, window_bounds = array<i64: 4, 8, 8, 128>}, {pipeline_mode = #tpu.pipeline_mode<synchronous>, transform_indices = @transform_1, window_bounds = array<i64: 1, 128>}, {pipeline_mode = #tpu.pipeline_mode<synchronous>, transform_indices = @transform_2, window_bounds = array<i64: 1, 128>}, {pipeline_mode = #tpu.pipeline_mode<synchronous>, transform_indices = @transform_3, window_bounds = array<i64: 9, 128, 128>}, {pipeline_mode = #tpu.pipeline_mode<synchronous>, transform_indices = @transform_4, window_bounds = array<i64: 1, 128>}, {pipeline_mode = #tpu.pipeline_mode<synchronous>, transform_indices = @transform_5, window_bounds = array<i64: 1, 128>}, {pipeline_mode = #tpu.pipeline_mode<synchronous>, transform_indices = @transform_6, window_bounds = array<i64: 9, 128, 128>}, {pipeline_mode = #tpu.pipeline_mode<synchronous>, transform_indices = @transform_7, window_bounds = array<i64: 128, 128>}, {transform_indices = @transform_8, window_bounds = array<i64: 1, 8, 8, 128>}]} {
    %cst = arith.constant 0.000000e+00 : f32
    %0 = vector.broadcast %cst : f32 to vector<4x9x9x128xf32>
    %c0 = arith.constant 0 : index
    %c0_0 = arith.constant 0 : index
    %c0_1 = arith.constant 0 : index
    %c0_2 = arith.constant 0 : index
    %1 = vector.load %arg10[%c0, %c0_0, %c0_1, %c0_2] : memref<4x9x9x128xf32, #tpu.memory_space<vmem>>, vector<4x9x9x128xf32>
    tpu.vector_store %arg10[%c0, %c0_0, %c0_1, %c0_2], %0 {strides = array<i32>} : memref<4x9x9x128xf32, #tpu.memory_space<vmem>>, vector<4x9x9x128xf32>,
    %c0_3 = arith.constant 0 : index
    %c0_4 = arith.constant 0 : index
    %c0_5 = arith.constant 0 : index
    %c0_6 = arith.constant 0 : index
    %2 = vector.load %arg1[%c0_3, %c0_4, %c0_5, %c0_6] : memref<4x8x8x128xf32, #tpu.memory_space<vmem>>, vector<4x8x8x128xf32>
    %c0_7 = arith.constant 0 : index
    %c0_8 = arith.constant 0 : index
    %3 = vector.load %arg2[%c0_7, %c0_8] : memref<1x128xf32, #tpu.memory_space<vmem>>, vector<1x128xf32>
    %4 = vector.shape_cast %3 : vector<1x128xf32> to vector<1x1x1x128xf32>
    %5 = vector.broadcast %4 : vector<1x1x1x128xf32> to vector<4x8x8x128xf32>
    %6 = arith.mulf %2, %5 : vector<4x8x8x128xf32>
    %c0_9 = arith.constant 0 : index
    %c0_10 = arith.constant 0 : index
    %7 = vector.load %arg3[%c0_9, %c0_10] : memref<1x128xf32, #tpu.memory_space<vmem>>, vector<1x128xf32>
    %8 = vector.shape_cast %7 : vector<1x128xf32> to vector<1x1x1x128xf32>
    %9 = vector.broadcast %8 : vector<1x1x1x128xf32> to vector<4x8x8x128xf32>
    %10 = arith.addf %6, %9 : vector<4x8x8x128xf32>
    %cst_11 = arith.constant 0.000000e+00 : f32
    %11 = vector.broadcast %cst_11 : f32 to vector<4x8x8x128xf32>
    %12 = arith.maximumf %10, %11 : vector<4x8x8x128xf32>
    %c0_12 = arith.constant 0 : index
    %c1 = arith.constant 1 : index
    %c1_13 = arith.constant 1 : index
    %c0_14 = arith.constant 0 : index
    %13 = vector.load %arg10[%c0_12, %c1, %c1_13, %c0_14] : memref<4x9x9x128xf32, #tpu.memory_space<vmem>>, vector<4x8x8x128xf32>
    tpu.vector_store %arg10[%c0_12, %c1, %c1_13, %c0_14], %12 {strides = array<i32>} : memref<4x9x9x128xf32, #tpu.memory_space<vmem>>, vector<4x8x8x128xf32>,
    %cst_15 = arith.constant 0.000000e+00 : f32
    %14 = vector.broadcast %cst_15 : f32 to vector<64x128xf32>
    %c3 = arith.constant 3 : index
    %c0_16 = arith.constant 0 : index
    %c0_17 = arith.constant 0 : index
    %c0_18 = arith.constant 0 : index
    %15 = vector.load %arg10[%c3, %c0_16, %c0_17, %c0_18] : memref<4x9x9x128xf32, #tpu.memory_space<vmem>>, vector<1x8x8x128xf32>
    %16 = vector.shape_cast %15 : vector<1x8x8x128xf32> to vector<8x8x128xf32>
    %17 = vector.shape_cast %16 : vector<8x8x128xf32> to vector<64x128xf32>
    %18 = arith.truncf %17 : vector<64x128xf32> to vector<64x128xbf16>
    %c0_19 = arith.constant 0 : index
    %c0_20 = arith.constant 0 : index
    %c0_21 = arith.constant 0 : index
    %19 = vector.load %arg4[%c0_19, %c0_20, %c0_21] : memref<9x128x128xbf16, #tpu.memory_space<vmem>>, vector<1x128x128xbf16>
    %20 = vector.shape_cast %19 : vector<1x128x128xbf16> to vector<128x128xbf16>
    %cst_22 = arith.constant dense<0.000000e+00> : vector<64x128xf32>
    %21 = tpu.matmul %18, %20, %cst_22 {dimension_numbers = #tpu.dot_dimension_numbers<[1], [0], [0], [1], [0, 0, 1, 1], [], []>} : vector<64x128xbf16>, vector<128x128xbf16>, vector<64x128xf32> -> vector<64x128xf32>
    %22 = arith.addf %14, %21 : vector<64x128xf32>
    %c2 = arith.constant 2 : index
    %c0_23 = arith.constant 0 : index
    %c1_24 = arith.constant 1 : index
    %c0_25 = arith.constant 0 : index
    %23 = vector.load %arg10[%c2, %c0_23, %c1_24, %c0_25] : memref<4x9x9x128xf32, #tpu.memory_space<vmem>>, vector<1x8x8x128xf32>
    %24 = vector.shape_cast %23 : vector<1x8x8x128xf32> to vector<8x8x128xf32>
    %25 = vector.shape_cast %24 : vector<8x8x128xf32> to vector<64x128xf32>
    %26 = arith.truncf %25 : vector<64x128xf32> to vector<64x128xbf16>
    %c1_26 = arith.constant 1 : index
    %c0_27 = arith.constant 0 : index
    %c0_28 = arith.constant 0 : index
    %27 = vector.load %arg4[%c1_26, %c0_27, %c0_28] : memref<9x128x128xbf16, #tpu.memory_space<vmem>>, vector<1x128x128xbf16>
    %28 = vector.shape_cast %27 : vector<1x128x128xbf16> to vector<128x128xbf16>
    %cst_29 = arith.constant dense<0.000000e+00> : vector<64x128xf32>
    %29 = tpu.matmul %26, %28, %cst_29 {dimension_numbers = #tpu.dot_dimension_numbers<[1], [0], [0], [1], [0, 0, 1, 1], [], []>} : vector<64x128xbf16>, vector<128x128xbf16>, vector<64x128xf32> -> vector<64x128xf32>
    %30 = arith.addf %22, %29 : vector<64x128xf32>
    %c3_30 = arith.constant 3 : index
    %c0_31 = arith.constant 0 : index
    %c1_32 = arith.constant 1 : index
    %c0_33 = arith.constant 0 : index
    %31 = vector.load %arg10[%c3_30, %c0_31, %c1_32, %c0_33] : memref<4x9x9x128xf32, #tpu.memory_space<vmem>>, vector<1x8x8x128xf32>
    %32 = vector.shape_cast %31 : vector<1x8x8x128xf32> to vector<8x8x128xf32>
    %33 = vector.shape_cast %32 : vector<8x8x128xf32> to vector<64x128xf32>
    %34 = arith.truncf %33 : vector<64x128xf32> to vector<64x128xbf16>
    %c2_34 = arith.constant 2 : index
    %c0_35 = arith.constant 0 : index
    %c0_36 = arith.constant 0 : index
    %35 = vector.load %arg4[%c2_34, %c0_35, %c0_36] : memref<9x128x128xbf16, #tpu.memory_space<vmem>>, vector<1x128x128xbf16>
    %36 = vector.shape_cast %35 : vector<1x128x128xbf16> to vector<128x128xbf16>
    %cst_37 = arith.constant dense<0.000000e+00> : vector<64x128xf32>
    %37 = tpu.matmul %34, %36, %cst_37 {dimension_numbers = #tpu.dot_dimension_numbers<[1], [0], [0], [1], [0, 0, 1, 1], [], []>} : vector<64x128xbf16>, vector<128x128xbf16>, vector<64x128xf32> -> vector<64x128xf32>
    %38 = arith.addf %30, %37 : vector<64x128xf32>
    %c1_38 = arith.constant 1 : index
    %c1_39 = arith.constant 1 : index
    %c0_40 = arith.constant 0 : index
    %c0_41 = arith.constant 0 : index
    %39 = vector.load %arg10[%c1_38, %c1_39, %c0_40, %c0_41] : memref<4x9x9x128xf32, #tpu.memory_space<vmem>>, vector<1x8x8x128xf32>
    %40 = vector.shape_cast %39 : vector<1x8x8x128xf32> to vector<8x8x128xf32>
    %41 = vector.shape_cast %40 : vector<8x8x128xf32> to vector<64x128xf32>
    %42 = arith.truncf %41 : vector<64x128xf32> to vector<64x128xbf16>
    %c3_42 = arith.constant 3 : index
    %c0_43 = arith.constant 0 : index
    %c0_44 = arith.constant 0 : index
    %43 = vector.load %arg4[%c3_42, %c0_43, %c0_44] : memref<9x128x128xbf16, #tpu.memory_space<vmem>>, vector<1x128x128xbf16>
    %44 = vector.shape_cast %43 : vector<1x128x128xbf16> to vector<128x128xbf16>
    %cst_45 = arith.constant dense<0.000000e+00> : vector<64x128xf32>
    %45 = tpu.matmul %42, %44, %cst_45 {dimension_numbers = #tpu.dot_dimension_numbers<[1], [0], [0], [1], [0, 0, 1, 1], [], []>} : vector<64x128xbf16>, vector<128x128xbf16>, vector<64x128xf32> -> vector<64x128xf32>
    %46 = arith.addf %38, %45 : vector<64x128xf32>
    %c0_46 = arith.constant 0 : index
    %c1_47 = arith.constant 1 : index
    %c1_48 = arith.constant 1 : index
    %c0_49 = arith.constant 0 : index
    %47 = vector.load %arg10[%c0_46, %c1_47, %c1_48, %c0_49] : memref<4x9x9x128xf32, #tpu.memory_space<vmem>>, vector<1x8x8x128xf32>
    %48 = vector.shape_cast %47 : vector<1x8x8x128xf32> to vector<8x8x128xf32>
    %49 = vector.shape_cast %48 : vector<8x8x128xf32> to vector<64x128xf32>
    %50 = arith.truncf %49 : vector<64x128xf32> to vector<64x128xbf16>
    %c4 = arith.constant 4 : index
    %c0_50 = arith.constant 0 : index
    %c0_51 = arith.constant 0 : index
    %51 = vector.load %arg4[%c4, %c0_50, %c0_51] : memref<9x128x128xbf16, #tpu.memory_space<vmem>>, vector<1x128x128xbf16>
    %52 = vector.shape_cast %51 : vector<1x128x128xbf16> to vector<128x128xbf16>
    %cst_52 = arith.constant dense<0.000000e+00> : vector<64x128xf32>
    %53 = tpu.matmul %50, %52, %cst_52 {dimension_numbers = #tpu.dot_dimension_numbers<[1], [0], [0], [1], [0, 0, 1, 1], [], []>} : vector<64x128xbf16>, vector<128x128xbf16>, vector<64x128xf32> -> vector<64x128xf32>
    %54 = arith.addf %46, %53 : vector<64x128xf32>
    %c1_53 = arith.constant 1 : index
    %c1_54 = arith.constant 1 : index
    %c1_55 = arith.constant 1 : index
    %c0_56 = arith.constant 0 : index
    %55 = vector.load %arg10[%c1_53, %c1_54, %c1_55, %c0_56] : memref<4x9x9x128xf32, #tpu.memory_space<vmem>>, vector<1x8x8x128xf32>
    %56 = vector.shape_cast %55 : vector<1x8x8x128xf32> to vector<8x8x128xf32>
    %57 = vector.shape_cast %56 : vector<8x8x128xf32> to vector<64x128xf32>
    %58 = arith.truncf %57 : vector<64x128xf32> to vector<64x128xbf16>
    %c5 = arith.constant 5 : index
    %c0_57 = arith.constant 0 : index
    %c0_58 = arith.constant 0 : index
    %59 = vector.load %arg4[%c5, %c0_57, %c0_58] : memref<9x128x128xbf16, #tpu.memory_space<vmem>>, vector<1x128x128xbf16>
    %60 = vector.shape_cast %59 : vector<1x128x128xbf16> to vector<128x128xbf16>
    %cst_59 = arith.constant dense<0.000000e+00> : vector<64x128xf32>
    %61 = tpu.matmul %58, %60, %cst_59 {dimension_numbers = #tpu.dot_dimension_numbers<[1], [0], [0], [1], [0, 0, 1, 1], [], []>} : vector<64x128xbf16>, vector<128x128xbf16>, vector<64x128xf32> -> vector<64x128xf32>
    %62 = arith.addf %54, %61 : vector<64x128xf32>
    %c3_60 = arith.constant 3 : index
    %c1_61 = arith.constant 1 : index
    %c0_62 = arith.constant 0 : index
    %c0_63 = arith.constant 0 : index
    %63 = vector.load %arg10[%c3_60, %c1_61, %c0_62, %c0_63] : memref<4x9x9x128xf32, #tpu.memory_space<vmem>>, vector<1x8x8x128xf32>
    %64 = vector.shape_cast %63 : vector<1x8x8x128xf32> to vector<8x8x128xf32>
    %65 = vector.shape_cast %64 : vector<8x8x128xf32> to vector<64x128xf32>
    %66 = arith.truncf %65 : vector<64x128xf32> to vector<64x128xbf16>
    %c6 = arith.constant 6 : index
    %c0_64 = arith.constant 0 : index
    %c0_65 = arith.constant 0 : index
    %67 = vector.load %arg4[%c6, %c0_64, %c0_65] : memref<9x128x128xbf16, #tpu.memory_space<vmem>>, vector<1x128x128xbf16>
    %68 = vector.shape_cast %67 : vector<1x128x128xbf16> to vector<128x128xbf16>
    %cst_66 = arith.constant dense<0.000000e+00> : vector<64x128xf32>
    %69 = tpu.matmul %66, %68, %cst_66 {dimension_numbers = #tpu.dot_dimension_numbers<[1], [0], [0], [1], [0, 0, 1, 1], [], []>} : vector<64x128xbf16>, vector<128x128xbf16>, vector<64x128xf32> -> vector<64x128xf32>
    %70 = arith.addf %62, %69 : vector<64x128xf32>
    %c2_67 = arith.constant 2 : index
    %c1_68 = arith.constant 1 : index
    %c1_69 = arith.constant 1 : index
    %c0_70 = arith.constant 0 : index
    %71 = vector.load %arg10[%c2_67, %c1_68, %c1_69, %c0_70] : memref<4x9x9x128xf32, #tpu.memory_space<vmem>>, vector<1x8x8x128xf32>
    %72 = vector.shape_cast %71 : vector<1x8x8x128xf32> to vector<8x8x128xf32>
    %73 = vector.shape_cast %72 : vector<8x8x128xf32> to vector<64x128xf32>
    %74 = arith.truncf %73 : vector<64x128xf32> to vector<64x128xbf16>
    %c7 = arith.constant 7 : index
    %c0_71 = arith.constant 0 : index
    %c0_72 = arith.constant 0 : index
    %75 = vector.load %arg4[%c7, %c0_71, %c0_72] : memref<9x128x128xbf16, #tpu.memory_space<vmem>>, vector<1x128x128xbf16>
    %76 = vector.shape_cast %75 : vector<1x128x128xbf16> to vector<128x128xbf16>
    %cst_73 = arith.constant dense<0.000000e+00> : vector<64x128xf32>
    %77 = tpu.matmul %74, %76, %cst_73 {dimension_numbers = #tpu.dot_dimension_numbers<[1], [0], [0], [1], [0, 0, 1, 1], [], []>} : vector<64x128xbf16>, vector<128x128xbf16>, vector<64x128xf32> -> vector<64x128xf32>
    %78 = arith.addf %70, %77 : vector<64x128xf32>
    %c3_74 = arith.constant 3 : index
    %c1_75 = arith.constant 1 : index
    %c1_76 = arith.constant 1 : index
    %c0_77 = arith.constant 0 : index
    %79 = vector.load %arg10[%c3_74, %c1_75, %c1_76, %c0_77] : memref<4x9x9x128xf32, #tpu.memory_space<vmem>>, vector<1x8x8x128xf32>
    %80 = vector.shape_cast %79 : vector<1x8x8x128xf32> to vector<8x8x128xf32>
    %81 = vector.shape_cast %80 : vector<8x8x128xf32> to vector<64x128xf32>
    %82 = arith.truncf %81 : vector<64x128xf32> to vector<64x128xbf16>
    %c8 = arith.constant 8 : index
    %c0_78 = arith.constant 0 : index
    %c0_79 = arith.constant 0 : index
    %83 = vector.load %arg4[%c8, %c0_78, %c0_79] : memref<9x128x128xbf16, #tpu.memory_space<vmem>>, vector<1x128x128xbf16>
    %84 = vector.shape_cast %83 : vector<1x128x128xbf16> to vector<128x128xbf16>
    %cst_80 = arith.constant dense<0.000000e+00> : vector<64x128xf32>
    %85 = tpu.matmul %82, %84, %cst_80 {dimension_numbers = #tpu.dot_dimension_numbers<[1], [0], [0], [1], [0, 0, 1, 1], [], []>} : vector<64x128xbf16>, vector<128x128xbf16>, vector<64x128xf32> -> vector<64x128xf32>
    %86 = arith.addf %78, %85 : vector<64x128xf32>
    %c0_81 = arith.constant 0 : index
    %c0_82 = arith.constant 0 : index
    %87 = vector.load %arg5[%c0_81, %c0_82] : memref<1x128xf32, #tpu.memory_space<vmem>>, vector<1x128xf32>
    %88 = vector.broadcast %87 : vector<1x128xf32> to vector<64x128xf32>
    %89 = arith.mulf %86, %88 : vector<64x128xf32>
    %c0_83 = arith.constant 0 : index
    %c0_84 = arith.constant 0 : index
    %90 = vector.load %arg6[%c0_83, %c0_84] : memref<1x128xf32, #tpu.memory_space<vmem>>, vector<1x128xf32>
    %91 = vector.broadcast %90 : vector<1x128xf32> to vector<64x128xf32>
    %92 = arith.addf %89, %91 : vector<64x128xf32>
    %cst_85 = arith.constant 0.000000e+00 : f32
    %93 = vector.broadcast %cst_85 : f32 to vector<64x128xf32>
    %94 = arith.maximumf %92, %93 : vector<64x128xf32>
    %cst_86 = arith.constant 0.000000e+00 : f32
    %95 = vector.broadcast %cst_86 : f32 to vector<10x10x128xf32>
    %c0_87 = arith.constant 0 : index
    %c0_88 = arith.constant 0 : index
    %c0_89 = arith.constant 0 : index
    %96 = vector.load %arg11[%c0_87, %c0_88, %c0_89] : memref<10x10x128xf32, #tpu.memory_space<vmem>>, vector<10x10x128xf32>
    tpu.vector_store %arg11[%c0_87, %c0_88, %c0_89], %95 {strides = array<i32>} : memref<10x10x128xf32, #tpu.memory_space<vmem>>, vector<10x10x128xf32>,
    %97 = vector.shape_cast %94 : vector<64x128xf32> to vector<8x8x128xf32>
    %c1_90 = arith.constant 1 : index
    %c1_91 = arith.constant 1 : index
    %c0_92 = arith.constant 0 : index
    %98 = vector.load %arg11[%c1_90, %c1_91, %c0_92] : memref<10x10x128xf32, #tpu.memory_space<vmem>>, vector<8x8x128xf32>
    tpu.vector_store %arg11[%c1_90, %c1_91, %c0_92], %97 {strides = array<i32>} : memref<10x10x128xf32, #tpu.memory_space<vmem>>, vector<8x8x128xf32>,
    %cst_93 = arith.constant 0.000000e+00 : f32
    %99 = vector.broadcast %cst_93 : f32 to vector<64x128xf32>
    %c0_94 = arith.constant 0 : index
    %c0_95 = arith.constant 0 : index
    %c0_96 = arith.constant 0 : index
    %100 = vector.load %arg11[%c0_94, %c0_95, %c0_96] : memref<10x10x128xf32, #tpu.memory_space<vmem>>, vector<8x8x128xf32>
    %101 = vector.shape_cast %100 : vector<8x8x128xf32> to vector<64x128xf32>
    %102 = arith.truncf %101 : vector<64x128xf32> to vector<64x128xbf16>
    %c0_97 = arith.constant 0 : index
    %c0_98 = arith.constant 0 : index
    %c0_99 = arith.constant 0 : index
    %103 = vector.load %arg7[%c0_97, %c0_98, %c0_99] : memref<9x128x128xbf16, #tpu.memory_space<vmem>>, vector<1x128x128xbf16>
    %104 = vector.shape_cast %103 : vector<1x128x128xbf16> to vector<128x128xbf16>
    %cst_100 = arith.constant dense<0.000000e+00> : vector<64x128xf32>
    %105 = tpu.matmul %102, %104, %cst_100 {dimension_numbers = #tpu.dot_dimension_numbers<[1], [0], [0], [1], [0, 0, 1, 1], [], []>} : vector<64x128xbf16>, vector<128x128xbf16>, vector<64x128xf32> -> vector<64x128xf32>
    %106 = arith.addf %99, %105 : vector<64x128xf32>
    %c0_101 = arith.constant 0 : index
    %c1_102 = arith.constant 1 : index
    %c0_103 = arith.constant 0 : index
    %107 = vector.load %arg11[%c0_101, %c1_102, %c0_103] : memref<10x10x128xf32, #tpu.memory_space<vmem>>, vector<8x8x128xf32>
    %108 = vector.shape_cast %107 : vector<8x8x128xf32> to vector<64x128xf32>
    %109 = arith.truncf %108 : vector<64x128xf32> to vector<64x128xbf16>
    %c1_104 = arith.constant 1 : index
    %c0_105 = arith.constant 0 : index
    %c0_106 = arith.constant 0 : index
    %110 = vector.load %arg7[%c1_104, %c0_105, %c0_106] : memref<9x128x128xbf16, #tpu.memory_space<vmem>>, vector<1x128x128xbf16>
    %111 = vector.shape_cast %110 : vector<1x128x128xbf16> to vector<128x128xbf16>
    %cst_107 = arith.constant dense<0.000000e+00> : vector<64x128xf32>
    %112 = tpu.matmul %109, %111, %cst_107 {dimension_numbers = #tpu.dot_dimension_numbers<[1], [0], [0], [1], [0, 0, 1, 1], [], []>} : vector<64x128xbf16>, vector<128x128xbf16>, vector<64x128xf32> -> vector<64x128xf32>
    %113 = arith.addf %106, %112 : vector<64x128xf32>
    %c0_108 = arith.constant 0 : index
    %c2_109 = arith.constant 2 : index
    %c0_110 = arith.constant 0 : index
    %114 = vector.load %arg11[%c0_108, %c2_109, %c0_110] : memref<10x10x128xf32, #tpu.memory_space<vmem>>, vector<8x8x128xf32>
    %115 = vector.shape_cast %114 : vector<8x8x128xf32> to vector<64x128xf32>
    %116 = arith.truncf %115 : vector<64x128xf32> to vector<64x128xbf16>
    %c2_111 = arith.constant 2 : index
    %c0_112 = arith.constant 0 : index
    %c0_113 = arith.constant 0 : index
    %117 = vector.load %arg7[%c2_111, %c0_112, %c0_113] : memref<9x128x128xbf16, #tpu.memory_space<vmem>>, vector<1x128x128xbf16>
    %118 = vector.shape_cast %117 : vector<1x128x128xbf16> to vector<128x128xbf16>
    %cst_114 = arith.constant dense<0.000000e+00> : vector<64x128xf32>
    %119 = tpu.matmul %116, %118, %cst_114 {dimension_numbers = #tpu.dot_dimension_numbers<[1], [0], [0], [1], [0, 0, 1, 1], [], []>} : vector<64x128xbf16>, vector<128x128xbf16>, vector<64x128xf32> -> vector<64x128xf32>
    %120 = arith.addf %113, %119 : vector<64x128xf32>
    %c1_115 = arith.constant 1 : index
    %c0_116 = arith.constant 0 : index
    %c0_117 = arith.constant 0 : index
    %121 = vector.load %arg11[%c1_115, %c0_116, %c0_117] : memref<10x10x128xf32, #tpu.memory_space<vmem>>, vector<8x8x128xf32>
    %122 = vector.shape_cast %121 : vector<8x8x128xf32> to vector<64x128xf32>
    %123 = arith.truncf %122 : vector<64x128xf32> to vector<64x128xbf16>
    %c3_118 = arith.constant 3 : index
    %c0_119 = arith.constant 0 : index
    %c0_120 = arith.constant 0 : index
    %124 = vector.load %arg7[%c3_118, %c0_119, %c0_120] : memref<9x128x128xbf16, #tpu.memory_space<vmem>>, vector<1x128x128xbf16>
    %125 = vector.shape_cast %124 : vector<1x128x128xbf16> to vector<128x128xbf16>
    %cst_121 = arith.constant dense<0.000000e+00> : vector<64x128xf32>
    %126 = tpu.matmul %123, %125, %cst_121 {dimension_numbers = #tpu.dot_dimension_numbers<[1], [0], [0], [1], [0, 0, 1, 1], [], []>} : vector<64x128xbf16>, vector<128x128xbf16>, vector<64x128xf32> -> vector<64x128xf32>
    %127 = arith.addf %120, %126 : vector<64x128xf32>
    %c1_122 = arith.constant 1 : index
    %c1_123 = arith.constant 1 : index
    %c0_124 = arith.constant 0 : index
    %128 = vector.load %arg11[%c1_122, %c1_123, %c0_124] : memref<10x10x128xf32, #tpu.memory_space<vmem>>, vector<8x8x128xf32>
    %129 = vector.shape_cast %128 : vector<8x8x128xf32> to vector<64x128xf32>
    %130 = arith.truncf %129 : vector<64x128xf32> to vector<64x128xbf16>
    %c4_125 = arith.constant 4 : index
    %c0_126 = arith.constant 0 : index
    %c0_127 = arith.constant 0 : index
    %131 = vector.load %arg7[%c4_125, %c0_126, %c0_127] : memref<9x128x128xbf16, #tpu.memory_space<vmem>>, vector<1x128x128xbf16>
    %132 = vector.shape_cast %131 : vector<1x128x128xbf16> to vector<128x128xbf16>
    %cst_128 = arith.constant dense<0.000000e+00> : vector<64x128xf32>
    %133 = tpu.matmul %130, %132, %cst_128 {dimension_numbers = #tpu.dot_dimension_numbers<[1], [0], [0], [1], [0, 0, 1, 1], [], []>} : vector<64x128xbf16>, vector<128x128xbf16>, vector<64x128xf32> -> vector<64x128xf32>
    %134 = arith.addf %127, %133 : vector<64x128xf32>
    %c1_129 = arith.constant 1 : index
    %c2_130 = arith.constant 2 : index
    %c0_131 = arith.constant 0 : index
    %135 = vector.load %arg11[%c1_129, %c2_130, %c0_131] : memref<10x10x128xf32, #tpu.memory_space<vmem>>, vector<8x8x128xf32>
    %136 = vector.shape_cast %135 : vector<8x8x128xf32> to vector<64x128xf32>
    %137 = arith.truncf %136 : vector<64x128xf32> to vector<64x128xbf16>
    %c5_132 = arith.constant 5 : index
    %c0_133 = arith.constant 0 : index
    %c0_134 = arith.constant 0 : index
    %138 = vector.load %arg7[%c5_132, %c0_133, %c0_134] : memref<9x128x128xbf16, #tpu.memory_space<vmem>>, vector<1x128x128xbf16>
    %139 = vector.shape_cast %138 : vector<1x128x128xbf16> to vector<128x128xbf16>
    %cst_135 = arith.constant dense<0.000000e+00> : vector<64x128xf32>
    %140 = tpu.matmul %137, %139, %cst_135 {dimension_numbers = #tpu.dot_dimension_numbers<[1], [0], [0], [1], [0, 0, 1, 1], [], []>} : vector<64x128xbf16>, vector<128x128xbf16>, vector<64x128xf32> -> vector<64x128xf32>
    %141 = arith.addf %134, %140 : vector<64x128xf32>
    %c2_136 = arith.constant 2 : index
    %c0_137 = arith.constant 0 : index
    %c0_138 = arith.constant 0 : index
    %142 = vector.load %arg11[%c2_136, %c0_137, %c0_138] : memref<10x10x128xf32, #tpu.memory_space<vmem>>, vector<8x8x128xf32>
    %143 = vector.shape_cast %142 : vector<8x8x128xf32> to vector<64x128xf32>
    %144 = arith.truncf %143 : vector<64x128xf32> to vector<64x128xbf16>
    %c6_139 = arith.constant 6 : index
    %c0_140 = arith.constant 0 : index
    %c0_141 = arith.constant 0 : index
    %145 = vector.load %arg7[%c6_139, %c0_140, %c0_141] : memref<9x128x128xbf16, #tpu.memory_space<vmem>>, vector<1x128x128xbf16>
    %146 = vector.shape_cast %145 : vector<1x128x128xbf16> to vector<128x128xbf16>
    %cst_142 = arith.constant dense<0.000000e+00> : vector<64x128xf32>
    %147 = tpu.matmul %144, %146, %cst_142 {dimension_numbers = #tpu.dot_dimension_numbers<[1], [0], [0], [1], [0, 0, 1, 1], [], []>} : vector<64x128xbf16>, vector<128x128xbf16>, vector<64x128xf32> -> vector<64x128xf32>
    %148 = arith.addf %141, %147 : vector<64x128xf32>
    %c2_143 = arith.constant 2 : index
    %c1_144 = arith.constant 1 : index
    %c0_145 = arith.constant 0 : index
    %149 = vector.load %arg11[%c2_143, %c1_144, %c0_145] : memref<10x10x128xf32, #tpu.memory_space<vmem>>, vector<8x8x128xf32>
    %150 = vector.shape_cast %149 : vector<8x8x128xf32> to vector<64x128xf32>
    %151 = arith.truncf %150 : vector<64x128xf32> to vector<64x128xbf16>
    %c7_146 = arith.constant 7 : index
    %c0_147 = arith.constant 0 : index
    %c0_148 = arith.constant 0 : index
    %152 = vector.load %arg7[%c7_146, %c0_147, %c0_148] : memref<9x128x128xbf16, #tpu.memory_space<vmem>>, vector<1x128x128xbf16>
    %153 = vector.shape_cast %152 : vector<1x128x128xbf16> to vector<128x128xbf16>
    %cst_149 = arith.constant dense<0.000000e+00> : vector<64x128xf32>
    %154 = tpu.matmul %151, %153, %cst_149 {dimension_numbers = #tpu.dot_dimension_numbers<[1], [0], [0], [1], [0, 0, 1, 1], [], []>} : vector<64x128xbf16>, vector<128x128xbf16>, vector<64x128xf32> -> vector<64x128xf32>
    %155 = arith.addf %148, %154 : vector<64x128xf32>
    %c2_150 = arith.constant 2 : index
    %c2_151 = arith.constant 2 : index
    %c0_152 = arith.constant 0 : index
    %156 = vector.load %arg11[%c2_150, %c2_151, %c0_152] : memref<10x10x128xf32, #tpu.memory_space<vmem>>, vector<8x8x128xf32>
    %157 = vector.shape_cast %156 : vector<8x8x128xf32> to vector<64x128xf32>
    %158 = arith.truncf %157 : vector<64x128xf32> to vector<64x128xbf16>
    %c8_153 = arith.constant 8 : index
    %c0_154 = arith.constant 0 : index
    %c0_155 = arith.constant 0 : index
    %159 = vector.load %arg7[%c8_153, %c0_154, %c0_155] : memref<9x128x128xbf16, #tpu.memory_space<vmem>>, vector<1x128x128xbf16>
    %160 = vector.shape_cast %159 : vector<1x128x128xbf16> to vector<128x128xbf16>
    %cst_156 = arith.constant dense<0.000000e+00> : vector<64x128xf32>
    %161 = tpu.matmul %158, %160, %cst_156 {dimension_numbers = #tpu.dot_dimension_numbers<[1], [0], [0], [1], [0, 0, 1, 1], [], []>} : vector<64x128xbf16>, vector<128x128xbf16>, vector<64x128xf32> -> vector<64x128xf32>
    %162 = arith.addf %155, %161 : vector<64x128xf32>
    %c0_157 = arith.constant 0 : index
    %c1_158 = arith.constant 1 : index
    %c1_159 = arith.constant 1 : index
    %c0_160 = arith.constant 0 : index
    %163 = vector.load %arg10[%c0_157, %c1_158, %c1_159, %c0_160] : memref<4x9x9x128xf32, #tpu.memory_space<vmem>>, vector<1x8x8x128xf32>
    %164 = vector.shape_cast %163 : vector<1x8x8x128xf32> to vector<8x8x128xf32>
    %165 = vector.shape_cast %164 : vector<8x8x128xf32> to vector<64x128xf32>
    %166 = arith.truncf %165 : vector<64x128xf32> to vector<64x128xbf16>
    %c0_161 = arith.constant 0 : index
    %c0_162 = arith.constant 0 : index
    %167 = vector.load %arg8[%c0_161, %c0_162] : memref<128x128xbf16, #tpu.memory_space<vmem>>, vector<128x128xbf16>
    %cst_163 = arith.constant dense<0.000000e+00> : vector<64x128xf32>
    %168 = tpu.matmul %166, %167, %cst_163 {dimension_numbers = #tpu.dot_dimension_numbers<[1], [0], [0], [1], [0, 0, 1, 1], [], []>} : vector<64x128xbf16>, vector<128x128xbf16>, vector<64x128xf32> -> vector<64x128xf32>
    %169 = arith.addf %162, %168 : vector<64x128xf32>
    %170 = vector.shape_cast %169 : vector<64x128xf32> to vector<1x8x8x128xf32>
    %c0_164 = arith.constant 0 : index
    %c0_165 = arith.constant 0 : index
    %c0_166 = arith.constant 0 : index
    %c0_167 = arith.constant 0 : index
    %171 = vector.load %arg9[%c0_164, %c0_165, %c0_166, %c0_167] : memref<1x8x8x128xf32, #tpu.memory_space<vmem>>, vector<1x8x8x128xf32>
    tpu.vector_store %arg9[%c0_164, %c0_165, %c0_166, %c0_167], %170 {strides = array<i32>} : memref<1x8x8x128xf32, #tpu.memory_space<vmem>>, vector<1x8x8x128xf32>,
    return
  }
  func.func @transform_0(%arg0: i32) -> (i32, i32, i32, i32) {
    %c0_i32 = arith.constant 0 : i32
    %c0_i32_0 = arith.constant 0 : i32
    %c0_i32_1 = arith.constant 0 : i32
    %c0_i32_2 = arith.constant 0 : i32
    return %arg0, %c0_i32, %c0_i32_0, %c0_i32_1 : i32, i32, i32, i32
  }
  func.func @transform_1(%arg0: i32) -> (i32, i32) {
    %c0_i32 = arith.constant 0 : i32
    %c0_i32_0 = arith.constant 0 : i32
    %c0_i32_1 = arith.constant 0 : i32
    return %c0_i32, %c0_i32_0 : i32, i32
  }
  func.func @transform_2(%arg0: i32) -> (i32, i32) {
    %c0_i32 = arith.constant 0 : i32
    %c0_i32_0 = arith.constant 0 : i32
    %c0_i32_1 = arith.constant 0 : i32
    return %c0_i32, %c0_i32_0 : i32, i32
  }
  func.func @transform_3(%arg0: i32) -> (i32, i32, i32) {
    %c0_i32 = arith.constant 0 : i32
    %c0_i32_0 = arith.constant 0 : i32
    %c0_i32_1 = arith.constant 0 : i32
    %c0_i32_2 = arith.constant 0 : i32
    return %c0_i32, %c0_i32_0, %c0_i32_1 : i32, i32, i32
  }
  func.func @transform_4(%arg0: i32) -> (i32, i32) {
    %c0_i32 = arith.constant 0 : i32
    %c0_i32_0 = arith.constant 0 : i32
    %c0_i32_1 = arith.constant 0 : i32
    return %c0_i32, %c0_i32_0 : i32, i32
  }
  func.func @transform_5(%arg0: i32) -> (i32, i32) {
    %c0_i32 = arith.constant 0 : i32
    %c0_i32_0 = arith.constant 0 : i32
    %c0_i32_1 = arith.constant 0 : i32
    return %c0_i32, %c0_i32_0 : i32, i32
  }
  func.func @transform_6(%arg0: i32) -> (i32, i32, i32) {
    %c0_i32 = arith.constant 0 : i32
    %c0_i32_0 = arith.constant 0 : i32
    %c0_i32_1 = arith.constant 0 : i32
    %c0_i32_2 = arith.constant 0 : i32
    return %c0_i32, %c0_i32_0, %c0_i32_1 : i32, i32, i32
  }
  func.func @transform_7(%arg0: i32) -> (i32, i32) {
    %c0_i32 = arith.constant 0 : i32
    %c0_i32_0 = arith.constant 0 : i32
    %c0_i32_1 = arith.constant 0 : i32
    return %c0_i32, %c0_i32_0 : i32, i32
  }
  func.func @transform_8(%arg0: i32) -> (i32, i32, i32, i32) {
    %c0_i32 = arith.constant 0 : i32
    %c0_i32_0 = arith.constant 0 : i32
    %c0_i32_1 = arith.constant 0 : i32
    %c0_i32_2 = arith.constant 0 : i32
    return %arg0, %c0_i32, %c0_i32_0, %c0_i32_1 : i32, i32, i32, i32
  }
}

</mosaic_0001>

<bundles_post_ra>
// kernel: _lambda_.3
= control target key start
LH: loop header
LB: loop body
LE: loop exit
PB: predicated region body
PF: predicated region fallthrough
CT: control target
= control target key end

     0   :  { %s4437_s24 = smov 0   ;;  %s5381_s0 = inlined_call_operand.vmem [shape: f32[2,8,8,128], index: 0, kind: input, shape index: {}]   ;;  %s5382_s1 = inlined_call_operand.vmem [shape: f32[1,128], index: 1, kind: input, shape index: {}]   ;;  %s5383_s2 = inlined_call_operand.vmem [shape: f32[1,128], index: 2, kind: input, shape index: {}]   ;;  %s5384_s3 = inlined_call_operand.vmem [shape: bf16[9,128,128], index: 3, kind: input, shape index: {}]   ;;  %s5385_s4 = inlined_call_operand.vmem [shape: f32[1,128], index: 4, kind: input, shape index: {}]   ;;  %s5386_s5 = inlined_call_operand.vmem [shape: f32[1,128], index: 5, kind: input, shape index: {}]   ;;  %s5387_s6 = inlined_call_operand.vmem [shape: bf16[9,128,128], index: 6, kind: input, shape index: {}]   ;;  %s5388_s7 = inlined_call_operand.vmem [shape: f32[2,8,8,128], index: 7, kind: output, shape index: {}]  }
   0x1 LB: > { %s3169_s25 = sadd.s32 4294967295, %s4394_s24   ;;  %p3173_p0 = scmp.ge.s32.totalorder %s4394_s24, 1  ;;  %s4394_s24 = sphi %s4437_s24, %s17_s24  }
   0x2   : > { %p237_p1 = scmp.lt.s32.totalorder %s4394_s24, 3 }
   0x4   : > { %p238_p2 = pnand %p3173_p0, %p237_p1 }
   0x6   : > { %241 = sbr.rel (%p238_p2) target bundleno = 723 (0x2d3), region = 48 }
   0xb   : > { %v4243_v0 = vld [vmem:[%s5384_s3 + $0x78] sm:$0xff]   ;;  %v4245_v2 = vld [vmem:[%s5384_s3 + $0x70] sm:$0xff]   ;;  %p4456_p3 = scmp.lt.s32.totalorder %s3169_s25, 1  ;;  %v4396_v3 = vmov 0.0   ;;  %v4247_v5 = vld [vmem:[%s5384_s3 + $0x68] sm:$0xff]  }
   0xc   : > { %v4244_v1 = vld [vmem:[%s5384_s3 + $0x38] sm:$0xff]   ;;  %3802 = vmatprep.subr.bf16.mxu0 %v4243_v0  ;;  %280 = vst [vmem:[#allocation2] sm:$0xff] %v4396_v3  ;;  %281 = vst [vmem:[#allocation2 + $0x8] sm:$0x3] %v4396_v3  ;;  %v4246_v4 = vld [vmem:[%s5384_s3 + $0x30] sm:$0xff]  }
   0xd   : > { %282 = vst [vmem:[#allocation2 + $0x10] sm:$0xff] %v4396_v3  ;;  %283 = vst [vmem:[#allocation2 + $0x18] sm:$0x3] %v4396_v3  ;;  %3826 = vmatprep.subr.bf16.mxu1 %v4244_v1  ;;  %3803 = vmatpush3.bf16.msra.mxu0 %v4243_v0  ;;  %v4248_v6 = vld [vmem:[%s5384_s3 + $0x28] sm:$0xff]   ;;  %s5431_s25 = smov (!%p4456_p3, %s3169_s25), 1  ;;  %v4249_v7 = vld [vmem:[%s5384_s3 + $0x60] sm:$0xff]  }
   0xe   : > { %284 = vst [vmem:[#allocation2 + $0x20] sm:$0xff] %v4396_v3  ;;  %285 = vst [vmem:[#allocation2 + $0x28] sm:$0x3] %v4396_v3  ;;  %3827 = vmatpush3.bf16.msra.mxu1 %v4244_v1  ;;  %3804 = vmatprep.subr.bf16.mxu0 %v4245_v2  ;;  %v4250_v8 = vld [vmem:[%s5384_s3 + $0x20] sm:$0xff]   ;;  %s3584_s20 = sshll.u32 %s5431_s25, 6  ;;  %v4251_v9 = vld [vmem:[%s5384_s3 + $0x58] sm:$0xff]  }
   0xf   : > { %286 = vst [vmem:[#allocation2 + $0x30] sm:$0xff] %v4396_v3  ;;  %287 = vst [vmem:[#allocation2 + $0x38] sm:$0x3] %v4396_v3  ;;  %3828 = vmatprep.subr.bf16.mxu1 %v4246_v4  ;;  %v4252_v10 = vld [vmem:[%s5384_s3 + $0x18] sm:$0xff]   ;;  %s4533_s29 = scalar_lea.vmem %s5381_s0, %s3584_s20  ;;  %v4253_v11 = vld [vmem:[%s5384_s3 + $0x50] sm:$0xff]   ;;  %s5352_s19 = scalar_lea.vmem %s5388_s7, %s3584_s20 }
  0x10   : > { %288 = vst [vmem:[#allocation2 + $0x40] sm:$0xff] %v4396_v3  ;;  %289 = vst [vmem:[#allocation2 + $0x48] sm:$0x3] %v4396_v3  ;;  %v300_v12 = vld [vmem:[%s4533_s29] sm:$0xff]  ;;  %v4254_v15 = vld [vmem:[%s5384_s3 + $0x10] sm:$0xff]  }
  0x11   : > { %290 = vst [vmem:[#allocation2 + $0x50] sm:$0xff] %v4396_v3  ;;  %291 = vst [vmem:[#allocation2 + $0x58] sm:$0x3] %v4396_v3  ;;  %3805 = vmatpush3.bf16.msra.mxu0 %v4245_v2  ;;  %v4542_v13 = vld [vmem:[%s5382_s1] ss:$0 sm:$0xff]  ;;  %v301_v17 = vld [vmem:[%s4533_s29 + $0x8] sm:$0xff] }
  0x12   : > { %292 = vst [vmem:[#allocation2 + $0x60] sm:$0xff] %v4396_v3  ;;  %293 = vst [vmem:[#allocation2 + $0x68] sm:$0x3] %v4396_v3  ;;  %3829 = vmatpush3.bf16.msra.mxu1 %v4246_v4  ;;  %3806 = vmatprep.subr.bf16.mxu0 %v4247_v5  ;;  %v4547_v14 = vld [vmem:[%s5383_s2] ss:$0 sm:$0xff]  ;;  %v315_v16 = vmul.f32 %v4542_v13, %v300_v12  ;;  %v302_v18 = vld [vmem:[%s4533_s29 + $0x10] sm:$0xff]  ;;  %v316_v19 = vmul.f32 %v4542_v13, %v301_v17 }
  0x13   : > { %294 = vst [vmem:[#allocation2 + $0x70] sm:$0xff] %v4396_v3  ;;  %295 = vst [vmem:[#allocation2 + $0x78] sm:$0x3] %v4396_v3  ;;  %3830 = vmatprep.subr.bf16.mxu1 %v4248_v6  ;;  %v317_v20 = vmul.f32 %v4542_v13, %v302_v18  ;;  %v4255_v21 = vld [vmem:[%s5384_s3 + $0x48] sm:$0xff]   ;;  %v4257_v31 = vld [vmem:[%s5384_s3 + $0x40] sm:$0xff]  }
  0x14   : > { %296 = vst [vmem:[#allocation2 + $0x80] sm:$0xff] %v4396_v3  ;;  %297 = vst [vmem:[#allocation2 + $0x88] sm:$0x3] %v4396_v3  ;;  %v330_v22 = vadd.f32 %v4547_v14, %v315_v16  ;;  %v383_v23 = vld [vmem:[#allocation2 + $0x1] sm:$0xff]  ;;  %v331_v24 = vadd.f32 %v4547_v14, %v316_v19  ;;  %v4259_v33 = vld [vmem:[%s5384_s3 + $0xb8] sm:$0xff]  }
  0x15   : > { %298 = vst [vmem:[#allocation2 + $0x90] sm:$0xff] %v4396_v3  ;;  %299 = vst [vmem:[#allocation2 + $0x98] sm:$0x3] %v4396_v3  ;;  %3807 = vmatpush3.bf16.msra.mxu0 %v4247_v5  ;;  %v332_v25 = vadd.f32 %v4547_v14, %v317_v20  ;;  %v4256_v26 = vld [vmem:[%s5384_s3 + $0x8] sm:$0xff]   ;;  %v4258_v32 = vld [vmem:[%s5384_s3] sm:$0xff]  }
  0x16   : > { %1727 = vst [vmem:[#allocation3] sm:$0xff] %v4396_v3  ;;  %1728 = vst [vmem:[#allocation3 + $0x8] sm:$0x3] %v4396_v3  ;;  %3831 = vmatpush3.bf16.msra.mxu1 %v4248_v6  ;;  %3808 = vmatprep.subr.bf16.mxu0 %v4249_v7  ;;  %v4566_v27 = vmax.f32 %v330_v22, 0.0  ;;  %v4568_v28 = vmax.f32 %v331_v24, 0.0  ;;  %v303_v34 = vld [vmem:[%s4533_s29 + $0x18] sm:$0xff] }
  0x17   : > { %1729 = vst [vmem:[#allocation3 + $0x10] sm:$0xff] %v4396_v3  ;;  %1730 = vst [vmem:[#allocation3 + $0x18] sm:$0x3] %v4396_v3  ;;  %3832 = vmatprep.subr.bf16.mxu1 %v4250_v8  ;;  %v4570_v29 = vmax.f32 %v332_v25, 0.0  ;;  %v304_v35 = vld [vmem:[%s4533_s29 + $0x20] sm:$0xff]  ;;  %v4260_v36 = vld [vmem:[%s5384_s3 + $0xf8] sm:$0xff]   ;;  %v318_v37 = vmul.f32 %v4542_v13, %v303_v34 }
  0x18   : > { %1731 = vst [vmem:[#allocation3 + $0x20] sm:$0xff] %v4396_v3  ;;  %1732 = vst [vmem:[#allocation3 + $0x28] sm:$0x3] %v4396_v3  ;;  %v391_v30 = vpack.c.bf16 %v4566_v27, %v383_v23  ;;  %v319_v38 = vmul.f32 %v4542_v13, %v304_v35  ;;  %v305_v40 = vld [vmem:[%s4533_s29 + $0x28] sm:$0xff]  ;;  %v306_v41 = vld [vmem:[%s4533_s29 + $0x30] sm:$0xff] }
  0x19   : > { %1733 = vst [vmem:[#allocation3 + $0x30] sm:$0xff] %v4396_v3  ;;  %1734 = vst [vmem:[#allocation3 + $0x38] sm:$0x3] %v4396_v3  ;;  %3809 = vmatpush3.bf16.msra.mxu0 %v4249_v7  ;;  %v4594_v39 = vpack.c.bf16 %v4570_v29, %v4568_v28  ;;  %v333_v43 = vadd.f32 %v4547_v14, %v318_v37  ;;  %v320_v45 = vmul.f32 %v4542_v13, %v305_v40  ;;  %v4261_v51 = vld [vmem:[%s5384_s3 + $0xb0] sm:$0xff]   ;;  %v4263_v60 = vld [vmem:[%s5384_s3 + $0xa8] sm:$0xff]  }
  0x1a   : > { %1735 = vst [vmem:[#allocation3 + $0x40] sm:$0xff] %v4396_v3  ;;  %1736 = vst [vmem:[#allocation3 + $0x48] sm:$0x3] %v4396_v3  ;;  %3833 = vmatpush3.bf16.msra.mxu1 %v4250_v8  ;;  %3810 = vmatprep.subr.bf16.mxu0 %v4251_v9  ;;  %v334_v44 = vadd.f32 %v4547_v14, %v319_v38  ;;  %v321_v46 = vmul.f32 %v4542_v13, %v306_v41  ;;  %v4262_v52 = vld [vmem:[%s5384_s3 + $0xf0] sm:$0xff]   ;;  %v638_v61 = vld [vmem:[#allocation2 + $0x2] sm:$0xff] }
  0x1b   : > { %1737 = vst [vmem:[#allocation3 + $0x50] sm:$0xff] %v4396_v3  ;;  %1738 = vst [vmem:[#allocation3 + $0x58] sm:$0x3] %v4396_v3  ;;  %3834 = vmatprep.subr.bf16.mxu1 %v4252_v10  ;;  %3818 = vmatprep.mubr.bf16.mxu0 %v391_v30  ;;  %v4620_v53 = vmax.f32 %v333_v43, 0.0  ;;  %v335_v55 = vadd.f32 %v4547_v14, %v320_v45  ;;  %v4264_v63 = vld [vmem:[%s5384_s3 + $0xe8] sm:$0xff]   ;;  %v4265_v2 = vld [vmem:[%s5384_s3 + $0xa0] sm:$0xff]  }
  0x1c   : > { %1739 = vst [vmem:[#allocation3 + $0x60] sm:$0xff] %v4396_v3  ;;  %1740 = vst [vmem:[#allocation3 + $0x68] sm:$0x3] %v4396_v3  ;;  %v4622_v54 = vmax.f32 %v334_v44, 0.0  ;;  %v336_v56 = vadd.f32 %v4547_v14, %v321_v46  ;;  %v4266_v4 = vld [vmem:[%s5384_s3 + $0xe0] sm:$0xff]   ;;  %v307_v16 = vld [vmem:[%s4533_s29 + $0x38] sm:$0xff] }
  0x1d   : > { %1741 = vst [vmem:[#allocation3 + $0x70] sm:$0xff] %v4396_v3  ;;  %1742 = vst [vmem:[#allocation3 + $0x78] sm:$0x3] %v4396_v3  ;;  %3811 = vmatpush3.bf16.msra.mxu0 %v4251_v9  ;;  %v4633_v58 = vmax.f32 %v335_v55, 0.0  ;;  %v4267_v9 = vld [vmem:[%s5384_s3 + $0x98] sm:$0xff]   ;;  %v322_v17 = vmul.f32 %v4542_v13, %v307_v16  ;;  %v4269_v18 = vld [vmem:[%s5384_s3 + $0x90] sm:$0xff]  }
  0x1e   : > { %1743 = vst [vmem:[#allocation3 + $0x80] sm:$0xff] %v4396_v3  ;;  %1744 = vst [vmem:[#allocation3 + $0x88] sm:$0x3] %v4396_v3  ;;  %3835 = vmatpush3.bf16.msra.mxu1 %v4252_v10  ;;  %3812 = vmatprep.subr.bf16.mxu0 %v4253_v11  ;;  %v4631_v57 = vpack.c.bf16 %v4622_v54, %v4620_v53  ;;  %v4636_v59 = vmax.f32 %v336_v56, 0.0  ;;  %v4270_v20 = vld [vmem:[%s5384_s3 + $0xd0] sm:$0xff]   ;;  %v4271_v13 = vld [vmem:[%s5384_s3 + $0x88] sm:$0xff]  }
  0x1f   : > { %1745 = vst [vmem:[#allocation3 + $0x90] sm:$0xff] %v4396_v3  ;;  %1746 = vst [vmem:[#allocation3 + $0x98] sm:$0x3] %v4396_v3  ;;  %3836 = vmatprep.subr.bf16.mxu1 %v4254_v15  ;;  %v948_v62 = vpack.c.bf16 %v4633_v58, %v4622_v54  ;;  %v337_v19 = vadd.f32 %v4547_v14, %v322_v17  ;;  %v4272_v14 = vld [vmem:[%s5384_s3 + $0xc8] sm:$0xff]   ;;  %v4273_v22 = vld [vmem:[%s5384_s3 + $0x80] sm:$0xff]  }
  0x20   : > { %347 = vst [vmem:[#allocation2 + $0x11] sm:$0xff] %v4566_v27  ;;  %348 = vst [vmem:[#allocation2 + $0x21] sm:$0xff] %v4568_v28  ;;  %v4653_v1 = vpack.c.bf16 %v4636_v59, %v4633_v58  ;;  %v4274_v23 = vld [vmem:[%s5384_s3 + $0xc0] sm:$0xff]   ;;  %v4276_v30 = vld [vmem:[%s5384_s3 + $0x178] sm:$0xff]  }
  0x21   : > { %3813 = vmatpush3.bf16.msra.mxu0 %v4253_v11  ;;  %349 = vst [vmem:[#allocation2 + $0x31] sm:$0xff] %v4570_v29  ;;  %350 = vst [vmem:[#allocation2 + $0x41] sm:$0xff] %v4620_v53  ;;  %v4268_v11 = vld [vmem:[%s5384_s3 + $0xd8] sm:$0xff]   ;;  %v4277_v35 = vld [vmem:[%s5384_s3 + $0x130] sm:$0xff]  }
  0x22   : > { %3837 = vmatpush3.bf16.msra.mxu1 %v4254_v15  ;;  %3814 = vmatprep.subr.bf16.mxu0 %v4255_v21  ;;  %351 = vst [vmem:[#allocation2 + $0x51] sm:$0xff] %v4622_v54  ;;  %352 = vst [vmem:[#allocation2 + $0x61] sm:$0xff] %v4633_v58  ;;  %v4280_v44 = vld [vmem:[%s5384_s3 + $0x168] sm:$0xff]   ;;  %v4284_v55 = vld [vmem:[%s5384_s3 + $0x158] sm:$0xff]  }
  0x23   : > { %3838 = vmatprep.subr.bf16.mxu1 %v4256_v26  ;;  %353 = vst [vmem:[#allocation2 + $0x71] sm:$0xff] %v4636_v59  ;;  %v4287_v56 = vld [vmem:[%s5384_s3 + $0x108] sm:$0xff]   ;;  %v4298_v16 = vld [vmem:[%s5384_s3 + $0x1e0] sm:$0xff]   ;;  %v4299_v54 = vld [vmem:[%s5384_s3 + $0x198] sm:$0xff]  }
  0x24   : > { %v4300_v58 = vld [vmem:[%s5384_s3 + $0x1d8] sm:$0xff]   ;;  %v4303_v17 = vld [vmem:[%s5384_s3 + $0x188] sm:$0xff]  }
  0x25   : > { %3815 = vmatpush3.bf16.msra.mxu0 %v4255_v21  ;;  %v4698_v21 = vmax.f32 %v337_v19, 0.0  ;;  %v4307_v19 = vld [vmem:[%s5384_s3 + $0x238] sm:$0xff]  }
  0x26   : > { %3839 = vmatpush3.bf16.msra.mxu1 %v4256_v26  ;;  %3816 = vmatprep.subr.bf16.mxu0 %v4257_v31  ;;  %v4275_v26 = vld [vmem:[%s5384_s3 + $0x138] sm:$0xff]  }
  0x27   : > { %3840 = vmatprep.subr.bf16.mxu1 %v4258_v32  ;;  %v4598_v42 = vld [vmem:[#allocation2 + $0x10] sm:$0xff]  ;;  %v4606_v48 = vld [vmem:[#allocation2 + $0x20] sm:$0xff]  ;;  %354 = vst [vmem:[#allocation2 + $0x81] sm:$0xff] %v4698_v21 }
  0x28   : > { %v363_v47 = vpack.c.bf16 %v4598_v42, %v4396_v3  ;;  %v4608_v49 = vld [vmem:[#allocation2 + $0x30] sm:$0xff]  ;;  %v4662_v5 = vld [vmem:[#allocation2 + $0x40] sm:$0xff]  ;;  %v796_v15 = vpack.c.bf16 %v4606_v48, %v4598_v42  ;;  %v4279_v42 = vld [vmem:[%s5384_s3 + $0x128] sm:$0xff]  }
  0x29   : > { %3817 = vmatpush3.bf16.msra.mxu0 %v4257_v31  ;;  %v4612_v50 = vpack.c.bf16 %v4608_v49, %v4606_v48  ;;  %v4649_v0 = vld [vmem:[#allocation2 + $0x12] sm:$0xff]  ;;  %v4671_v8 = vld [vmem:[#allocation2 + $0x60] sm:$0xff]  ;;  %v797_v34 = vpack.c.bf16 %v4662_v5, %v4608_v49  ;;  %v946_v49 = vpack.c.bf16 %v4568_v28, %v4566_v27 }
  0x2a   : > { %3841 = vmatpush3.bf16.msra.mxu1 %v4258_v32  ;;  %3850 = vmatprep.subr.bf16.mxu0 %v4259_v33  ;;  %v646_v3 = vpack.c.bf16 %v4649_v0, %v638_v61  ;;  %v4664_v6 = vld [vmem:[#allocation2 + $0x50] sm:$0xff]  ;;  %v640_v24 = vld [vmem:[#allocation2 + $0x22] sm:$0xff] }
  0x2b   : > { %3842 = vmatprep.mubr.bf16.mxu1 %v363_v47  ;;  %3874 = vmatprep.subr.bf16.mxu1 %v4260_v36  ;;  %v4668_v7 = vpack.c.bf16 %v4664_v6, %v4662_v5  ;;  %v4676_v10 = vld [vmem:[#allocation2 + $0x70] sm:$0xff]  ;;  %v4724_v32 = vld [vmem:[#allocation2 + $0x42] sm:$0xff]  ;;  %v798_v41 = vpack.c.bf16 %v4671_v8, %v4664_v6 }
  0x2c   : > { %3819 = vmatmul.mubr.bf16.vlgmr.msra.gmra.mxu0 %v4594_v39  ;;  %v4684_v12 = vpack.c.bf16 %v4676_v10, %v4671_v8  ;;  %v4713_v25 = vld [vmem:[#allocation2 + $0x32] sm:$0xff]  ;;  %v4740_v38 = vld [vmem:[#allocation2 + $0x62] sm:$0xff] }
  0x2d   : > { %3843 = vmatmul.mubr.bf16.vlgmr.msra.gmra.mxu1 %v4612_v50  ;;  %3851 = vmatpush3.bf16.msra.mxu0 %v4259_v33  ;;  %v4722_v31 = vpack.c.bf16 %v4713_v25, %v640_v24  ;;  %v4726_v33 = vld [vmem:[#allocation2 + $0x52] sm:$0xff]  ;;  %v4281_v47 = vld [vmem:[%s5384_s3 + $0x120] sm:$0xff]   ;;  %v1097_v5 = vpack.c.bf16 %v4724_v32, %v4713_v25 }
  0x2e   : > { %3875 = vmatpush3.bf16.msra.mxu1 %v4260_v36  ;;  %3852 = vmatprep.subr.bf16.mxu0 %v4261_v51  ;;  %v4278_v36 = vld [vmem:[%s5384_s3 + $0x170] sm:$0xff]   ;;  %v4738_v37 = vpack.c.bf16 %v4726_v33, %v4724_v32  ;;  %v4750_v43 = vld [vmem:[#allocation2 + $0x80] sm:$0xff] }
  0x2f   : > { %3876 = vmatprep.subr.bf16.mxu1 %v4262_v52  ;;  %3822 = vmatprep.mubr.bf16.mxu0 %v4631_v57  ;;  %v4743_v40 = vld [vmem:[#allocation2 + $0x72] sm:$0xff]  ;;  %v799_v46 = vpack.c.bf16 %v4750_v43, %v4676_v10  ;;  %v4282_v48 = vld [vmem:[%s5384_s3 + $0x160] sm:$0xff]   ;;  %v949_v10 = vpack.c.bf16 %v4698_v21, %v4636_v59 }
  0x30   : > { %3846 = vmatprep.mubr.bf16.mxu1 %v4668_v7  ;;  %v4758_v45 = vpack.c.bf16 %v4743_v40, %v4740_v38  ;;  %v4285_v27 = vld [vmem:[%s5384_s3 + $0x110] sm:$0xff]   ;;  %v4289_v61 = vld [vmem:[%s5384_s3 + $0x100] sm:$0xff]  }
  0x31   : > { %3853 = vmatpush3.bf16.msra.mxu0 %v4261_v51  ;;  %v1096_v51 = vpack.c.bf16 %v640_v24, %v4649_v0  ;;  %v4286_v28 = vld [vmem:[%s5384_s3 + $0x150] sm:$0xff]   ;;  %v4291_v0 = vld [vmem:[%s5384_s3 + $0x1b8] sm:$0xff]   ;;  %v4817_v8 = vld [vmem:[#allocation2 + $0x82] sm:$0xff] }
  0x32   : > { %3877 = vmatpush3.bf16.msra.mxu1 %v4262_v52  ;;  %3854 = vmatprep.subr.bf16.mxu0 %v4263_v60  ;;  %v4283_v52 = vld [vmem:[%s5384_s3 + $0x118] sm:$0xff]   ;;  %v4294_v6 = vld [vmem:[%s5384_s3 + $0x1f0] sm:$0xff]   ;;  %v4314_v24 = vld [vmem:[%s5384_s3 + $0x200] sm:$0xff]  }
  0x33   : > { %3878 = vmatprep.subr.bf16.mxu1 %v4264_v63  ;;  %v4301_v59 = vld [vmem:[%s5384_s3 + $0x190] sm:$0xff]  }
  0x34   : > { %3823 = vmatmul.mubr.bf16.gmra.mxu0 %v4653_v1  ;;  %v1546_v25 = vld [vmem:[#allocation2 + $0x92] sm:$0xff] }
  0x35   : > { %3855 = vmatpush3.bf16.msra.mxu0 %v4263_v60  ;;  %3866 = vmatprep.mubr.bf16.mxu0 %v646_v3  ;;  %v4288_v60 = vld [vmem:[%s5384_s3 + $0x148] sm:$0xff]   ;;  %v947_v3 = vpack.c.bf16 %v4620_v53, %v4570_v29  ;;  %v1098_v53 = vpack.c.bf16 %v4740_v38, %v4726_v33  ;;  %v4317_v32 = vld [vmem:[%s5387_s6 + $0x70] sm:$0xff]   ;;  %v4322_v38 = vld [vmem:[%s5387_s6 + $0x20] sm:$0xff]  }
  0x36   : > { %3879 = vmatpush3.bf16.msra.mxu1 %v4264_v63  ;;  %3856 = vmatprep.subr.bf16.mxu0 %v4265_v2  ;;  %v4290_v63 = vld [vmem:[%s5384_s3 + $0x140] sm:$0xff]   ;;  %v4295_v29 = vld [vmem:[%s5384_s3 + $0x1a8] sm:$0xff]   ;;  %v4318_v33 = vld [vmem:[%s5387_s6 + $0x30] sm:$0xff]  }
  0x37   : > { %3880 = vmatprep.subr.bf16.mxu1 %v4266_v4  ;;  %3847 = vmatmul.mubr.bf16.gmra.mxu1 %v4684_v12 }
  0x38   : > { %3890 = vmatprep.mubr.bf16.mxu1 %v796_v15  ;;  %v1099_v15 = vpack.c.bf16 %v4817_v8, %v4743_v40  ;;  %v4325_v40 = vld [vmem:[%s5387_s6 + $0x50] sm:$0xff]  }
  0x39   : > { %3857 = vmatpush3.bf16.msra.mxu0 %v4265_v2  ;;  %v4292_v2 = vld [vmem:[%s5384_s3 + $0x1f8] sm:$0xff]  }
  0x3a   : > { %3881 = vmatpush3.bf16.msra.mxu1 %v4266_v4  ;;  %3858 = vmatprep.subr.bf16.mxu0 %v4267_v9  ;;  %v4293_v4 = vld [vmem:[%s5384_s3 + $0x1b0] sm:$0xff]  }
  0x3b   : > { %3882 = vmatprep.subr.bf16.mxu1 %v4268_v11 }
  0x3d   : > { %3859 = vmatpush3.bf16.msra.mxu0 %v4267_v9  ;;  %v4296_v9 = vld [vmem:[%s5384_s3 + $0x1e8] sm:$0xff]  }
  0x3e   : > { %3883 = vmatpush3.bf16.msra.mxu1 %v4268_v11  ;;  %3860 = vmatprep.subr.bf16.mxu0 %v4269_v18  ;;  %v4297_v11 = vld [vmem:[%s5384_s3 + $0x1a0] sm:$0xff]  }
  0x3f   : > { %3884 = vmatprep.subr.bf16.mxu1 %v4270_v20 }
  0x41   : > { %3861 = vmatpush3.bf16.msra.mxu0 %v4269_v18  ;;  %v4306_v18 = vld [vmem:[%s5384_s3 + $0x1c0] sm:$0xff]  }
  0x42   : > { %3885 = vmatpush3.bf16.msra.mxu1 %v4270_v20  ;;  %3862 = vmatprep.subr.bf16.mxu0 %v4271_v13  ;;  %v4308_v20 = vld [vmem:[%s5384_s3 + $0x230] sm:$0xff]  }
  0x43   : > { %3886 = vmatprep.subr.bf16.mxu1 %v4272_v14 }
  0x45   : > { %3863 = vmatpush3.bf16.msra.mxu0 %v4271_v13  ;;  %v4309_v13 = vld [vmem:[%s5384_s3 + $0x228] sm:$0xff]  }
  0x46   : > { %3887 = vmatpush3.bf16.msra.mxu1 %v4272_v14  ;;  %3864 = vmatprep.subr.bf16.mxu0 %v4273_v22  ;;  %v1396_v14 = vld [vmem:[#allocation2 + $0x91] sm:$0xff] }
  0x47   : > { %3888 = vmatprep.subr.bf16.mxu1 %v4274_v23 }
  0x49   : > { %3865 = vmatpush3.bf16.msra.mxu0 %v4273_v22  ;;  %v4874_v22 = vld [vmem:[#allocation2] sm:$0xff] }
  0x4a   : > { %3889 = vmatpush3.bf16.msra.mxu1 %v4274_v23  ;;  %3898 = vmatprep.subr.bf16.mxu0 %v4275_v26  ;;  %5394 = vst [vmem:[#allocation4_spill] sm:$0xff] %v4874_v22  ;;  %v1250_v23 = vpack.c.bf16 %v4874_v22, %v4750_v43 }
  0x4b   : > { %3922 = vmatprep.subr.bf16.mxu1 %v4276_v30 }
  0x4c   : > { %3867 = vmatmul.mubr.bf16.vlgmr.msra.gmra.mxu0 %v4722_v31 }
  0x4d   : > { %3899 = vmatpush3.bf16.msra.mxu0 %v4275_v26  ;;  %3891 = vmatmul.mubr.bf16.vlgmr.msra.gmra.mxu1 %v797_v34  ;;  %v1550_v26 = vpack.c.bf16 %v1546_v25, %v4817_v8  ;;  %v4319_v34 = vld [vmem:[%s5387_s6 + $0x68] sm:$0xff]  }
  0x4e   : > { %3923 = vmatpush3.bf16.msra.mxu1 %v4276_v30  ;;  %3900 = vmatprep.subr.bf16.mxu0 %v4277_v35  ;;  %v4315_v30 = vld [vmem:[%s5387_s6 + $0x78] sm:$0xff]  }
  0x4f   : > { %3924 = vmatprep.subr.bf16.mxu1 %v4278_v36  ;;  %3870 = vmatprep.mubr.bf16.mxu0 %v4738_v37 }
  0x50   : > { %3894 = vmatprep.mubr.bf16.mxu1 %v798_v41  ;;  %v4324_v41 = vld [vmem:[%s5387_s6 + $0x18] sm:$0xff]  }
  0x51   : > { %3901 = vmatpush3.bf16.msra.mxu0 %v4277_v35  ;;  %v4321_v35 = vld [vmem:[%s5387_s6 + $0x60] sm:$0xff]  }
  0x52   : > { %3925 = vmatpush3.bf16.msra.mxu1 %v4278_v36  ;;  %3902 = vmatprep.subr.bf16.mxu0 %v4279_v42  ;;  %v4320_v36 = vld [vmem:[%s5387_s6 + $0x28] sm:$0xff]  }
  0x53   : > { %3926 = vmatprep.subr.bf16.mxu1 %v4280_v44 }
  0x54   : > { %3871 = vmatmul.mubr.bf16.gmra.mxu0 %v4758_v45 }
  0x55   : > { %3903 = vmatpush3.bf16.msra.mxu0 %v4279_v42  ;;  %3895 = vmatmul.mubr.bf16.gmra.mxu1 %v799_v46  ;;  %v4327_v42 = vld [vmem:[%s5387_s6 + $0x48] sm:$0xff]  }
  0x56   : > { %3927 = vmatpush3.bf16.msra.mxu1 %v4280_v44  ;;  %3904 = vmatprep.subr.bf16.mxu0 %v4281_v47  ;;  %v4326_v44 = vld [vmem:[%s5387_s6 + $0x10] sm:$0xff]  }
  0x57   : > { %3928 = vmatprep.subr.bf16.mxu1 %v4282_v48  ;;  %3914 = vmatprep.mubr.bf16.mxu0 %v946_v49 }
  0x58   : > { %3938 = vmatprep.mubr.bf16.mxu1 %v1096_v51  ;;  %v4330_v51 = vld [vmem:[%s5387_s6] sm:$0xff]  }
  0x59   : > { %3905 = vmatpush3.bf16.msra.mxu0 %v4281_v47  ;;  %v4328_v47 = vld [vmem:[%s5387_s6 + $0x8] sm:$0xff]  }
  0x5a   : > { %3929 = vmatpush3.bf16.msra.mxu1 %v4282_v48  ;;  %3906 = vmatprep.subr.bf16.mxu0 %v4283_v52  ;;  %v4950_v48 = vld [vmem:[%s5387_s6 + $0xb8] sm:$0xff]  }
  0x5b   : > { %3930 = vmatprep.subr.bf16.mxu1 %v4284_v55  ;;  %5395 = vst [vmem:[#allocation5_spill] sm:$0xff] %v4950_v48 }
  0x5d   : > { %3907 = vmatpush3.bf16.msra.mxu0 %v4283_v52 }
  0x5e   : > { %3931 = vmatpush3.bf16.msra.mxu1 %v4284_v55  ;;  %3908 = vmatprep.subr.bf16.mxu0 %v4285_v27 }
  0x5f   : > { %3932 = vmatprep.subr.bf16.mxu1 %v4286_v28 }
  0x61   : > { %3909 = vmatpush3.bf16.msra.mxu0 %v4285_v27  ;;  %v4959_v27 = vld [vmem:[%s5387_s6 + $0xf8] sm:$0xff]  }
  0x62   : > { %3933 = vmatpush3.bf16.msra.mxu1 %v4286_v28  ;;  %3910 = vmatprep.subr.bf16.mxu0 %v4287_v56  ;;  %5396 = vst [vmem:[#allocation6_spill] sm:$0xff] %v4959_v27 }
  0x63   : > { %3934 = vmatprep.subr.bf16.mxu1 %v4288_v60 }
  0x65   : > { %3911 = vmatpush3.bf16.msra.mxu0 %v4287_v56 }
  0x66   : > { %3935 = vmatpush3.bf16.msra.mxu1 %v4288_v60  ;;  %3912 = vmatprep.subr.bf16.mxu0 %v4289_v61 }
  0x67   : > { %3936 = vmatprep.subr.bf16.mxu1 %v4290_v63 }
  0x69   : > { %3913 = vmatpush3.bf16.msra.mxu0 %v4289_v61 }
  0x6a   : > { %3937 = vmatpush3.bf16.msra.mxu1 %v4290_v63  ;;  %3946 = vmatprep.subr.bf16.mxu0 %v4291_v0 }
  0x6b   : > { %3970 = vmatprep.subr.bf16.mxu1 %v4292_v2 }
  0x6c   : > { %3915 = vmatmul.mubr.bf16.vlgmr.msra.gmra.mxu0 %v947_v3 }
  0x6d   : > { %3947 = vmatpush3.bf16.msra.mxu0 %v4291_v0  ;;  %3939 = vmatmul.mubr.bf16.vlgmr.msra.gmra.mxu1 %v1097_v5 }
  0x6e   : > { %3971 = vmatpush3.bf16.msra.mxu1 %v4292_v2  ;;  %3948 = vmatprep.subr.bf16.mxu0 %v4293_v4 }
  0x6f   : > { %3972 = vmatprep.subr.bf16.mxu1 %v4294_v6  ;;  %3918 = vmatprep.mubr.bf16.mxu0 %v948_v62  ;;  %v4302_v62 = vld [vmem:[%s5384_s3 + $0x1d0] sm:$0xff]  }
  0x70   : > { %3942 = vmatprep.mubr.bf16.mxu1 %v1098_v53 }
  0x71   : > { %3949 = vmatpush3.bf16.msra.mxu0 %v4293_v4 }
  0x72   : > { %3973 = vmatpush3.bf16.msra.mxu1 %v4294_v6  ;;  %3950 = vmatprep.subr.bf16.mxu0 %v4295_v29 }
  0x73   : > { %3974 = vmatprep.subr.bf16.mxu1 %v4296_v9 }
  0x74   : > { %3919 = vmatmul.mubr.bf16.gmra.mxu0 %v949_v10 }
  0x75   : > { %3951 = vmatpush3.bf16.msra.mxu0 %v4295_v29  ;;  %3943 = vmatmul.mubr.bf16.gmra.mxu1 %v1099_v15 }
  0x76   : > { %3975 = vmatpush3.bf16.msra.mxu1 %v4296_v9  ;;  %3952 = vmatprep.subr.bf16.mxu0 %v4297_v11 }
  0x77   : > { %3976 = vmatprep.subr.bf16.mxu1 %v4298_v16  ;;  %3962 = vmatprep.mubr.bf16.mxu0 %v4612_v50  ;;  %v4304_v50 = vld [vmem:[%s5384_s3 + $0x1c8] sm:$0xff]  }
  0x78   : > { %3986 = vmatprep.mubr.bf16.mxu1 %v4594_v39  ;;  %v4305_v39 = vld [vmem:[%s5384_s3 + $0x180] sm:$0xff]  }
  0x79   : > { %3953 = vmatpush3.bf16.msra.mxu0 %v4297_v11 }
  0x7a   : > { %3977 = vmatpush3.bf16.msra.mxu1 %v4298_v16  ;;  %3954 = vmatprep.subr.bf16.mxu0 %v4299_v54 }
  0x7b   : > { %3978 = vmatprep.subr.bf16.mxu1 %v4300_v58 }
  0x7d   : > { %3955 = vmatpush3.bf16.msra.mxu0 %v4299_v54 }
  0x7e   : > { %3979 = vmatpush3.bf16.msra.mxu1 %v4300_v58  ;;  %3956 = vmatprep.subr.bf16.mxu0 %v4301_v59 }
  0x7f   : > { %3980 = vmatprep.subr.bf16.mxu1 %v4302_v62 }
  0x81   : > { %3957 = vmatpush3.bf16.msra.mxu0 %v4301_v59 }
  0x82   : > { %3981 = vmatpush3.bf16.msra.mxu1 %v4302_v62  ;;  %3958 = vmatprep.subr.bf16.mxu0 %v4303_v17 }
  0x83   : > { %3982 = vmatprep.subr.bf16.mxu1 %v4304_v50 }
  0x85   : > { %3959 = vmatpush3.bf16.msra.mxu0 %v4303_v17 }
  0x86   : > { %3983 = vmatpush3.bf16.msra.mxu1 %v4304_v50  ;;  %3960 = vmatprep.subr.bf16.mxu0 %v4305_v39 }
  0x87   : > { %3984 = vmatprep.subr.bf16.mxu1 %v4306_v18 }
  0x89   : > { %3961 = vmatpush3.bf16.msra.mxu0 %v4305_v39 }
  0x8a   : > { %3985 = vmatpush3.bf16.msra.mxu1 %v4306_v18  ;;  %3994 = vmatprep.subr.bf16.mxu0 %v4307_v19 }
  0x8b   : > { %4018 = vmatprep.subr.bf16.mxu1 %v4315_v30 }
  0x8c   : > { %3963 = vmatmul.mubr.bf16.vlgmr.msra.gmra.mxu0 %v4668_v7  ;;  %v1400_v7 = vpack.c.bf16 %v1396_v14, %v4698_v21  ;;  %v4313_v21 = vld [vmem:[%s5384_s3 + $0x208] sm:$0xff]  }
  0x8d   : > { %3995 = vmatpush3.bf16.msra.mxu0 %v4307_v19  ;;  %3987 = vmatmul.mubr.bf16.vlgmr.msra.gmra.mxu1 %v4631_v57  ;;  %v4310_v57 = vld [vmem:[%s5384_s3 + $0x220] sm:$0xff]  }
  0x8e   : > { %3996 = vmatprep.subr.bf16.mxu0 %v4308_v20  ;;  %3966 = vmatprep.mubr.bf16.mxu0 %v4684_v12  ;;  %v4312_v12 = vld [vmem:[%s5384_s3 + $0x210] sm:$0xff]  }
  0x8f   : > { %3990 = vmatprep.mubr.bf16.mxu1 %v4653_v1  ;;  %v4311_v1 = vld [vmem:[%s5384_s3 + $0x218] sm:$0xff]   ;;  %4019 = vmatpush3.bf16.msra.mxu1 %v4315_v30 }
  0x90   : > { %4020 = vmatprep.subr.bf16.mxu1 %v4317_v32 }
  0x91   : > { %3997 = vmatpush3.bf16.msra.mxu0 %v4308_v20 }
  0x92   : > { %3998 = vmatprep.subr.bf16.mxu0 %v4309_v13 }
  0x93   : > { %4021 = vmatpush3.bf16.msra.mxu1 %v4317_v32 }
  0x94   : > { %3967 = vmatmul.mubr.bf16.gmra.mxu0 %v1250_v23  ;;  %4022 = vmatprep.subr.bf16.mxu1 %v4319_v34 }
  0x95   : > { %3999 = vmatpush3.bf16.msra.mxu0 %v4309_v13  ;;  %3991 = vmatmul.mubr.bf16.gmra.mxu1 %v1400_v7 }
  0x96   : > { %4000 = vmatprep.subr.bf16.mxu0 %v4310_v57  ;;  %4010 = vmatprep.mubr.bf16.mxu0 %v4722_v31  ;;  %v4316_v31 = vld [vmem:[%s5387_s6 + $0x38] sm:$0xff]  }
  0x97   : > { %4023 = vmatpush3.bf16.msra.mxu1 %v4319_v34 }
  0x98   : > { %4024 = vmatprep.subr.bf16.mxu1 %v4321_v35 }
  0x99   : > { %4001 = vmatpush3.bf16.msra.mxu0 %v4310_v57 }
  0x9a   : > { %4002 = vmatprep.subr.bf16.mxu0 %v4311_v1 }
  0x9b   : > { %4025 = vmatpush3.bf16.msra.mxu1 %v4321_v35 }
  0x9d   : > { %4003 = vmatpush3.bf16.msra.mxu0 %v4311_v1 }
  0x9e   : > { %4004 = vmatprep.subr.bf16.mxu0 %v4312_v12 }
  0xa1   : > { %4005 = vmatpush3.bf16.msra.mxu0 %v4312_v12 }
  0xa2   : > { %4006 = vmatprep.subr.bf16.mxu0 %v4313_v21 }
  0xa5   : > { %4007 = vmatpush3.bf16.msra.mxu0 %v4313_v21 }
  0xa6   : > { %4008 = vmatprep.subr.bf16.mxu0 %v4314_v24 }
  0xa9   : > { %4009 = vmatpush3.bf16.msra.mxu0 %v4314_v24 }
  0xaa   : > { %4042 = vmatprep.subr.bf16.mxu0 %v4316_v31 }
  0xac   : > { %4011 = vmatmul.mubr.bf16.vlgmr.msra.gmra.mxu0 %v4738_v37  ;;  %v4323_v37 = vld [vmem:[%s5387_s6 + $0x58] sm:$0xff]  }
  0xad   : > { %4014 = vmatprep.mubr.bf16.mxu0 %v4758_v45  ;;  %4043 = vmatpush3.bf16.msra.mxu0 %v4316_v31  ;;  %v4329_v45 = vld [vmem:[%s5387_s6 + $0x40] sm:$0xff]  }
  0xae   : > { %4044 = vmatprep.subr.bf16.mxu0 %v4318_v33  ;;  %4026 = vmatprep.subr.bf16.mxu1 %v4323_v37 }
  0xaf   : > { %4027 = vmatpush3.bf16.msra.mxu1 %v4323_v37 }
  0xb0   : > { %4028 = vmatprep.subr.bf16.mxu1 %v4325_v40 }
  0xb1   : > { %4045 = vmatpush3.bf16.msra.mxu0 %v4318_v33 }
  0xb2   : > { %4046 = vmatprep.subr.bf16.mxu0 %v4320_v36 }
  0xb3   : > { %4029 = vmatpush3.bf16.msra.mxu1 %v4325_v40 }
  0xb4   : > { %4015 = vmatmul.mubr.bf16.gmra.mxu0 %v1550_v26  ;;  %4030 = vmatprep.subr.bf16.mxu1 %v4327_v42 }
  0xb5   : > { %4047 = vmatpush3.bf16.msra.mxu0 %v4320_v36 }
  0xb6   : > { %4048 = vmatprep.subr.bf16.mxu0 %v4322_v38 }
  0xb7   : > { %4031 = vmatpush3.bf16.msra.mxu1 %v4327_v42 }
  0xb8   : > { %4032 = vmatprep.subr.bf16.mxu1 %v4329_v45 }
  0xb9   : > { %4049 = vmatpush3.bf16.msra.mxu0 %v4322_v38 }
  0xba   : > { %4050 = vmatprep.subr.bf16.mxu0 %v4324_v41 }
  0xbb   : > { %4033 = vmatpush3.bf16.msra.mxu1 %v4329_v45 }
  0xbc   : > { %4066 = vmatprep.subr.bf16.mxu1 %v4950_v48 }
  0xbd   : > { %4051 = vmatpush3.bf16.msra.mxu0 %v4324_v41 }
  0xbe   : > { %4052 = vmatprep.subr.bf16.mxu0 %v4326_v44 }
  0xc1   : > { %4053 = vmatpush3.bf16.msra.mxu0 %v4326_v44 }
  0xc2   : > { %4054 = vmatprep.subr.bf16.mxu0 %v4328_v47 }
  0xc5   : > { %4055 = vmatpush3.bf16.msra.mxu0 %v4328_v47 }
  0xc6   : > { %4056 = vmatprep.subr.bf16.mxu0 %v4330_v51 }
  0xc9   : > { %4057 = vmatpush3.bf16.msra.mxu0 %v4330_v51 }
  0xca   : > { %4090 = vmatprep.subr.bf16.mxu0 %v4959_v27 }
  0xec   : > { %v4934_v43 = vpop.f32.mrf.mxu0 }
  0xed   : > { %v3844_v52 = vpop.f32.mrf.mxu1 }
  0xee   : > { %v4942_v46 = vpop.f32.mrf.mxu0  ;;  %v616_v36 = vadd.f32 %v3844_v52, %v4934_v43 }
  0xef   : > { %v607_v56 = vpop.f32.mrf.mxu1 }
  0xf0   : > { %v3821_v49 = vpop.f32.mrf.mxu0  ;;  %v608_v40 = vadd.f32 %v607_v56, %v4942_v46 }
  0xf1   : > { %v3845_v61 = vpop.f32.mrf.mxu1 }
  0xf2   : > { %v497_v55 = vpop.f32.mrf.mxu0  ;;  %v619_v42 = vadd.f32 %v3845_v61, %v3821_v49 }
  0xf3   : > { %v610_v0 = vpop.f32.mrf.mxu1 }
  0xf4   : > { %v3824_v28 = vpop.f32.mrf.mxu0  ;;  %v611_v51 = vadd.f32 %v610_v0, %v497_v55 }
  0xf6   : > { %v510_v60 = vpop.f32.mrf.mxu0 }
  0xf7   : > { %v3848_v2 = vpop.f32.mrf.mxu1 }
  0xf8   : > { %v4962_v63 = vpop.f32.mrf.mxu0  ;;  %v632_v22 = vadd.f32 %v3848_v2, %v3824_v28 }
  0xf9   : > { %5397 = vst [vmem:[#allocation7_spill] sm:$0xff] %v4962_v63  ;;  %v623_v5 = vpop.f32.mrf.mxu1 }
  0xfa   : > { %v4964_v3 = vpop.f32.mrf.mxu0 }
  0xfb   : > { %5398 = vst [vmem:[#allocation8_spill] sm:$0xff] %v4964_v3  ;;  %v3849_v29 = vpop.f32.mrf.mxu1 }
  0xfd   : > { %v626_v8 = vpop.f32.mrf.mxu1 }
 0x100   : > { %v5403_v56 = vld [vmem:[#allocation7_spill] sm:$0xff] }
 0x102   : > { %v5404_v55 = vld [vmem:[#allocation8_spill] sm:$0xff] }
 0x103   : > { %v627_v0 = vadd.f32 %v626_v8, %v5404_v55 }
 0x10c   : > { %v3868_v4 = vpop.f32.mrf.mxu0 }
 0x10d   : > { %v3892_v9 = vpop.f32.mrf.mxu1  ;;  %v782_v41 = vadd.f32 %v3868_v4, %v616_v36  ;;  %v635_v4 = vadd.f32 %v3849_v29, %v5403_v56 }
 0x10e   : > { %v749_v6 = vpop.f32.mrf.mxu0 }
 0x10f   : > { %v899_v11 = vpop.f32.mrf.mxu1  ;;  %v780_v44 = vadd.f32 %v749_v6, %v608_v40  ;;  %v932_v27 = vadd.f32 %v3892_v9, %v782_v41 }
 0x110   : > { %v3869_v53 = vpop.f32.mrf.mxu0 }
 0x111   : > { %v3893_v16 = vpop.f32.mrf.mxu1  ;;  %v783_v48 = vadd.f32 %v3869_v53, %v619_v42 }
 0x112   : > { %v752_v10 = vpop.f32.mrf.mxu0 }
 0x113   : > { %v902_v58 = vpop.f32.mrf.mxu1  ;;  %v933_v52 = vadd.f32 %v3893_v16, %v783_v48 }
 0x114   : > { %v3872_v15 = vpop.f32.mrf.mxu0 }
 0x115   : > { %v3896_v62 = vpop.f32.mrf.mxu1  ;;  %v786_v63 = vadd.f32 %v3872_v15, %v632_v22 }
 0x116   : > { %v765_v54 = vpop.f32.mrf.mxu0 }
 0x117   : > { %v915_v39 = vpop.f32.mrf.mxu1  ;;  %v936_v53 = vadd.f32 %v3896_v62, %v786_v63 }
 0x118   : > { %v3873_v59 = vpop.f32.mrf.mxu0 }
 0x119   : > { %v3897_v19 = vpop.f32.mrf.mxu1  ;;  %v787_v28 = vadd.f32 %v3873_v59, %v635_v4 }
 0x11a   : > { %v768_v17 = vpop.f32.mrf.mxu0 }
 0x11b   : > { %v4966_v13 = vpop.f32.mrf.mxu1  ;;  %v785_v22 = vadd.f32 %v768_v17, %v627_v0  ;;  %v937_v29 = vadd.f32 %v3897_v19, %v787_v28  ;;  %v1784_v0 = vld [vmem:[#allocation3 + $0x1] sm:$0xff] }
 0x11c   : > { %5399 = vst [vmem:[#allocation9_spill] sm:$0xff] %v4966_v13 }
 0x12c   : > { %v3916_v50 = vpop.f32.mrf.mxu0 }
 0x12d   : > { %v3940_v14 = vpop.f32.mrf.mxu1  ;;  %v1082_v13 = vadd.f32 %v3916_v50, %v932_v27 }
 0x12e   : > { %v1049_v18 = vpop.f32.mrf.mxu0 }
 0x12f   : > { %v1199_v7 = vpop.f32.mrf.mxu1  ;;  %v1232_v61 = vadd.f32 %v3940_v14, %v1082_v13 }
 0x130   : > { %v3917_v20 = vpop.f32.mrf.mxu0 }
 0x131   : > { %v3941_v1 = vpop.f32.mrf.mxu1  ;;  %v1083_v6 = vadd.f32 %v3917_v20, %v933_v52  ;;  %v5405_v20 = vld [vmem:[#allocation9_spill] sm:$0xff] }
 0x132   : > { %v1052_v23 = vpop.f32.mrf.mxu0  ;;  %v935_v8 = vadd.f32 %v5405_v20, %v785_v22 }
 0x133   : > { %v1202_v21 = vpop.f32.mrf.mxu1  ;;  %v1233_v48 = vadd.f32 %v3941_v1, %v1083_v6 }
 0x134   : > { %v3920_v57 = vpop.f32.mrf.mxu0 }
 0x135   : > { %v3944_v25 = vpop.f32.mrf.mxu1 }
 0x136   : > { %v1065_v12 = vpop.f32.mrf.mxu0 }
 0x137   : > { %v1215_v31 = vpop.f32.mrf.mxu1 }
 0x138   : > { %v3921_v24 = vpop.f32.mrf.mxu0 }
 0x139   : > { %v4970_v33 = vpop.f32.mrf.mxu1  ;;  %v1087_v59 = vadd.f32 %v3921_v24, %v937_v29 }
 0x13a   : > { %v4968_v26 = vpop.f32.mrf.mxu0  ;;  %5401 = vst [vmem:[#allocation11_spill] sm:$0xff] %v4970_v33  ;;  %v781_v33 = vadd.f32 %v752_v10, %v611_v51 }
 0x13b   : > { %5400 = vst [vmem:[#allocation10_spill] sm:$0xff] %v4968_v26  ;;  %v4972_v35 = vpop.f32.mrf.mxu1  ;;  %v930_v26 = vadd.f32 %v899_v11, %v780_v44 }
 0x13c   : > { %5402 = vst [vmem:[#allocation12_spill] sm:$0xff] %v4972_v35  ;;  %v624_v35 = vadd.f32 %v623_v5, %v510_v60  ;;  %v931_v49 = vadd.f32 %v902_v58, %v781_v33  ;;  %v1086_v5 = vadd.f32 %v3920_v57, %v936_v53 }
 0x13d   : > { %v1080_v46 = vadd.f32 %v1049_v18, %v930_v26 }
 0x13e   : > { %v784_v36 = vadd.f32 %v765_v54, %v624_v35  ;;  %v1081_v27 = vadd.f32 %v1052_v23, %v931_v49  ;;  %v1236_v63 = vadd.f32 %v3944_v25, %v1086_v5 }
 0x13f   : > { %v1230_v9 = vadd.f32 %v1199_v7, %v1080_v46 }
 0x140   : > { %v934_v60 = vadd.f32 %v915_v39, %v784_v36  ;;  %v1231_v58 = vadd.f32 %v1202_v21, %v1081_v27  ;;  %v4982_v39 = vld [vmem:[%s5385_s4] ss:$0 sm:$0xff] }
 0x142   : > { %v1084_v16 = vadd.f32 %v1065_v12, %v934_v60  ;;  %v5406_v7 = vld [vmem:[#allocation10_spill] sm:$0xff]  ;;  %v4988_v12 = vld [vmem:[%s5386_s5] ss:$0 sm:$0xff] }
 0x143   : > { %v1085_v57 = vadd.f32 %v5406_v7, %v935_v8  ;;  %v5408_v42 = vld [vmem:[#allocation12_spill] sm:$0xff] }
 0x144   : > { %v1234_v19 = vadd.f32 %v1215_v31, %v1084_v16 }
 0x145   : > { %v1235_v44 = vadd.f32 %v5408_v42, %v1085_v57  ;;  %v5410_v57 = vld [vmem:[#allocation5_spill] sm:$0xff] }
 0x14c   : > { %v3964_v30 = vpop.f32.mrf.mxu0 }
 0x14d   : > { %v3988_v37 = vpop.f32.mrf.mxu1  ;;  %v1383_v10 = vadd.f32 %v3964_v30, %v1232_v61  ;;  %v5407_v30 = vld [vmem:[#allocation11_spill] sm:$0xff] }
 0x14e   : > { %v1350_v32 = vpop.f32.mrf.mxu0 }
 0x14f   : > { %v1500_v45 = vpop.f32.mrf.mxu1  ;;  %v1381_v11 = vadd.f32 %v1350_v32, %v1230_v9  ;;  %v1533_v50 = vadd.f32 %v3988_v37, %v1383_v10  ;;  %v1237_v32 = vadd.f32 %v5407_v30, %v1087_v59  ;;  %v4334_v30 = vld [vmem:[%s5387_s6 + $0xf0] sm:$0xff]  }
 0x150   : > { %v3965_v34 = vpop.f32.mrf.mxu0 }
 0x151   : > { %v3989_v3 = vpop.f32.mrf.mxu1  ;;  %v1384_v18 = vadd.f32 %v3965_v34, %v1233_v48  ;;  %v1531_v17 = vadd.f32 %v1500_v45, %v1381_v11 }
 0x152   : > { %v1353_v38 = vpop.f32.mrf.mxu0 }
 0x153   : > { %v1503_v40 = vpop.f32.mrf.mxu1  ;;  %v1382_v13 = vadd.f32 %v1353_v38, %v1231_v58  ;;  %v1534_v24 = vadd.f32 %v3989_v3, %v1384_v18 }
 0x154   : > { %v3968_v47 = vpop.f32.mrf.mxu0 }
 0x155   : > { %v3992_v15 = vpop.f32.mrf.mxu1  ;;  %v1387_v1 = vadd.f32 %v3968_v47, %v1236_v63  ;;  %v1532_v35 = vadd.f32 %v1503_v40, %v1382_v13  ;;  %v4333_v63 = vld [vmem:[%s5387_s6 + $0xb0] sm:$0xff]  }
 0x156   : > { %v1366_v43 = vpop.f32.mrf.mxu0 }
 0x157   : > { %v1516_v14 = vpop.f32.mrf.mxu1  ;;  %v1385_v33 = vadd.f32 %v1366_v43, %v1234_v19  ;;  %v1537_v45 = vadd.f32 %v3992_v15, %v1387_v1  ;;  %v5409_v19 = vld [vmem:[#allocation4_spill] sm:$0xff] }
 0x158   : > { %v3969_v2 = vpop.f32.mrf.mxu0 }
 0x159   : > { %v3993_v37 = vpop.f32.mrf.mxu1  ;;  %v1388_v47 = vadd.f32 %v3969_v2, %v1237_v32  ;;  %v1535_v56 = vadd.f32 %v1516_v14, %v1385_v33  ;;  %v2039_v33 = vld [vmem:[#allocation3 + $0x2] sm:$0xff] }
 0x15a   : > { %v1369_v54 = vpop.f32.mrf.mxu0 }
 0x15b   : > { %v1386_v4 = vadd.f32 %v1369_v54, %v1235_v44  ;;  %v1519_v49 = vpop.f32.mrf.mxu1  ;;  %v1538_v53 = vadd.f32 %v3993_v37, %v1388_v47  ;;  %v5411_v37 = vld [vmem:[#allocation6_spill] sm:$0xff]  ;;  %v4336_v44 = vld [vmem:[%s5387_s6 + $0xe8] sm:$0xff]  }
 0x15d   : > { %v1536_v60 = vadd.f32 %v1519_v49, %v1386_v4  ;;  %v4340_v4 = vld [vmem:[%s5387_s6 + $0xd8] sm:$0xff]   ;;  %v4342_v49 = vld [vmem:[%s5387_s6 + $0xd0] sm:$0xff]  }
 0x16c   : > { %v4012_v62 = vpop.f32.mrf.mxu0 }
 0x16d   : > { %v1683_v23 = vadd.f32 %v4012_v62, %v1533_v50 }
 0x16e   : > { %v1650_v21 = vpop.f32.mrf.mxu0 }
 0x16f   : > { %v1698_v25 = vmul.f32 %v4982_v39, %v1683_v23  ;;  %v1681_v26 = vadd.f32 %v1650_v21, %v1531_v17 }
 0x170   : > { %v4013_v34 = vpop.f32.mrf.mxu0 }
 0x171   : > { %v1713_v31 = vadd.f32 %v4988_v12, %v1698_v25  ;;  %v1696_v38 = vmul.f32 %v4982_v39, %v1681_v26  ;;  %v1684_v41 = vadd.f32 %v4013_v34, %v1534_v24 }
 0x172   : > { %v1653_v51 = vpop.f32.mrf.mxu0 }
 0x173   : > { %v4995_v3 = vmax.f32 %v1713_v31, 0.0  ;;  %v1711_v52 = vadd.f32 %v4988_v12, %v1696_v38  ;;  %v1699_v46 = vmul.f32 %v4982_v39, %v1684_v41  ;;  %v1682_v43 = vadd.f32 %v1653_v51, %v1532_v35  ;;  %v4337_v35 = vld [vmem:[%s5387_s6 + $0xa0] sm:$0xff]  }
 0x174   : > { %v4016_v36 = vpop.f32.mrf.mxu0 }
 0x175   : > { %1750 = vst [vmem:[#allocation3 + $0x31] sm:$0xff] %v4995_v3  ;;  %v5000_v61 = vmax.f32 %v1711_v52, 0.0  ;;  %v1714_v6 = vadd.f32 %v4988_v12, %v1699_v46  ;;  %v1697_v40 = vmul.f32 %v4982_v39, %v1682_v43  ;;  %v1687_v55 = vadd.f32 %v4016_v36, %v1537_v45  ;;  %v4339_v45 = vld [vmem:[%s5387_s6 + $0x98] sm:$0xff]   ;;  %v4338_v46 = vld [vmem:[%s5387_s6 + $0xe0] sm:$0xff]   ;;  %v4343_v36 = vld [vmem:[%s5387_s6 + $0x88] sm:$0xff]  }
 0x176   : > { %v1666_v28 = vpop.f32.mrf.mxu0 }
 0x177   : > { %1748 = vst [vmem:[#allocation3 + $0x11] sm:$0xff] %v5000_v61  ;;  %v5005_v2 = vmax.f32 %v1714_v6, 0.0  ;;  %v1712_v9 = vadd.f32 %v4988_v12, %v1697_v40  ;;  %v1702_v27 = vmul.f32 %v4982_v39, %v1687_v55  ;;  %v1685_v10 = vadd.f32 %v1666_v28, %v1535_v56  ;;  %v4341_v56 = vld [vmem:[%s5387_s6 + $0x90] sm:$0xff]   ;;  %v4345_v6 = vld [vmem:[%s5387_s6 + $0x80] sm:$0xff]   ;;  %v4344_v40 = vld [vmem:[%s5387_s6 + $0xc8] sm:$0xff]  }
 0x178   : > { %v4017_v22 = vpop.f32.mrf.mxu0  ;;  %v1792_v5 = vpack.c.bf16 %v5000_v61, %v1784_v0  ;;  %v4347_v55 = vld [vmem:[%s5387_s6 + $0x138] sm:$0xff]   ;;  %v4346_v28 = vld [vmem:[%s5387_s6 + $0xc0] sm:$0xff]  }
 0x179   : > { %1751 = vst [vmem:[#allocation3 + $0x41] sm:$0xff] %v5005_v2  ;;  %v5011_v48 = vmax.f32 %v1712_v9, 0.0  ;;  %v1717_v11 = vadd.f32 %v4988_v12, %v1702_v27  ;;  %v1700_v15 = vmul.f32 %v4982_v39, %v1685_v10  ;;  %v1688_v29 = vadd.f32 %v4017_v22, %v1538_v53  ;;  %v4349_v22 = vld [vmem:[%s5387_s6 + $0x130] sm:$0xff]  }
 0x17a   : > { %v1669_v16 = vpop.f32.mrf.mxu0  ;;  %4034 = vmatprep.mubr.bf16.mxu1 %v1792_v5  ;;  %v2348_v54 = vpack.c.bf16 %v5005_v2, %v4995_v3  ;;  %v4348_v5 = vld [vmem:[%s5387_s6 + $0x178] sm:$0xff]  }
 0x17b   : > { %1749 = vst [vmem:[#allocation3 + $0x21] sm:$0xff] %v5011_v48  ;;  %v5018_v58 = vmax.f32 %v1717_v11, 0.0  ;;  %v1715_v50 = vadd.f32 %v4988_v12, %v1700_v15  ;;  %v1703_v18 = vmul.f32 %v4982_v39, %v1688_v29  ;;  %v1686_v20 = vadd.f32 %v1669_v16, %v1536_v60  ;;  %v4351_v11 = vld [vmem:[%s5387_s6 + $0x128] sm:$0xff]   ;;  %v4350_v16 = vld [vmem:[%s5387_s6 + $0x170] sm:$0xff]  }
 0x17c   : > { %v5024_v8 = vpack.c.bf16 %v4995_v3, %v5011_v48  ;;  %v5054_v25 = vld [vmem:[#allocation3 + $0x30] sm:$0xff] }
 0x17d   : > { %1754 = vst [vmem:[#allocation3 + $0x71] sm:$0xff] %v5018_v58  ;;  %v5030_v59 = vmax.f32 %v1715_v50, 0.0  ;;  %v1718_v62 = vadd.f32 %v4988_v12, %v1703_v18  ;;  %v1701_v17 = vmul.f32 %v4982_v39, %v1686_v20  ;;  %v4335_v39 = vld [vmem:[%s5387_s6 + $0xa8] sm:$0xff]   ;;  %v5126_v9 = vld [vmem:[#allocation3 + $0x32] sm:$0xff] }
 0x17e   : > { %v1757_v13 = vld [vmem:[#allocation3 + $0x10] sm:$0xff]  ;;  %4035 = vmatmul.mubr.bf16.vlgmr.msra.gmra.mxu1 %v5024_v8 }
 0x17f   : > { %1752 = vst [vmem:[#allocation3 + $0x51] sm:$0xff] %v5030_v59  ;;  %v5036_v14 = vmax.f32 %v1718_v62, 0.0  ;;  %v1716_v23 = vadd.f32 %v4988_v12, %v1701_v17  ;;  %v1764_v7 = vpack.c.bf16 %v1757_v13, %v5409_v19  ;;  %4067 = vmatpush3.bf16.msra.mxu1 %v5410_v57  ;;  %v5043_v1 = vpack.c.bf16 %v5030_v59, %v5005_v2  ;;  %v5067_v34 = vld [vmem:[#allocation3 + $0x12] sm:$0xff]  ;;  %v4352_v17 = vld [vmem:[%s5387_s6 + $0x168] sm:$0xff]  }
 0x180   : > { %4068 = vmatprep.subr.bf16.mxu1 %v4333_v63  ;;  %v5074_v31 = vld [vmem:[#allocation3 + $0x40] sm:$0xff]  ;;  %v2047_v41 = vpack.c.bf16 %v5067_v34, %v2039_v33  ;;  %v2347_v62 = vpack.c.bf16 %v5011_v48, %v5000_v61  ;;  %v4357_v57 = vld [vmem:[%s5387_s6 + $0x110] sm:$0xff]   ;;  %v4360_v33 = vld [vmem:[%s5387_s6 + $0x148] sm:$0xff]  }
 0x181   : > { %1755 = vst [vmem:[#allocation3 + $0x81] sm:$0xff] %v5036_v14  ;;  %v5049_v21 = vmax.f32 %v1716_v23, 0.0  ;;  %4058 = vmatprep.mubr.bf16.mxu0 %v1764_v7  ;;  %4038 = vmatprep.mubr.bf16.mxu1 %v5043_v1  ;;  %v2350_v12 = vpack.c.bf16 %v5036_v14, %v5018_v58  ;;  %v5131_v10 = vld [vmem:[#allocation3 + $0x42] sm:$0xff]  ;;  %v2198_v29 = vpack.c.bf16 %v5074_v31, %v5054_v25  ;;  %v4355_v23 = vld [vmem:[%s5387_s6 + $0x118] sm:$0xff]   ;;  %v4366_v3 = vld [vmem:[%s5387_s6 + $0x1f0] sm:$0xff]  }
 0x182   : > { %v1758_v24 = vld [vmem:[#allocation3 + $0x20] sm:$0xff] }
 0x183   : > { %1753 = vst [vmem:[#allocation3 + $0x61] sm:$0xff] %v5049_v21  ;;  %v5058_v26 = vpack.c.bf16 %v5054_v25, %v1758_v24  ;;  %4069 = vmatpush3.bf16.msra.mxu1 %v4333_v63  ;;  %v5065_v32 = vpack.c.bf16 %v5018_v58, %v5049_v21  ;;  %v2197_v43 = vpack.c.bf16 %v1758_v24, %v1757_v13  ;;  %v2041_v0 = vld [vmem:[#allocation3 + $0x22] sm:$0xff]  ;;  %v4358_v25 = vld [vmem:[%s5387_s6 + $0x150] sm:$0xff]  }
 0x184   : > { %4070 = vmatprep.subr.bf16.mxu1 %v4335_v39  ;;  %v5091_v51 = vld [vmem:[#allocation3 + $0x70] sm:$0xff]  ;;  %v5129_v27 = vpack.c.bf16 %v5126_v9, %v2041_v0  ;;  %v4353_v63 = vld [vmem:[%s5387_s6 + $0x120] sm:$0xff]   ;;  %v2497_v7 = vpack.c.bf16 %v2041_v0, %v5067_v34  ;;  %v4359_v24 = vld [vmem:[%s5387_s6 + $0x108] sm:$0xff]  }
 0x185   : > { %4059 = vmatmul.mubr.bf16.vlgmr.msra.gmra.mxu0 %v5058_v26  ;;  %v5156_v18 = vld [vmem:[#allocation3 + $0x72] sm:$0xff]  ;;  %v4354_v48 = vld [vmem:[%s5387_s6 + $0x160] sm:$0xff]  }
 0x186   : > { %4091 = vmatpush3.bf16.msra.mxu0 %v5411_v37  ;;  %v5076_v38 = vld [vmem:[#allocation3 + $0x50] sm:$0xff]  ;;  %4039 = vmatmul.mubr.bf16.gmra.mxu1 %v5065_v32  ;;  %v4363_v34 = vld [vmem:[%s5387_s6 + $0x1b8] sm:$0xff]   ;;  %v4370_v58 = vld [vmem:[%s5387_s6 + $0x1e0] sm:$0xff]  }
 0x187   : > { %4092 = vmatprep.subr.bf16.mxu0 %v4334_v30  ;;  %v5082_v42 = vpack.c.bf16 %v5076_v38, %v5074_v31  ;;  %4071 = vmatpush3.bf16.msra.mxu1 %v4335_v39  ;;  %v5121_v53 = vld [vmem:[#allocation3 + $0x52] sm:$0xff]  ;;  %v2349_v31 = vpack.c.bf16 %v5049_v21, %v5030_v59  ;;  %v2498_v59 = vpack.c.bf16 %v5131_v10, %v5126_v9  ;;  %v4368_v21 = vld [vmem:[%s5387_s6 + $0x1e8] sm:$0xff]  }
 0x188   : > { %4082 = vmatprep.mubr.bf16.mxu1 %v2047_v41  ;;  %4072 = vmatprep.subr.bf16.mxu1 %v4337_v35  ;;  %v5135_v60 = vpack.c.bf16 %v5121_v53, %v5131_v10  ;;  %v5171_v13 = vld [vmem:[#allocation3 + $0x80] sm:$0xff]  ;;  %v4356_v39 = vld [vmem:[%s5387_s6 + $0x158] sm:$0xff]   ;;  %v4365_v37 = vld [vmem:[%s5387_s6 + $0x1b0] sm:$0xff]  }
 0x189   : > { %4062 = vmatprep.mubr.bf16.mxu0 %v5082_v42  ;;  %v2200_v61 = vpack.c.bf16 %v5171_v13, %v5091_v51  ;;  %v4367_v41 = vld [vmem:[%s5387_s6 + $0x1a8] sm:$0xff]  }
 0x18a   : > { %4093 = vmatpush3.bf16.msra.mxu0 %v4334_v30  ;;  %v1762_v47 = vld [vmem:[#allocation3 + $0x60] sm:$0xff] }
 0x18b   : > { %4094 = vmatprep.subr.bf16.mxu0 %v4336_v44  ;;  %v5094_v52 = vpack.c.bf16 %v5091_v51, %v1762_v47  ;;  %4073 = vmatpush3.bf16.msra.mxu1 %v4337_v35  ;;  %v5148_v15 = vld [vmem:[#allocation3 + $0x62] sm:$0xff]  ;;  %v2199_v50 = vpack.c.bf16 %v1762_v47, %v5076_v38  ;;  %v4364_v38 = vld [vmem:[%s5387_s6 + $0x1f8] sm:$0xff]  }
 0x18c   : > { %4074 = vmatprep.subr.bf16.mxu1 %v4339_v45  ;;  %v5160_v20 = vpack.c.bf16 %v5156_v18, %v5148_v15  ;;  %v4361_v30 = vld [vmem:[%s5387_s6 + $0x100] sm:$0xff]   ;;  %v2499_v2 = vpack.c.bf16 %v5148_v15, %v5121_v53  ;;  %v4375_v51 = vld [vmem:[%s5387_s6 + $0x188] sm:$0xff]  }
 0x18d   : > { %4063 = vmatmul.mubr.bf16.gmra.mxu0 %v5094_v52  ;;  %v4362_v35 = vld [vmem:[%s5387_s6 + $0x140] sm:$0xff]  }
 0x18e   : > { %4095 = vmatpush3.bf16.msra.mxu0 %v4336_v44  ;;  %4106 = vmatprep.mubr.bf16.mxu0 %v2197_v43  ;;  %v5236_v44 = vld [vmem:[#allocation3 + $0x82] sm:$0xff] }
 0x18f   : > { %4096 = vmatprep.subr.bf16.mxu0 %v4338_v46  ;;  %4075 = vmatpush3.bf16.msra.mxu1 %v4339_v45  ;;  %v4371_v45 = vld [vmem:[%s5387_s6 + $0x198] sm:$0xff]   ;;  %v2500_v47 = vpack.c.bf16 %v5236_v44, %v5156_v18  ;;  %v4376_v43 = vld [vmem:[%s5387_s6 + $0x1c8] sm:$0xff]  }
 0x190   : > { %4076 = vmatprep.subr.bf16.mxu1 %v4341_v56 }
 0x192   : > { %4097 = vmatpush3.bf16.msra.mxu0 %v4338_v46  ;;  %v4374_v46 = vld [vmem:[%s5387_s6 + $0x1d0] sm:$0xff]  }
 0x193   : > { %4098 = vmatprep.subr.bf16.mxu0 %v4340_v4  ;;  %4077 = vmatpush3.bf16.msra.mxu1 %v4341_v56  ;;  %v4379_v56 = vld [vmem:[%s5387_s6 + $0x238] sm:$0xff]  }
 0x194   : > { %4078 = vmatprep.subr.bf16.mxu1 %v4343_v36 }
 0x196   : > { %4099 = vmatpush3.bf16.msra.mxu0 %v4340_v4  ;;  %v4378_v4 = vld [vmem:[%s5387_s6 + $0x1c0] sm:$0xff]  }
 0x197   : > { %4100 = vmatprep.subr.bf16.mxu0 %v4342_v49  ;;  %4079 = vmatpush3.bf16.msra.mxu1 %v4343_v36  ;;  %v4380_v36 = vld [vmem:[%s5387_s6 + $0x230] sm:$0xff]  }
 0x198   : > { %4080 = vmatprep.subr.bf16.mxu1 %v4345_v6 }
 0x19a   : > { %4101 = vmatpush3.bf16.msra.mxu0 %v4342_v49  ;;  %v4381_v49 = vld [vmem:[%s5387_s6 + $0x228] sm:$0xff]  }
 0x19b   : > { %4102 = vmatprep.subr.bf16.mxu0 %v4344_v40  ;;  %4081 = vmatpush3.bf16.msra.mxu1 %v4345_v6  ;;  %v2651_v6 = vpack.c.bf16 %v5409_v19, %v5171_v13  ;;  %v4384_v19 = vld [vmem:[%s5387_s6 + $0x210] sm:$0xff]  }
 0x19c   : > { %4114 = vmatprep.subr.bf16.mxu1 %v4347_v55 }
 0x19e   : > { %4103 = vmatpush3.bf16.msra.mxu0 %v4344_v40  ;;  %4083 = vmatmul.mubr.bf16.vlgmr.msra.gmra.mxu1 %v5129_v27 }
 0x19f   : > { %4104 = vmatprep.subr.bf16.mxu0 %v4346_v28  ;;  %4086 = vmatprep.mubr.bf16.mxu1 %v5135_v60 }
 0x1a0   : > { %4115 = vmatpush3.bf16.msra.mxu1 %v4347_v55  ;;  %v4386_v55 = vld [vmem:[%s5387_s6 + $0x200] sm:$0xff]  }
 0x1a1   : > { %4116 = vmatprep.subr.bf16.mxu1 %v4349_v22 }
 0x1a2   : > { %4105 = vmatpush3.bf16.msra.mxu0 %v4346_v28 }
 0x1a3   : > { %4138 = vmatprep.subr.bf16.mxu0 %v4348_v5 }
 0x1a4   : > { %4117 = vmatpush3.bf16.msra.mxu1 %v4349_v22 }
 0x1a5   : > { %4107 = vmatmul.mubr.bf16.vlgmr.msra.gmra.mxu0 %v2198_v29  ;;  %4118 = vmatprep.subr.bf16.mxu1 %v4351_v11 }
 0x1a6   : > { %4110 = vmatprep.mubr.bf16.mxu0 %v2199_v50  ;;  %4139 = vmatpush3.bf16.msra.mxu0 %v4348_v5 }
 0x1a7   : > { %4140 = vmatprep.subr.bf16.mxu0 %v4350_v16  ;;  %4087 = vmatmul.mubr.bf16.gmra.mxu1 %v5160_v20 }
 0x1a8   : > { %4119 = vmatpush3.bf16.msra.mxu1 %v4351_v11  ;;  %4130 = vmatprep.mubr.bf16.mxu1 %v2347_v62 }
 0x1a9   : > { %4120 = vmatprep.subr.bf16.mxu1 %v4353_v63 }
 0x1aa   : > { %4141 = vmatpush3.bf16.msra.mxu0 %v4350_v16 }
 0x1ab   : > { %4142 = vmatprep.subr.bf16.mxu0 %v4352_v17 }
 0x1ac   : > { %4121 = vmatpush3.bf16.msra.mxu1 %v4353_v63 }
 0x1ad   : > { %4111 = vmatmul.mubr.bf16.gmra.mxu0 %v2200_v61  ;;  %4122 = vmatprep.subr.bf16.mxu1 %v4355_v23 }
 0x1ae   : > { %4143 = vmatpush3.bf16.msra.mxu0 %v4352_v17  ;;  %4154 = vmatprep.mubr.bf16.mxu0 %v2497_v7 }
 0x1af   : > { %4144 = vmatprep.subr.bf16.mxu0 %v4354_v48 }
 0x1b0   : > { %4123 = vmatpush3.bf16.msra.mxu1 %v4355_v23 }
 0x1b1   : > { %4124 = vmatprep.subr.bf16.mxu1 %v4357_v57 }
 0x1b2   : > { %4145 = vmatpush3.bf16.msra.mxu0 %v4354_v48 }
 0x1b3   : > { %4146 = vmatprep.subr.bf16.mxu0 %v4356_v39 }
 0x1b4   : > { %4125 = vmatpush3.bf16.msra.mxu1 %v4357_v57 }
 0x1b5   : > { %4126 = vmatprep.subr.bf16.mxu1 %v4359_v24 }
 0x1b6   : > { %4147 = vmatpush3.bf16.msra.mxu0 %v4356_v39 }
 0x1b7   : > { %4148 = vmatprep.subr.bf16.mxu0 %v4358_v25 }
 0x1b8   : > { %4127 = vmatpush3.bf16.msra.mxu1 %v4359_v24 }
 0x1b9   : > { %4128 = vmatprep.subr.bf16.mxu1 %v4361_v30 }
 0x1ba   : > { %4149 = vmatpush3.bf16.msra.mxu0 %v4358_v25 }
 0x1bb   : > { %4150 = vmatprep.subr.bf16.mxu0 %v4360_v33 }
 0x1bc   : > { %4129 = vmatpush3.bf16.msra.mxu1 %v4361_v30 }
 0x1bd   : > { %4162 = vmatprep.subr.bf16.mxu1 %v4363_v34 }
 0x1be   : > { %4151 = vmatpush3.bf16.msra.mxu0 %v4360_v33 }
 0x1bf   : > { %4152 = vmatprep.subr.bf16.mxu0 %v4362_v35  ;;  %4131 = vmatmul.mubr.bf16.vlgmr.msra.gmra.mxu1 %v2348_v54  ;;  %v4369_v54 = vld [vmem:[%s5387_s6 + $0x1a0] sm:$0xff]  }
 0x1c0   : > { %4134 = vmatprep.mubr.bf16.mxu1 %v2349_v31  ;;  %4163 = vmatpush3.bf16.msra.mxu1 %v4363_v34 }
 0x1c1   : > { %4164 = vmatprep.subr.bf16.mxu1 %v4365_v37 }
 0x1c2   : > { %4153 = vmatpush3.bf16.msra.mxu0 %v4362_v35 }
 0x1c3   : > { %4186 = vmatprep.subr.bf16.mxu0 %v4364_v38 }
 0x1c4   : > { %4165 = vmatpush3.bf16.msra.mxu1 %v4365_v37 }
 0x1c5   : > { %4155 = vmatmul.mubr.bf16.vlgmr.msra.gmra.mxu0 %v2498_v59  ;;  %4166 = vmatprep.subr.bf16.mxu1 %v4367_v41 }
 0x1c6   : > { %4158 = vmatprep.mubr.bf16.mxu0 %v2499_v2  ;;  %4187 = vmatpush3.bf16.msra.mxu0 %v4364_v38 }
 0x1c7   : > { %4188 = vmatprep.subr.bf16.mxu0 %v4366_v3  ;;  %4135 = vmatmul.mubr.bf16.gmra.mxu1 %v2350_v12  ;;  %v4373_v12 = vld [vmem:[%s5387_s6 + $0x190] sm:$0xff]  }
 0x1c8   : > { %4167 = vmatpush3.bf16.msra.mxu1 %v4367_v41  ;;  %4178 = vmatprep.mubr.bf16.mxu1 %v5058_v26  ;;  %v4372_v26 = vld [vmem:[%s5387_s6 + $0x1d8] sm:$0xff]  }
 0x1c9   : > { %4168 = vmatprep.subr.bf16.mxu1 %v4369_v54 }
 0x1ca   : > { %4189 = vmatpush3.bf16.msra.mxu0 %v4366_v3 }
 0x1cb   : > { %4190 = vmatprep.subr.bf16.mxu0 %v4368_v21 }
 0x1cc   : > { %4169 = vmatpush3.bf16.msra.mxu1 %v4369_v54 }
 0x1cd   : > { %4159 = vmatmul.mubr.bf16.gmra.mxu0 %v2500_v47  ;;  %4170 = vmatprep.subr.bf16.mxu1 %v4371_v45 }
 0x1ce   : > { %4191 = vmatpush3.bf16.msra.mxu0 %v4368_v21  ;;  %4202 = vmatprep.mubr.bf16.mxu0 %v5024_v8  ;;  %v4377_v8 = vld [vmem:[%s5387_s6 + $0x180] sm:$0xff]  }
 0x1cf   : > { %4192 = vmatprep.subr.bf16.mxu0 %v4370_v58 }
 0x1d0   : > { %4171 = vmatpush3.bf16.msra.mxu1 %v4371_v45 }
 0x1d1   : > { %4172 = vmatprep.subr.bf16.mxu1 %v4373_v12 }
 0x1d2   : > { %4193 = vmatpush3.bf16.msra.mxu0 %v4370_v58 }
 0x1d3   : > { %4194 = vmatprep.subr.bf16.mxu0 %v4372_v26 }
 0x1d4   : > { %4173 = vmatpush3.bf16.msra.mxu1 %v4373_v12 }
 0x1d5   : > { %4174 = vmatprep.subr.bf16.mxu1 %v4375_v51 }
 0x1d6   : > { %4195 = vmatpush3.bf16.msra.mxu0 %v4372_v26 }
 0x1d7   : > { %4196 = vmatprep.subr.bf16.mxu0 %v4374_v46 }
 0x1d8   : > { %4175 = vmatpush3.bf16.msra.mxu1 %v4375_v51 }
 0x1d9   : > { %4176 = vmatprep.subr.bf16.mxu1 %v4377_v8 }
 0x1da   : > { %4197 = vmatpush3.bf16.msra.mxu0 %v4374_v46 }
 0x1db   : > { %4198 = vmatprep.subr.bf16.mxu0 %v4376_v43 }
 0x1dc   : > { %4177 = vmatpush3.bf16.msra.mxu1 %v4377_v8 }
 0x1dd   : > { %4210 = vmatprep.subr.bf16.mxu1 %v4379_v56 }
 0x1de   : > { %4199 = vmatpush3.bf16.msra.mxu0 %v4376_v43 }
 0x1df   : > { %4200 = vmatprep.subr.bf16.mxu0 %v4378_v4  ;;  %4179 = vmatmul.mubr.bf16.vlgmr.msra.gmra.mxu1 %v5082_v42  ;;  %v4382_v42 = vld [vmem:[%s5387_s6 + $0x220] sm:$0xff]  }
 0x1e0   : > { %4182 = vmatprep.mubr.bf16.mxu1 %v5094_v52  ;;  %4211 = vmatpush3.bf16.msra.mxu1 %v4379_v56  ;;  %v2797_v52 = vld [vmem:[#allocation3 + $0x91] sm:$0xff] }
 0x1e1   : > { %4212 = vmatprep.subr.bf16.mxu1 %v4380_v36  ;;  %v2801_v40 = vpack.c.bf16 %v2797_v52, %v5036_v14  ;;  %v2947_v14 = vld [vmem:[#allocation3 + $0x92] sm:$0xff] }
 0x1e2   : > { %4201 = vmatpush3.bf16.msra.mxu0 %v4378_v4  ;;  %v2951_v0 = vpack.c.bf16 %v2947_v14, %v5236_v44 }
 0x1e4   : > { %4213 = vmatpush3.bf16.msra.mxu1 %v4380_v36 }
 0x1e5   : > { %4203 = vmatmul.mubr.bf16.vlgmr.msra.gmra.mxu0 %v5043_v1  ;;  %4214 = vmatprep.subr.bf16.mxu1 %v4381_v49  ;;  %v4383_v1 = vld [vmem:[%s5387_s6 + $0x218] sm:$0xff]  }
 0x1e6   : > { %4206 = vmatprep.mubr.bf16.mxu0 %v5065_v32  ;;  %v4385_v32 = vld [vmem:[%s5387_s6 + $0x208] sm:$0xff]  }
 0x1e7   : > { %4183 = vmatmul.mubr.bf16.gmra.mxu1 %v2651_v6 }
 0x1e8   : > { %4215 = vmatpush3.bf16.msra.mxu1 %v4381_v49  ;;  %4226 = vmatprep.mubr.bf16.mxu1 %v5129_v27 }
 0x1e9   : > { %4216 = vmatprep.subr.bf16.mxu1 %v4382_v42 }
 0x1ec   : > { %4217 = vmatpush3.bf16.msra.mxu1 %v4382_v42 }
 0x1ed   : > { %4207 = vmatmul.mubr.bf16.gmra.mxu0 %v2801_v40  ;;  %4218 = vmatprep.subr.bf16.mxu1 %v4383_v1 }
 0x1f0   : > { %4219 = vmatpush3.bf16.msra.mxu1 %v4383_v1 }
 0x1f1   : > { %4220 = vmatprep.subr.bf16.mxu1 %v4384_v19 }
 0x1f4   : > { %4221 = vmatpush3.bf16.msra.mxu1 %v4384_v19 }
 0x1f5   : > { %4222 = vmatprep.subr.bf16.mxu1 %v4385_v32 }
 0x1f8   : > { %4223 = vmatpush3.bf16.msra.mxu1 %v4385_v32 }
 0x1f9   : > { %4224 = vmatprep.subr.bf16.mxu1 %v4386_v55 }
 0x1fc   : > { %4225 = vmatpush3.bf16.msra.mxu1 %v4386_v55 }
 0x1ff   : > { %4227 = vmatmul.mubr.bf16.vlgmr.msra.gmra.mxu1 %v5135_v60 }
 0x200   : > { %4230 = vmatprep.mubr.bf16.mxu1 %v5160_v20 }
 0x207   : > { %4231 = vmatmul.mubr.bf16.gmra.mxu1 %v2951_v0 }
 0x23e   : > { %v4036_v53 = vpop.f32.mrf.mxu1 }
 0x240   : > { %v1895_v28 = vpop.f32.mrf.mxu1 }
 0x242   : > { %v4037_v9 = vpop.f32.mrf.mxu1 }
 0x244   : > { %v1898_v10 = vpop.f32.mrf.mxu1 }
 0x245   : > { %v4060_v27 = vpop.f32.mrf.mxu0 }
 0x246   : > { %v4040_v5 = vpop.f32.mrf.mxu1  ;;  %v2017_v42 = vadd.f32 %v4060_v27, %v4036_v53 }
 0x247   : > { %v2008_v22 = vpop.f32.mrf.mxu0 }
 0x248   : > { %v5304_v15 = vpop.f32.mrf.mxu1  ;;  %v2009_v52 = vadd.f32 %v2008_v22, %v1895_v28 }
 0x249   : > { %v4061_v11 = vpop.f32.mrf.mxu0 }
 0x24a   : > { %v5306_v16 = vpop.f32.mrf.mxu1  ;;  %v2020_v32 = vadd.f32 %v4061_v11, %v4037_v9 }
 0x24b   : > { %v2011_v29 = vpop.f32.mrf.mxu0 }
 0x24c   : > { %v5308_v50 = vpop.f32.mrf.mxu1  ;;  %v2012_v0 = vadd.f32 %v2011_v29, %v1898_v10 }
 0x24d   : > { %v4064_v60 = vpop.f32.mrf.mxu0 }
 0x24f   : > { %v2024_v20 = vpop.f32.mrf.mxu0 }
 0x250   : > { %v2025_v28 = vadd.f32 %v2024_v20, %v5304_v15 }
 0x251   : > { %v5310_v62 = vpop.f32.mrf.mxu0 }
 0x252   : > { %v2036_v10 = vadd.f32 %v5310_v62, %v5306_v16 }
 0x253   : > { %v5312_v13 = vpop.f32.mrf.mxu0 }
 0x254   : > { %v2028_v15 = vadd.f32 %v5312_v13, %v5308_v50  ;;  %v3090_v13 = vld [vmem:[%s4533_s29] sm:$0xff] }
 0x25e   : > { %v4084_v18 = vpop.f32.mrf.mxu1 }
 0x25f   : > { %v2183_v1 = vadd.f32 %v4084_v18, %v2017_v42 }
 0x260   : > { %v2150_v63 = vpop.f32.mrf.mxu1 }
 0x261   : > { %v2181_v14 = vadd.f32 %v2150_v63, %v2009_v52 }
 0x262   : > { %v4085_v17 = vpop.f32.mrf.mxu1 }
 0x264   : > { %v2153_v61 = vpop.f32.mrf.mxu1 }
 0x265   : > { %v4108_v23 = vpop.f32.mrf.mxu0 }
 0x266   : > { %v2333_v55 = vadd.f32 %v4108_v23, %v2183_v1 }
 0x267   : > { %v2300_v48 = vpop.f32.mrf.mxu0  ;;  %v4088_v7 = vpop.f32.mrf.mxu1 }
 0x269   : > { %v4109_v57 = vpop.f32.mrf.mxu0  ;;  %v2166_v39 = vpop.f32.mrf.mxu1 }
 0x26b   : > { %v2303_v24 = vpop.f32.mrf.mxu0  ;;  %v5314_v25 = vpop.f32.mrf.mxu1 }
 0x26d   : > { %v4112_v30 = vpop.f32.mrf.mxu0  ;;  %v5316_v33 = vpop.f32.mrf.mxu1 }
 0x26e   : > { %5412 = vst [vmem:[#allocation7_spill] sm:$0xff] %v5316_v33 }
 0x26f   : > { %v2316_v35 = vpop.f32.mrf.mxu0 }
 0x271   : > { %v5318_v31 = vpop.f32.mrf.mxu0 }
 0x272   : > { %5413 = vst [vmem:[#allocation8_spill] sm:$0xff] %v5318_v31  ;;  %v2182_v31 = vadd.f32 %v2153_v61, %v2012_v0 }
 0x273   : > { %v5320_v41 = vpop.f32.mrf.mxu0 }
 0x274   : > { %5414 = vst [vmem:[#allocation9_spill] sm:$0xff] %v5320_v41  ;;  %v2332_v22 = vadd.f32 %v2303_v24, %v2182_v31 }
 0x275   : > { %v5422_v31 = vld [vmem:[#allocation7_spill] sm:$0xff] }
 0x27f   : > { %v4132_v34 = vpop.f32.mrf.mxu1 }
 0x281   : > { %v2450_v37 = vpop.f32.mrf.mxu1 }
 0x283   : > { %v4133_v38 = vpop.f32.mrf.mxu1 }
 0x285   : > { %v4156_v59 = vpop.f32.mrf.mxu0  ;;  %v2453_v3 = vpop.f32.mrf.mxu1 }
 0x286   : > { %v2482_v23 = vadd.f32 %v2453_v3, %v2332_v22 }
 0x287   : > { %v2600_v2 = vpop.f32.mrf.mxu0  ;;  %v4136_v54 = vpop.f32.mrf.mxu1 }
 0x289   : > { %v4157_v21 = vpop.f32.mrf.mxu0  ;;  %v2466_v44 = vpop.f32.mrf.mxu1 }
 0x28b   : > { %v2603_v45 = vpop.f32.mrf.mxu0  ;;  %v5322_v47 = vpop.f32.mrf.mxu1 }
 0x28c   : > { %5415 = vst [vmem:[#allocation10_spill] sm:$0xff] %v5322_v47  ;;  %v2483_v47 = vadd.f32 %v4132_v34, %v2333_v55  ;;  %v2632_v16 = vadd.f32 %v2603_v45, %v2482_v23  ;;  %v5421_v34 = vld [vmem:[#allocation8_spill] sm:$0xff]  ;;  %v5423_v45 = vld [vmem:[#allocation9_spill] sm:$0xff] }
 0x28d   : > { %v4160_v58 = vpop.f32.mrf.mxu0  ;;  %v5324_v12 = vpop.f32.mrf.mxu1  ;;  %v3091_v55 = vld [vmem:[%s4533_s29 + $0x8] sm:$0xff] }
 0x28e   : > { %5416 = vst [vmem:[#allocation11_spill] sm:$0xff] %v5324_v12  ;;  %v2331_v12 = vadd.f32 %v2300_v48, %v2181_v14 }
 0x28f   : > { %v5326_v51 = vpop.f32.mrf.mxu0 }
 0x290   : > { %5417 = vst [vmem:[#allocation12_spill] sm:$0xff] %v5326_v51  ;;  %v2033_v51 = vadd.f32 %v4064_v60, %v4040_v5  ;;  %v2481_v53 = vadd.f32 %v2450_v37, %v2331_v12  ;;  %v2185_v5 = vadd.f32 %v2166_v39, %v2025_v28 }
 0x291   : > { %v5328_v8 = vpop.f32.mrf.mxu0 }
 0x292   : > { %5418 = vst [vmem:[#allocation4_spill] sm:$0xff] %v5328_v8  ;;  %v2184_v8 = vadd.f32 %v4085_v17, %v2020_v32  ;;  %v2187_v27 = vadd.f32 %v4088_v7, %v2033_v51  ;;  %v2631_v18 = vadd.f32 %v2600_v2, %v2481_v53  ;;  %v2335_v20 = vadd.f32 %v2316_v35, %v2185_v5 }
 0x293   : > { %v5330_v56 = vpop.f32.mrf.mxu0  ;;  %v2188_v7 = vadd.f32 %v5314_v25, %v2036_v10 }
 0x294   : > { %5419 = vst [vmem:[#allocation5_spill] sm:$0xff] %v5330_v56  ;;  %v2334_v33 = vadd.f32 %v4109_v57, %v2184_v8  ;;  %v2337_v29 = vadd.f32 %v4112_v30, %v2187_v27  ;;  %v2485_v3 = vadd.f32 %v2466_v44, %v2335_v20  ;;  %v5425_v44 = vld [vmem:[#allocation10_spill] sm:$0xff]  ;;  %v3097_v20 = vld [vmem:[%s4533_s29 + $0x38] sm:$0xff] }
 0x295   : > { %v2338_v37 = vadd.f32 %v5421_v34, %v2188_v7  ;;  %v5428_v52 = vld [vmem:[#allocation11_spill] sm:$0xff] }
 0x296   : > { %v2484_v9 = vadd.f32 %v4133_v38, %v2334_v33  ;;  %v2487_v57 = vadd.f32 %v4136_v54, %v2337_v29  ;;  %v3092_v33 = vld [vmem:[%s4533_s29 + $0x10] sm:$0xff]  ;;  %v2186_v38 = vadd.f32 %v5422_v31, %v2028_v15 }
 0x297   : > { %v5424_v12 = vld [vmem:[#allocation12_spill] sm:$0xff] }
 0x298   : > { %v2634_v17 = vadd.f32 %v4157_v21, %v2484_v9 }
 0x29b   : > { %v5429_v28 = vld [vmem:[#allocation5_spill] sm:$0xff] }
 0x29f   : > { %v4180_v26 = vpop.f32.mrf.mxu1 }
 0x2a1   : > { %v2751_v46 = vpop.f32.mrf.mxu1 }
 0x2a2   : > { %v2782_v48 = vadd.f32 %v2751_v46, %v2631_v18  ;;  %v3093_v46 = vld [vmem:[%s4533_s29 + $0x18] sm:$0xff]  ;;  %v3096_v18 = vld [vmem:[%s4533_s29 + $0x30] sm:$0xff] }
 0x2a3   : > { %v4181_v43 = vpop.f32.mrf.mxu1 }
 0x2a4   : > { %v2785_v39 = vadd.f32 %v4181_v43, %v2634_v17 }
 0x2a5   : > { %v4204_v4 = vpop.f32.mrf.mxu0  ;;  %v2754_v36 = vpop.f32.mrf.mxu1 }
 0x2a6   : > { %v2783_v35 = vadd.f32 %v2754_v36, %v2632_v16  ;;  %v5427_v36 = vld [vmem:[#allocation4_spill] sm:$0xff] }
 0x2a7   : > { %v2901_v49 = vpop.f32.mrf.mxu0  ;;  %v5332_v6 = vpop.f32.mrf.mxu1 }
 0x2a8   : > { %5420 = vst [vmem:[#allocation6_spill] sm:$0xff] %v5332_v6  ;;  %v2633_v6 = vadd.f32 %v4156_v59, %v2483_v47  ;;  %v2932_v62 = vadd.f32 %v2901_v49, %v2782_v48  ;;  %v2637_v59 = vadd.f32 %v4160_v58, %v2487_v57  ;;  %v2336_v47 = vadd.f32 %v5423_v45, %v2186_v38 }
 0x2a9   : > { %v4205_v40 = vpop.f32.mrf.mxu0  ;;  %v5334_v19 = vpop.f32.mrf.mxu1  ;;  %v2635_v58 = vadd.f32 %v5424_v12, %v2485_v3 }
 0x2aa   : > { %v2784_v11 = vadd.f32 %v4180_v26, %v2633_v6  ;;  %v2935_v25 = vadd.f32 %v4205_v40, %v2785_v39  ;;  %v2488_v26 = vadd.f32 %v5425_v44, %v2338_v37  ;;  %v2486_v1 = vadd.f32 %v5428_v52, %v2336_v47 }
 0x2ab   : > { %v2904_v56 = vpop.f32.mrf.mxu0  ;;  %v5336_v41 = vpop.f32.mrf.mxu1  ;;  %v2786_v0 = vadd.f32 %v5334_v19, %v2635_v58 }
 0x2ac   : > { %v2934_v61 = vadd.f32 %v4204_v4, %v2784_v11  ;;  %v2933_v8 = vadd.f32 %v2904_v56, %v2783_v35  ;;  %v2638_v42 = vadd.f32 %v5427_v36, %v2488_v26  ;;  %v2636_v27 = vadd.f32 %v5429_v28, %v2486_v1 }
 0x2ad   : > { %v4208_v60 = vpop.f32.mrf.mxu0  ;;  %v2770_v63 = vpop.f32.mrf.mxu1 }
 0x2ae   : > { %v2789_v11 = vadd.f32 %v5336_v41, %v2638_v42  ;;  %v2787_v23 = vadd.f32 %v2770_v63, %v2636_v27 }
 0x2af   : > { %v2917_v2 = vpop.f32.mrf.mxu0  ;;  %v5426_v43 = vld [vmem:[#allocation6_spill] sm:$0xff] }
 0x2b0   : > { %v2788_v4 = vadd.f32 %v5426_v43, %v2637_v59  ;;  %v2936_v9 = vadd.f32 %v2917_v2, %v2786_v0 }
 0x2b1   : > { %v4209_v40 = vpop.f32.mrf.mxu0 }
 0x2b2   : > { %v2938_v14 = vadd.f32 %v4208_v60, %v2788_v4  ;;  %v3094_v60 = vld [vmem:[%s4533_s29 + $0x20] sm:$0xff]  ;;  %v2939_v17 = vadd.f32 %v4209_v40, %v2789_v11 }
 0x2b3   : > { %v2920_v5 = vpop.f32.mrf.mxu0 }
 0x2b4   : > { %v2937_v7 = vadd.f32 %v2920_v5, %v2787_v23 }
 0x2bf   : > { %v4228_v24 = vpop.f32.mrf.mxu1 }
 0x2c0   : > { %v3084_v30 = vadd.f32 %v4228_v24, %v2934_v61 }
 0x2c1   : > { %v3051_v50 = vpop.f32.mrf.mxu1 }
 0x2c2   : > { %v3100_v54 = vadd.f32 %v3092_v33, %v3084_v30  ;;  %v3082_v21 = vadd.f32 %v3051_v50, %v2932_v62  ;;  %v3095_v33 = vld [vmem:[%s4533_s29 + $0x28] sm:$0xff] }
 0x2c3   : > { %v4229_v51 = vpop.f32.mrf.mxu1 }
 0x2c4   : > { %3108 = vst [vmem:[%s5352_s19 + $0x10] sm:$0xff] %v3100_v54  ;;  %v3098_v49 = vadd.f32 %v3090_v13, %v3082_v21  ;;  %v3085_v6 = vadd.f32 %v4229_v51, %v2935_v25 }
 0x2c5   : > { %v3054_v32 = vpop.f32.mrf.mxu1 }
 0x2c6   : > { %3106 = vst [vmem:[%s5352_s19] sm:$0xff] %v3098_v49  ;;  %v3101_v56 = vadd.f32 %v3093_v46, %v3085_v6  ;;  %v3083_v53 = vadd.f32 %v3054_v32, %v2933_v8 }
 0x2c7   : > { %v4232_v22 = vpop.f32.mrf.mxu1 }
 0x2c8   : > { %3109 = vst [vmem:[%s5352_s19 + $0x18] sm:$0xff] %v3101_v56  ;;  %v3099_v10 = vadd.f32 %v3091_v55, %v3083_v53  ;;  %v3088_v29 = vadd.f32 %v4232_v22, %v2938_v14 }
 0x2c9   : > { %v3067_v19 = vpop.f32.mrf.mxu1 }
 0x2ca   : > { %3107 = vst [vmem:[%s5352_s19 + $0x8] sm:$0xff] %v3099_v10  ;;  %v3104_v61 = vadd.f32 %v3096_v18, %v3088_v29  ;;  %v3086_v48 = vadd.f32 %v3067_v19, %v2936_v9 }
 0x2cb   : > { %v4233_v15 = vpop.f32.mrf.mxu1 }
 0x2cc   : > { %3112 = vst [vmem:[%s5352_s19 + $0x30] sm:$0xff] %v3104_v61  ;;  %v3102_v41 = vadd.f32 %v3094_v60, %v3086_v48  ;;  %v3089_v57 = vadd.f32 %v4233_v15, %v2939_v17 }
 0x2cd   : > { %v3070_v24 = vpop.f32.mrf.mxu1 }
 0x2ce   : > { %3110 = vst [vmem:[%s5352_s19 + $0x20] sm:$0xff] %v3102_v41  ;;  %v3105_v16 = vadd.f32 %v3097_v20, %v3089_v57  ;;  %v3087_v62 = vadd.f32 %v3070_v24, %v2937_v7 }
 0x2d0   : > { %3113 = vst [vmem:[%s5352_s19 + $0x38] sm:$0xff] %v3105_v16  ;;  %v3103_v39 = vadd.f32 %v3095_v33, %v3087_v62 }
 0x2d2   : > { %3111 = vst [vmem:[%s5352_s19 + $0x28] sm:$0xff] %v3103_v39 }
 0x2d3 PF: > { %s17_s24 = sadd.s32 1, %s4394_s24  }
 0x2d4   : > { %p14_p4 = scmp.ge.s32.totalorder %s17_s24, 4  }
 0x2d6   :  { %16 = sbr.rel (!%p14_p4) target bundleno = 1 (0x1), region = 98 }

// kernel: _lambda_.2
= control target key start
LH: loop header
LB: loop body
LE: loop exit
PB: predicated region body
PF: predicated region fallthrough
CT: control target
= control target key end

     0   :  { %s4853_s27 = smov 0   ;;  %s6028_s0 = inlined_call_operand.vmem [shape: f32[8,8,8,128], index: 0, kind: input, shape index: {}]   ;;  %s6029_s1 = inlined_call_operand.vmem [shape: f32[1,128], index: 1, kind: input, shape index: {}]   ;;  %s6030_s2 = inlined_call_operand.vmem [shape: f32[1,128], index: 2, kind: input, shape index: {}]   ;;  %s6031_s3 = inlined_call_operand.vmem [shape: bf16[9,128,128], index: 3, kind: input, shape index: {}]   ;;  %s6032_s4 = inlined_call_operand.vmem [shape: f32[1,128], index: 4, kind: input, shape index: {}]   ;;  %s6033_s5 = inlined_call_operand.vmem [shape: f32[1,128], index: 5, kind: input, shape index: {}]   ;;  %s6034_s6 = inlined_call_operand.vmem [shape: bf16[9,128,128], index: 6, kind: input, shape index: {}]   ;;  %s6035_s7 = inlined_call_operand.vmem [shape: bf16[128,128], index: 7, kind: input, shape index: {}]   ;;  %s6036_s8 = inlined_call_operand.vmem [shape: f32[2,8,8,128], index: 8, kind: output, shape index: {}]  }
   0x1 LB: > { %s4859_s28 = sadd.s32 4294967295, %s4805_s27   ;;  %p3514_p0 = scmp.ge.s32.totalorder %s4805_s27, 1  ;;  %s4805_s27 = sphi %s4853_s27, %s18_s27  }
   0x2   : > { %p264_p1 = scmp.lt.s32.totalorder %s4805_s27, 3 }
   0x4   : > { %p265_p2 = pnand %p3514_p0, %p264_p1 }
   0x6   : > { %268 = sbr.rel (%p265_p2) target bundleno = 747 (0x2eb), region = 52 }
   0xb   : > { %v4645_v0 = vld [vmem:[%s6031_s3 + $0x78] sm:$0xff]   ;;  %s3515_s9 = sshll.u32 %s4859_s28, 2  ;;  %v4875_v2 = vld [vmem:[%s6031_s3 + $0x70] sm:$0xff]   ;;  %v4807_v4 = vmov 0.0   ;;  %v4649_v5 = vld [vmem:[%s6031_s3 + $0x68] sm:$0xff]   ;;  %p306_p4 = scmp.lt.s32.totalorder %s4859_s28, 1 }
   0xc   : > { %v4870_v1 = vld [vmem:[%s6031_s3 + $0x38] sm:$0xff]   ;;  %4164 = vmatprep.subr.bf16.mxu0 %v4645_v0  ;;  %v4881_v3 = vld [vmem:[%s6031_s3 + $0x30] sm:$0xff]   ;;  %p4885_p3 = scmp.lt.s32.totalorder %s3515_s9, 7  ;;  %312 = vst [vmem:[#allocation2] sm:$0xff] %v4807_v4  ;;  %348 = vst [vmem:[#allocation2 + $0x120] sm:$0xff] %v4807_v4 }
   0xd   : > { %4188 = vmatprep.subr.bf16.mxu1 %v4870_v1  ;;  %4165 = vmatpush3.bf16.msra.mxu0 %v4645_v0  ;;  %349 = vst [vmem:[#allocation2 + $0x128] sm:$0x1] %v4807_v4  ;;  %350 = vst [vmem:[#allocation2 + $0x130] sm:$0xff] %v4807_v4  ;;  %v4650_v6 = vld [vmem:[%s6031_s3 + $0x28] sm:$0xff]   ;;  %v4651_v7 = vld [vmem:[%s6031_s3 + $0x60] sm:$0xff]   ;;  %s6067_s28 = smov (!%p306_p4, %s4859_s28), 1 }
   0xe   : > { %351 = vst [vmem:[#allocation2 + $0x138] sm:$0x1] %v4807_v4  ;;  %314 = vst [vmem:[#allocation2 + $0x10] sm:$0xff] %v4807_v4  ;;  %4189 = vmatpush3.bf16.msra.mxu1 %v4870_v1  ;;  %4166 = vmatprep.subr.bf16.mxu0 %v4875_v2  ;;  %s6065_s9 = smov (!%p4885_p3, %s3515_s9), 7  ;;  %v4652_v8 = vld [vmem:[%s6031_s3 + $0x20] sm:$0xff]   ;;  %v4653_v9 = vld [vmem:[%s6031_s3 + $0x58] sm:$0xff]  }
   0xf   : > { %315 = vst [vmem:[#allocation2 + $0x18] sm:$0x1] %v4807_v4  ;;  %316 = vst [vmem:[#allocation2 + $0x20] sm:$0xff] %v4807_v4  ;;  %4190 = vmatprep.subr.bf16.mxu1 %v4881_v3  ;;  %s3934_s25 = sshll.u32 %s6065_s9, 6  ;;  %v4654_v10 = vld [vmem:[%s6031_s3 + $0x18] sm:$0xff]   ;;  %v4655_v11 = vld [vmem:[%s6031_s3 + $0x50] sm:$0xff]  }
  0x10   : > { %317 = vst [vmem:[#allocation2 + $0x28] sm:$0x1] %v4807_v4  ;;  %318 = vst [vmem:[#allocation2 + $0x30] sm:$0xff] %v4807_v4  ;;  %s4982_s13 = scalar_lea.vmem %s6028_s0, %s3934_s25  ;;  %v4656_v12 = vld [vmem:[%s6031_s3 + $0x10] sm:$0xff]   ;;  %v4994_v14 = vld [vmem:[%s6029_s1] ss:$0 sm:$0xff] }
  0x11   : > { %319 = vst [vmem:[#allocation2 + $0x38] sm:$0x1] %v4807_v4  ;;  %320 = vst [vmem:[#allocation2 + $0x40] sm:$0xff] %v4807_v4  ;;  %4167 = vmatpush3.bf16.msra.mxu0 %v4875_v2  ;;  %v400_v13 = vld [vmem:[%s4982_s13 + $0x80] sm:$0xff]  ;;  %v401_v18 = vld [vmem:[%s4982_s13 + $0x88] sm:$0xff]  ;;  %s3935_s30 = sshll.u32 %s6067_s28, 6 }
  0x12   : > { %321 = vst [vmem:[#allocation2 + $0x48] sm:$0x1] %v4807_v4  ;;  %322 = vst [vmem:[#allocation2 + $0x50] sm:$0xff] %v4807_v4  ;;  %4191 = vmatpush3.bf16.msra.mxu1 %v4881_v3  ;;  %4168 = vmatprep.subr.bf16.mxu0 %v4649_v5  ;;  %v439_v15 = vmul.f32 %v4994_v14, %v400_v13  ;;  %v5000_v16 = vld [vmem:[%s6030_s2] ss:$0 sm:$0xff]  ;;  %v402_v20 = vld [vmem:[%s4982_s13 + $0x90] sm:$0xff]  ;;  %v440_v21 = vmul.f32 %v4994_v14, %v401_v18  ;;  %s5988_s12 = scalar_lea.vmem %s6036_s8, %s3935_s30 }
  0x13   : > { %323 = vst [vmem:[#allocation2 + $0x58] sm:$0x1] %v4807_v4  ;;  %324 = vst [vmem:[#allocation2 + $0x60] sm:$0xff] %v4807_v4  ;;  %4192 = vmatprep.subr.bf16.mxu1 %v4650_v6  ;;  %v408_v17 = vld [vmem:[%s4982_s13 + $0xc0] sm:$0xff]  ;;  %v409_v22 = vld [vmem:[%s4982_s13 + $0xc8] sm:$0xff]  ;;  %v441_v26 = vmul.f32 %v4994_v14, %v402_v20 }
  0x14   : > { %325 = vst [vmem:[#allocation2 + $0x68] sm:$0x1] %v4807_v4  ;;  %326 = vst [vmem:[#allocation2 + $0x70] sm:$0xff] %v4807_v4  ;;  %v447_v19 = vmul.f32 %v4994_v14, %v408_v17  ;;  %v410_v23 = vld [vmem:[%s4982_s13 + $0xd0] sm:$0xff]  ;;  %v4657_v24 = vld [vmem:[%s6031_s3 + $0x48] sm:$0xff]   ;;  %v478_v25 = vadd.f32 %v5000_v16, %v439_v15  ;;  %v448_v27 = vmul.f32 %v4994_v14, %v409_v22 }
  0x15   : > { %327 = vst [vmem:[#allocation2 + $0x78] sm:$0x1] %v4807_v4  ;;  %328 = vst [vmem:[#allocation2 + $0x80] sm:$0xff] %v4807_v4  ;;  %4169 = vmatpush3.bf16.msra.mxu0 %v4649_v5  ;;  %v449_v28 = vmul.f32 %v4994_v14, %v410_v23  ;;  %v589_v29 = vld [vmem:[#allocation2 + $0x121] sm:$0xff]  ;;  %v5020_v31 = vadd.f32 %v5000_v16, %v440_v21  ;;  %v5026_v34 = vadd.f32 %v5000_v16, %v441_v26  ;;  %v4661_v45 = vld [vmem:[%s6031_s3 + $0xb8] sm:$0xff]  }
  0x16   : > { %329 = vst [vmem:[#allocation2 + $0x88] sm:$0x1] %v4807_v4  ;;  %332 = vst [vmem:[#allocation2 + $0xa0] sm:$0xff] %v4807_v4  ;;  %4193 = vmatpush3.bf16.msra.mxu1 %v4650_v6  ;;  %4170 = vmatprep.subr.bf16.mxu0 %v4651_v7  ;;  %v5017_v30 = vadd.f32 %v5000_v16, %v447_v19  ;;  %v4658_v32 = vld [vmem:[%s6031_s3 + $0x8] sm:$0xff]   ;;  %v510_v33 = vmax.f32 %v478_v25, 0.0  ;;  %v5029_v35 = vadd.f32 %v5000_v16, %v448_v27  ;;  %v4659_v43 = vld [vmem:[%s6031_s3 + $0x40] sm:$0xff]  }
  0x17   : > { %334 = vst [vmem:[#allocation2 + $0xb0] sm:$0xff] %v4807_v4  ;;  %336 = vst [vmem:[#allocation2 + $0xc0] sm:$0xff] %v4807_v4  ;;  %4194 = vmatprep.subr.bf16.mxu1 %v4652_v8  ;;  %v5032_v36 = vadd.f32 %v5000_v16, %v449_v28  ;;  %v511_v38 = vmax.f32 %v5020_v31, 0.0  ;;  %v512_v40 = vmax.f32 %v5026_v34, 0.0  ;;  %v4660_v44 = vld [vmem:[%s6031_s3] sm:$0xff]   ;;  %v4662_v46 = vld [vmem:[%s6031_s3 + $0xf8] sm:$0xff]  }
  0x18   : > { %338 = vst [vmem:[#allocation2 + $0xd0] sm:$0xff] %v4807_v4  ;;  %340 = vst [vmem:[#allocation2 + $0xe0] sm:$0xff] %v4807_v4  ;;  %v518_v37 = vmax.f32 %v5017_v30, 0.0  ;;  %v597_v39 = vpack.c.bf16 %v510_v33, %v589_v29  ;;  %v519_v41 = vmax.f32 %v5029_v35, 0.0  ;;  %v403_v47 = vld [vmem:[%s4982_s13 + $0x98] sm:$0xff]  ;;  %v404_v48 = vld [vmem:[%s4982_s13 + $0xa0] sm:$0xff] }
  0x19   : > { %342 = vst [vmem:[#allocation2 + $0xf0] sm:$0xff] %v4807_v4  ;;  %344 = vst [vmem:[#allocation2 + $0x100] sm:$0xff] %v4807_v4  ;;  %4171 = vmatpush3.bf16.msra.mxu0 %v4651_v7  ;;  %v520_v42 = vmax.f32 %v5032_v36, 0.0  ;;  %v442_v49 = vmul.f32 %v4994_v14, %v403_v47  ;;  %v411_v50 = vld [vmem:[%s4982_s13 + $0xd8] sm:$0xff]  ;;  %v412_v51 = vld [vmem:[%s4982_s13 + $0xe0] sm:$0xff]  ;;  %v598_v52 = vpack.c.bf16 %v512_v40, %v511_v38 }
  0x1a   : > { %346 = vst [vmem:[#allocation2 + $0x110] sm:$0xff] %v4807_v4  ;;  %366 = vst [vmem:[#allocation2 + $0x1b0] sm:$0xff] %v4807_v4  ;;  %4195 = vmatpush3.bf16.msra.mxu1 %v4652_v8  ;;  %4172 = vmatprep.subr.bf16.mxu0 %v4653_v9  ;;  %v4663_v53 = vld [vmem:[%s6031_s3 + $0xb0] sm:$0xff]   ;;  %v443_v54 = vmul.f32 %v4994_v14, %v404_v48  ;;  %v450_v55 = vmul.f32 %v4994_v14, %v411_v50  ;;  %v405_v60 = vld [vmem:[%s4982_s13 + $0xa8] sm:$0xff] }
  0x1b   : > { %367 = vst [vmem:[#allocation2 + $0x1b8] sm:$0x1] %v4807_v4  ;;  %368 = vst [vmem:[#allocation2 + $0x1c0] sm:$0xff] %v4807_v4  ;;  %4196 = vmatprep.subr.bf16.mxu1 %v4654_v10  ;;  %4180 = vmatprep.mubr.bf16.mxu0 %v597_v39  ;;  %v451_v56 = vmul.f32 %v4994_v14, %v412_v51  ;;  %v4664_v58 = vld [vmem:[%s6031_s3 + $0xf0] sm:$0xff]   ;;  %v481_v59 = vadd.f32 %v5000_v16, %v442_v49  ;;  %v413_v3 = vld [vmem:[%s4982_s13 + $0xe8] sm:$0xff] }
  0x1c   : > { %369 = vst [vmem:[#allocation2 + $0x1c8] sm:$0x1] %v4807_v4  ;;  %370 = vst [vmem:[#allocation2 + $0x1d0] sm:$0xff] %v4807_v4  ;;  %v406_v61 = vld [vmem:[%s4982_s13 + $0xb0] sm:$0xff]  ;;  %v482_v1 = vadd.f32 %v5000_v16, %v443_v54  ;;  %v5088_v2 = vadd.f32 %v5000_v16, %v450_v55  ;;  %v4665_v13 = vld [vmem:[%s6031_s3 + $0xa8] sm:$0xff]  }
  0x1d   : > { %371 = vst [vmem:[#allocation2 + $0x1d8] sm:$0x1] %v4807_v4  ;;  %372 = vst [vmem:[#allocation2 + $0x1e0] sm:$0xff] %v4807_v4  ;;  %4173 = vmatpush3.bf16.msra.mxu0 %v4653_v9  ;;  %v513_v6 = vmax.f32 %v481_v59, 0.0  ;;  %v490_v7 = vadd.f32 %v5000_v16, %v451_v56  ;;  %v414_v8 = vld [vmem:[%s4982_s13 + $0xf0] sm:$0xff]  ;;  %v4666_v23 = vld [vmem:[%s6031_s3 + $0xe8] sm:$0xff]  }
  0x1e   : > { %373 = vst [vmem:[#allocation2 + $0x1e8] sm:$0x1] %v4807_v4  ;;  %374 = vst [vmem:[#allocation2 + $0x1f0] sm:$0xff] %v4807_v4  ;;  %4197 = vmatpush3.bf16.msra.mxu1 %v4654_v10  ;;  %4174 = vmatprep.subr.bf16.mxu0 %v4655_v11  ;;  %v514_v9 = vmax.f32 %v482_v1, 0.0  ;;  %v521_v10 = vmax.f32 %v5088_v2, 0.0  ;;  %v453_v18 = vmul.f32 %v4994_v14, %v414_v8  ;;  %v4667_v27 = vld [vmem:[%s6031_s3 + $0xa0] sm:$0xff]  }
  0x1f   : > { %375 = vst [vmem:[#allocation2 + $0x1f8] sm:$0x1] %v4807_v4  ;;  %376 = vst [vmem:[#allocation2 + $0x200] sm:$0xff] %v4807_v4  ;;  %4198 = vmatprep.subr.bf16.mxu1 %v4656_v12  ;;  %v5102_v15 = vmax.f32 %v490_v7, 0.0  ;;  %v5121_v26 = vpack.c.bf16 %v513_v6, %v512_v40  ;;  %v4668_v39 = vld [vmem:[%s6031_s3 + $0xe0] sm:$0xff]   ;;  %v394_v48 = vld [vmem:[%s4982_s13 + $0x50] sm:$0xff] }
  0x20   : > { %378 = vst [vmem:[#allocation2 + $0x210] sm:$0xff] %v4807_v4  ;;  %380 = vst [vmem:[#allocation2 + $0x220] sm:$0xff] %v4807_v4  ;;  %v599_v20 = vpack.c.bf16 %v514_v9, %v513_v6  ;;  %v492_v25 = vadd.f32 %v5000_v16, %v453_v18  ;;  %v395_v49 = vld [vmem:[%s4982_s13 + $0x58] sm:$0xff]  ;;  %v433_v51 = vmul.f32 %v4994_v14, %v394_v48  ;;  %v4671_v1 = vld [vmem:[%s6031_s3 + $0x90] sm:$0xff]  }
  0x21   : > { %382 = vst [vmem:[#allocation2 + $0x230] sm:$0xff] %v4807_v4  ;;  %1935 = vst [vmem:[#allocation3] sm:$0xff] %v4807_v4  ;;  %4175 = vmatpush3.bf16.msra.mxu0 %v4655_v11  ;;  %v445_v11 = vmul.f32 %v4994_v14, %v406_v61  ;;  %v434_v30 = vmul.f32 %v4994_v14, %v395_v49  ;;  %v397_v8 = vld [vmem:[%s4982_s13 + $0x68] sm:$0xff]  ;;  %v4704_v31 = vld [vmem:[%s6031_s3 + $0x1d0] sm:$0xff]  }
  0x22   : > { %1936 = vst [vmem:[#allocation3 + $0x8] sm:$0x3] %v4807_v4  ;;  %1937 = vst [vmem:[#allocation3 + $0x10] sm:$0xff] %v4807_v4  ;;  %4199 = vmatpush3.bf16.msra.mxu1 %v4656_v12  ;;  %4176 = vmatprep.subr.bf16.mxu0 %v4657_v24  ;;  %v452_v12 = vmul.f32 %v4994_v14, %v413_v3  ;;  %v5166_v56 = vadd.f32 %v5000_v16, %v433_v51  ;;  %v4675_v51 = vld [vmem:[%s6031_s3 + $0x80] sm:$0xff]  }
  0x23   : > { %1938 = vst [vmem:[#allocation3 + $0x18] sm:$0x3] %v4807_v4  ;;  %1939 = vst [vmem:[#allocation3 + $0x20] sm:$0xff] %v4807_v4  ;;  %4200 = vmatprep.subr.bf16.mxu1 %v4658_v32  ;;  %v5111_v21 = vadd.f32 %v5000_v16, %v445_v11 }
  0x24   : > { %1940 = vst [vmem:[#allocation3 + $0x28] sm:$0x3] %v4807_v4  ;;  %1941 = vst [vmem:[#allocation3 + $0x30] sm:$0xff] %v4807_v4  ;;  %v491_v22 = vadd.f32 %v5000_v16, %v452_v12  ;;  %v436_v12 = vmul.f32 %v4994_v14, %v397_v8  ;;  %v853_v8 = vpack.c.bf16 %v520_v42, %v519_v41 }
  0x25   : > { %1942 = vst [vmem:[#allocation3 + $0x38] sm:$0x3] %v4807_v4  ;;  %1943 = vst [vmem:[#allocation3 + $0x40] sm:$0xff] %v4807_v4  ;;  %4177 = vmatpush3.bf16.msra.mxu0 %v4657_v24  ;;  %v516_v28 = vmax.f32 %v5111_v21, 0.0  ;;  %v4715_v21 = vld [vmem:[%s6031_s3 + $0x208] sm:$0xff]  }
  0x26   : > { %1944 = vst [vmem:[#allocation3 + $0x48] sm:$0x3] %v4807_v4  ;;  %1945 = vst [vmem:[#allocation3 + $0x50] sm:$0xff] %v4807_v4  ;;  %4201 = vmatpush3.bf16.msra.mxu1 %v4658_v32  ;;  %4178 = vmatprep.subr.bf16.mxu0 %v4659_v43  ;;  %v5127_v29 = vmax.f32 %v491_v22, 0.0  ;;  %v5129_v32 = vmax.f32 %v492_v25, 0.0  ;;  %v5214_v25 = vadd.f32 %v5000_v16, %v436_v12 }
  0x27   : > { %1946 = vst [vmem:[#allocation3 + $0x58] sm:$0x3] %v4807_v4  ;;  %1947 = vst [vmem:[#allocation3 + $0x60] sm:$0xff] %v4807_v4  ;;  %4202 = vmatprep.subr.bf16.mxu1 %v4660_v44 }
  0x28   : > { %1948 = vst [vmem:[#allocation3 + $0x68] sm:$0x3] %v4807_v4  ;;  %1949 = vst [vmem:[#allocation3 + $0x70] sm:$0xff] %v4807_v4 }
  0x29   : > { %1950 = vst [vmem:[#allocation3 + $0x78] sm:$0x3] %v4807_v4  ;;  %1951 = vst [vmem:[#allocation3 + $0x80] sm:$0xff] %v4807_v4  ;;  %4179 = vmatpush3.bf16.msra.mxu0 %v4659_v43 }
  0x2a   : > { %1952 = vst [vmem:[#allocation3 + $0x88] sm:$0x3] %v4807_v4  ;;  %1953 = vst [vmem:[#allocation3 + $0x90] sm:$0xff] %v4807_v4  ;;  %4203 = vmatpush3.bf16.msra.mxu1 %v4660_v44  ;;  %4212 = vmatprep.subr.bf16.mxu0 %v4661_v45  ;;  %v392_v44 = vld [vmem:[%s4982_s13 + $0x40] sm:$0xff] }
  0x2b   : > { %1954 = vst [vmem:[#allocation3 + $0x98] sm:$0x3] %v4807_v4  ;;  %543 = vst [vmem:[#allocation2 + $0x131] sm:$0xff] %v510_v33  ;;  %4236 = vmatprep.subr.bf16.mxu1 %v4662_v46  ;;  %v844_v33 = vld [vmem:[#allocation2 + $0x1b1] sm:$0xff]  ;;  %v431_v47 = vmul.f32 %v4994_v14, %v392_v44  ;;  %v507_v44 = vmax.f32 %v5214_v25, 0.0 }
  0x2c   : > { %551 = vst [vmem:[#allocation2 + $0x1c1] sm:$0xff] %v518_v37  ;;  %552 = vst [vmem:[#allocation2 + $0x1d1] sm:$0xff] %v519_v41  ;;  %4181 = vmatmul.mubr.bf16.vlgmr.msra.gmra.mxu0 %v598_v52  ;;  %v852_v43 = vpack.c.bf16 %v518_v37, %v844_v33  ;;  %v4673_v33 = vld [vmem:[%s6031_s3 + $0x88] sm:$0xff]   ;;  %v4680_v41 = vld [vmem:[%s6031_s3 + $0x170] sm:$0xff]  }
  0x2d   : > { %553 = vst [vmem:[#allocation2 + $0x1e1] sm:$0xff] %v520_v42  ;;  %4213 = vmatpush3.bf16.msra.mxu0 %v4661_v45  ;;  %554 = vst [vmem:[#allocation2 + $0x1f1] sm:$0xff] %v521_v10  ;;  %4184 = vmatprep.mubr.bf16.mxu0 %v599_v20  ;;  %v1757_v45 = vpack.c.bf16 %v5127_v29, %v5102_v15  ;;  %v5155_v52 = vadd.f32 %v5000_v16, %v431_v47  ;;  %v4672_v20 = vld [vmem:[%s6031_s3 + $0xd0] sm:$0xff]  }
  0x2e   : > { %4214 = vmatprep.subr.bf16.mxu0 %v4663_v53  ;;  %555 = vst [vmem:[#allocation2 + $0x201] sm:$0xff] %v5102_v15  ;;  %556 = vst [vmem:[#allocation2 + $0x211] sm:$0xff] %v5127_v29  ;;  %v854_v42 = vpack.c.bf16 %v5102_v15, %v521_v10  ;;  %v4682_v10 = vld [vmem:[%s6031_s3 + $0x168] sm:$0xff]   ;;  %v4720_v15 = vld [vmem:[%s6034_s6 + $0x30] sm:$0xff]  }
  0x2f   : > { %557 = vst [vmem:[#allocation2 + $0x221] sm:$0xff] %v5129_v32  ;;  %v502_v61 = vmax.f32 %v5155_v52, 0.0  ;;  %540 = vst [vmem:[#allocation2 + $0xf1] sm:$0xff] %v507_v44  ;;  %v4686_v52 = vld [vmem:[%s6031_s3 + $0x158] sm:$0xff]  }
  0x31   : > { %4215 = vmatpush3.bf16.msra.mxu0 %v4663_v53  ;;  %v4669_v53 = vld [vmem:[%s6031_s3 + $0x98] sm:$0xff]   ;;  %535 = vst [vmem:[#allocation2 + $0xa1] sm:$0xff] %v502_v61 }
  0x32   : > { %4216 = vmatprep.subr.bf16.mxu0 %v4665_v13 }
  0x33   : > { %v5072_v57 = vld [vmem:[#allocation2 + $0x1c0] sm:$0xff]  ;;  %v5082_v63 = vld [vmem:[#allocation2 + $0x1d0] sm:$0xff] }
  0x34   : > { %v568_v62 = vpack.c.bf16 %v5072_v57, %v4807_v4  ;;  %v5084_v0 = vld [vmem:[#allocation2 + $0x1e0] sm:$0xff]  ;;  %v444_v4 = vmul.f32 %v4994_v14, %v405_v60  ;;  %v1454_v19 = vpack.c.bf16 %v5082_v63, %v5072_v57  ;;  %v5152_v37 = vld [vmem:[#allocation2 + $0x1f0] sm:$0xff]  ;;  %v4670_v60 = vld [vmem:[%s6031_s3 + $0xd8] sm:$0xff]  }
  0x35   : > { %v569_v5 = vpack.c.bf16 %v5084_v0, %v5082_v63  ;;  %4217 = vmatpush3.bf16.msra.mxu0 %v4665_v13  ;;  %v5160_v54 = vld [vmem:[#allocation2 + $0x200] sm:$0xff]  ;;  %v5185_v7 = vld [vmem:[#allocation2 + $0x210] sm:$0xff]  ;;  %v4706_v57 = vld [vmem:[%s6031_s3 + $0x1c8] sm:$0xff]  }
  0x36   : > { %4204 = vmatprep.mubr.bf16.mxu1 %v568_v62  ;;  %v483_v17 = vadd.f32 %v5000_v16, %v444_v4  ;;  %4218 = vmatprep.subr.bf16.mxu0 %v4667_v27  ;;  %v570_v59 = vpack.c.bf16 %v5160_v54, %v5152_v37  ;;  %v1455_v62 = vpack.c.bf16 %v5152_v37, %v5084_v0  ;;  %v396_v4 = vld [vmem:[%s4982_s13 + $0x60] sm:$0xff]  ;;  %v398_v13 = vld [vmem:[%s4982_s13 + $0x70] sm:$0xff] }
  0x37   : > { %4205 = vmatmul.mubr.bf16.vlgmr.msra.gmra.mxu1 %v569_v5  ;;  %v504_v5 = vmax.f32 %v5166_v56, 0.0  ;;  %v435_v11 = vmul.f32 %v4994_v14, %v396_v4  ;;  %v437_v22 = vmul.f32 %v4994_v14, %v398_v13  ;;  %v4678_v4 = vld [vmem:[%s6031_s3 + $0x178] sm:$0xff]   ;;  %v1000_v13 = vld [vmem:[#allocation2 + $0xf0] sm:$0xff]  ;;  %v4707_v63 = vld [vmem:[%s6031_s3 + $0x180] sm:$0xff]  }
  0x38   : > { %4237 = vmatpush3.bf16.msra.mxu1 %v4662_v46  ;;  %v515_v24 = vmax.f32 %v483_v17, 0.0  ;;  %v393_v46 = vld [vmem:[%s4982_s13 + $0x48] sm:$0xff]  ;;  %4208 = vmatprep.mubr.bf16.mxu1 %v570_v59  ;;  %v399_v17 = vld [vmem:[%s4982_s13 + $0x78] sm:$0xff]  ;;  %v995_v49 = vld [vmem:[#allocation2 + $0xa0] sm:$0xff] }
  0x39   : > { %4238 = vmatprep.subr.bf16.mxu1 %v4664_v58  ;;  %v432_v50 = vmul.f32 %v4994_v14, %v393_v46  ;;  %4219 = vmatpush3.bf16.msra.mxu0 %v4667_v27  ;;  %537 = vst [vmem:[#allocation2 + $0xc1] sm:$0xff] %v504_v5  ;;  %v1456_v27 = vpack.c.bf16 %v5185_v7, %v5160_v54  ;;  %v4674_v46 = vld [vmem:[%s6031_s3 + $0xc8] sm:$0xff]   ;;  %v4677_v59 = vld [vmem:[%s6031_s3 + $0x138] sm:$0xff]   ;;  %v4712_v0 = vld [vmem:[%s6031_s3 + $0x220] sm:$0xff]  }
  0x3a   : > { %v5131_v34 = vpack.c.bf16 %v515_v24, %v514_v9  ;;  %v600_v40 = vpack.c.bf16 %v516_v28, %v515_v24  ;;  %4220 = vmatprep.subr.bf16.mxu0 %v4669_v53  ;;  %v5191_v9 = vld [vmem:[#allocation2 + $0x220] sm:$0xff]  ;;  %v5211_v24 = vadd.f32 %v5000_v16, %v435_v11  ;;  %v4679_v11 = vld [vmem:[%s6031_s3 + $0x130] sm:$0xff]   ;;  %v4713_v54 = vld [vmem:[%s6031_s3 + $0x218] sm:$0xff]  }
  0x3b   : > { %v5163_v55 = vadd.f32 %v5000_v16, %v432_v50  ;;  %v571_v18 = vpack.c.bf16 %v5191_v9, %v5185_v7  ;;  %v4797_v7 = vld [vmem:[#allocation2 + $0x1f1] sm:$0xff] }
  0x3c   : > { %4239 = vmatpush3.bf16.msra.mxu1 %v4664_v58  ;;  %4185 = vmatmul.mubr.bf16.gmra.mxu0 %v600_v40  ;;  %v5169_v58 = vadd.f32 %v5000_v16, %v434_v30 }
  0x3d   : > { %4240 = vmatprep.subr.bf16.mxu1 %v4666_v23  ;;  %4228 = vmatprep.mubr.bf16.mxu0 %v852_v43  ;;  %v503_v3 = vmax.f32 %v5163_v55, 0.0  ;;  %v506_v43 = vmax.f32 %v5211_v24, 0.0  ;;  %v4687_v55 = vld [vmem:[%s6031_s3 + $0x110] sm:$0xff]   ;;  %v4699_v24 = vld [vmem:[%s6031_s3 + $0x1a0] sm:$0xff]  }
  0x3e   : > { %v505_v6 = vmax.f32 %v5169_v58, 0.0  ;;  %4221 = vmatpush3.bf16.msra.mxu0 %v4669_v53  ;;  %v4676_v53 = vld [vmem:[%s6031_s3 + $0xc0] sm:$0xff]   ;;  %v4698_v58 = vld [vmem:[%s6031_s3 + $0x1e8] sm:$0xff]  }
  0x3f   : > { %536 = vst [vmem:[#allocation2 + $0xb1] sm:$0xff] %v503_v3  ;;  %4209 = vmatmul.mubr.bf16.gmra.mxu1 %v571_v18  ;;  %4222 = vmatprep.subr.bf16.mxu0 %v4671_v1  ;;  %539 = vst [vmem:[#allocation2 + $0xe1] sm:$0xff] %v506_v43  ;;  %v384_v18 = vld [vmem:[%s4982_s13] sm:$0xff]  ;;  %v1305_v56 = vpack.c.bf16 %v507_v44, %v506_v43  ;;  %v4701_v44 = vld [vmem:[%s6031_s3 + $0x198] sm:$0xff]  }
  0x40   : > { %4241 = vmatpush3.bf16.msra.mxu1 %v4666_v23  ;;  %538 = vst [vmem:[#allocation2 + $0xd1] sm:$0xff] %v505_v6  ;;  %v438_v23 = vmul.f32 %v4994_v14, %v399_v17  ;;  %v4700_v43 = vld [vmem:[%s6031_s3 + $0x1e0] sm:$0xff]  }
  0x41   : > { %4242 = vmatprep.subr.bf16.mxu1 %v4668_v39 }
  0x42   : > { %v5225_v40 = vadd.f32 %v5000_v16, %v438_v23  ;;  %4223 = vmatpush3.bf16.msra.mxu0 %v4671_v1  ;;  %v423_v23 = vmul.f32 %v4994_v14, %v384_v18  ;;  %v388_v18 = vld [vmem:[%s4982_s13 + $0x20] sm:$0xff] }
  0x43   : > { %4224 = vmatprep.subr.bf16.mxu0 %v4673_v33 }
  0x44   : > { %4243 = vmatpush3.bf16.msra.mxu1 %v4668_v39  ;;  %v5222_v39 = vadd.f32 %v5000_v16, %v437_v22  ;;  %v509_v48 = vmax.f32 %v5225_v40, 0.0  ;;  %v386_v22 = vld [vmem:[%s4982_s13 + $0x10] sm:$0xff] }
  0x45   : > { %4244 = vmatprep.subr.bf16.mxu1 %v4670_v60  ;;  %v425_v36 = vmul.f32 %v4994_v14, %v386_v22  ;;  %v4703_v40 = vld [vmem:[%s6031_s3 + $0x190] sm:$0xff]  }
  0x46   : > { %v508_v47 = vmax.f32 %v5222_v39, 0.0  ;;  %v996_v50 = vld [vmem:[#allocation2 + $0xb0] sm:$0xff]  ;;  %542 = vst [vmem:[#allocation2 + $0x111] sm:$0xff] %v509_v48  ;;  %4225 = vmatpush3.bf16.msra.mxu0 %v4673_v33  ;;  %v999_v12 = vld [vmem:[#allocation2 + $0xe0] sm:$0xff]  ;;  %v387_v33 = vld [vmem:[%s4982_s13 + $0x18] sm:$0xff] }
  0x47   : > { %v1003_v30 = vpack.c.bf16 %v996_v50, %v995_v49  ;;  %4226 = vmatprep.subr.bf16.mxu0 %v4675_v51  ;;  %v998_v1 = vld [vmem:[#allocation2 + $0xd0] sm:$0xff]  ;;  %v4681_v49 = vld [vmem:[%s6031_s3 + $0x128] sm:$0xff]   ;;  %v1005_v50 = vpack.c.bf16 %v1000_v13, %v999_v12  ;;  %v4702_v39 = vld [vmem:[%s6031_s3 + $0x1d8] sm:$0xff]  }
  0x48   : > { %4245 = vmatpush3.bf16.msra.mxu1 %v4670_v60  ;;  %541 = vst [vmem:[#allocation2 + $0x101] sm:$0xff] %v508_v47  ;;  %v997_v60 = vld [vmem:[#allocation2 + $0xc0] sm:$0xff]  ;;  %v1306_v25 = vpack.c.bf16 %v509_v48, %v508_v47  ;;  %v4709_v47 = vld [vmem:[%s6031_s3 + $0x238] sm:$0xff]   ;;  %v4710_v48 = vld [vmem:[%s6031_s3 + $0x230] sm:$0xff]  }
  0x49   : > { %4246 = vmatprep.subr.bf16.mxu1 %v4672_v20  ;;  %4252 = vmatprep.mubr.bf16.mxu1 %v1003_v30  ;;  %v1004_v17 = vpack.c.bf16 %v998_v1, %v997_v60 }
  0x4a   : > { %4227 = vmatpush3.bf16.msra.mxu0 %v4675_v51  ;;  %v462_v51 = vadd.f32 %v5000_v16, %v423_v23  ;;  %v390_v23 = vld [vmem:[%s4982_s13 + $0x30] sm:$0xff] }
  0x4b   : > { %4260 = vmatprep.subr.bf16.mxu0 %v4677_v59 }
  0x4c   : > { %4247 = vmatpush3.bf16.msra.mxu1 %v4672_v20  ;;  %v385_v20 = vld [vmem:[%s4982_s13 + $0x8] sm:$0xff] }
  0x4d   : > { %4248 = vmatprep.subr.bf16.mxu1 %v4674_v46  ;;  %v424_v35 = vmul.f32 %v4994_v14, %v385_v20  ;;  %4229 = vmatmul.mubr.bf16.vlgmr.msra.gmra.mxu0 %v853_v8  ;;  %v1002_v1 = vld [vmem:[#allocation2 + $0x110] sm:$0xff]  ;;  %v494_v8 = vmax.f32 %v462_v51, 0.0  ;;  %v427_v20 = vmul.f32 %v4994_v14, %v388_v18 }
  0x4e   : > { %4261 = vmatpush3.bf16.msra.mxu0 %v4677_v59  ;;  %v389_v59 = vld [vmem:[%s4982_s13 + $0x28] sm:$0xff]  ;;  %4232 = vmatprep.mubr.bf16.mxu0 %v854_v42 }
  0x4f   : > { %v463_v30 = vadd.f32 %v5000_v16, %v424_v35  ;;  %v1001_v2 = vld [vmem:[#allocation2 + $0x100] sm:$0xff]  ;;  %4262 = vmatprep.subr.bf16.mxu0 %v4679_v11  ;;  %v428_v22 = vmul.f32 %v4994_v14, %v389_v59  ;;  %v391_v35 = vld [vmem:[%s4982_s13 + $0x38] sm:$0xff]  ;;  %527 = vst [vmem:[#allocation2 + $0x11] sm:$0xff] %v494_v8  ;;  %v1303_v59 = vpack.c.bf16 %v503_v3, %v502_v61  ;;  %v4688_v61 = vld [vmem:[%s6031_s3 + $0x150] sm:$0xff]  }
  0x50   : > { %4249 = vmatpush3.bf16.msra.mxu1 %v4674_v46  ;;  %v426_v46 = vmul.f32 %v4994_v14, %v387_v33  ;;  %v429_v33 = vmul.f32 %v4994_v14, %v390_v23  ;;  %v1006_v42 = vpack.c.bf16 %v1002_v1, %v1001_v2  ;;  %v4684_v2 = vld [vmem:[%s6031_s3 + $0x160] sm:$0xff]   ;;  %v4689_v3 = vld [vmem:[%s6031_s3 + $0x108] sm:$0xff]   ;;  %v407_v23 = vld [vmem:[%s4982_s13 + $0xb8] sm:$0xff] }
  0x51   : > { %4250 = vmatprep.subr.bf16.mxu1 %v4676_v53  ;;  %v495_v12 = vmax.f32 %v463_v30, 0.0  ;;  %v5309_v51 = vadd.f32 %v5000_v16, %v428_v22 }
  0x52   : > { %v5287_v60 = vadd.f32 %v5000_v16, %v426_v46  ;;  %4263 = vmatpush3.bf16.msra.mxu0 %v4679_v11  ;;  %v5306_v46 = vadd.f32 %v5000_v16, %v427_v20  ;;  %v5315_v30 = vadd.f32 %v5000_v16, %v429_v33  ;;  %v4691_v33 = vld [vmem:[%s6031_s3 + $0x100] sm:$0xff]  }
  0x53   : > { %528 = vst [vmem:[#allocation2 + $0x21] sm:$0xff] %v495_v12  ;;  %4264 = vmatprep.subr.bf16.mxu0 %v4681_v49  ;;  %v1153_v1 = vpack.c.bf16 %v495_v12, %v494_v8  ;;  %v4685_v8 = vld [vmem:[%s6031_s3 + $0x118] sm:$0xff]  }
  0x54   : > { %4251 = vmatpush3.bf16.msra.mxu1 %v4676_v53  ;;  %v5281_v53 = vadd.f32 %v5000_v16, %v425_v36  ;;  %v430_v36 = vmul.f32 %v4994_v14, %v391_v35  ;;  %v498_v18 = vmax.f32 %v5306_v46, 0.0  ;;  %v500_v20 = vmax.f32 %v5315_v30, 0.0  ;;  %v4711_v30 = vld [vmem:[%s6031_s3 + $0x228] sm:$0xff]  }
  0x55   : > { %4284 = vmatprep.subr.bf16.mxu1 %v4678_v4  ;;  %v446_v35 = vmul.f32 %v4994_v14, %v407_v23  ;;  %v4731_v23 = vld [vmem:[%s6034_s6 + $0x40] sm:$0xff]  }
  0x56   : > { %v496_v13 = vmax.f32 %v5281_v53, 0.0  ;;  %v5318_v11 = vadd.f32 %v5000_v16, %v430_v36  ;;  %4265 = vmatpush3.bf16.msra.mxu0 %v4681_v49  ;;  %531 = vst [vmem:[#allocation2 + $0x51] sm:$0xff] %v498_v18  ;;  %533 = vst [vmem:[#allocation2 + $0x71] sm:$0xff] %v500_v20  ;;  %v415_v49 = vld [vmem:[%s4982_s13 + $0xf8] sm:$0xff] }
  0x57   : > { %4253 = vmatmul.mubr.bf16.vlgmr.msra.gmra.mxu1 %v1004_v17  ;;  %v497_v17 = vmax.f32 %v5287_v60, 0.0  ;;  %v454_v12 = vmul.f32 %v4994_v14, %v415_v49  ;;  %v5362_v36 = vadd.f32 %v5000_v16, %v446_v35  ;;  %v4697_v60 = vld [vmem:[%s6031_s3 + $0x1a8] sm:$0xff]  }
  0x58   : > { %4285 = vmatpush3.bf16.msra.mxu1 %v4678_v4  ;;  %v855_v4 = vpack.c.bf16 %v5129_v32, %v5127_v29  ;;  %4256 = vmatprep.mubr.bf16.mxu1 %v1005_v50  ;;  %529 = vst [vmem:[#allocation2 + $0x31] sm:$0xff] %v496_v13  ;;  %v4683_v50 = vld [vmem:[%s6031_s3 + $0x120] sm:$0xff]   ;;  %v501_v22 = vmax.f32 %v5318_v11, 0.0  ;;  %v4721_v29 = vld [vmem:[%s6034_s6 + $0x68] sm:$0xff]  }
  0x59   : > { %4286 = vmatprep.subr.bf16.mxu1 %v4680_v41  ;;  %530 = vst [vmem:[#allocation2 + $0x41] sm:$0xff] %v497_v17  ;;  %4266 = vmatprep.subr.bf16.mxu0 %v4683_v50  ;;  %v517_v14 = vmax.f32 %v5362_v36, 0.0  ;;  %v1747_v11 = vld [vmem:[#allocation2 + $0x1c1] sm:$0xff] }
  0x5a   : > { %4233 = vmatmul.mubr.bf16.gmra.mxu0 %v855_v4  ;;  %534 = vst [vmem:[#allocation2 + $0x81] sm:$0xff] %v501_v22  ;;  %v493_v4 = vadd.f32 %v5000_v16, %v454_v12  ;;  %v4729_v49 = vld [vmem:[%s6034_s6 + $0x48] sm:$0xff]   ;;  %v4728_v12 = vld [vmem:[%s6034_s6 + $0x10] sm:$0xff]  }
  0x5b   : > { %4276 = vmatprep.mubr.bf16.mxu0 %v1153_v1  ;;  %4267 = vmatpush3.bf16.msra.mxu0 %v4683_v50  ;;  %v4694_v50 = vld [vmem:[%s6031_s3 + $0x1f8] sm:$0xff]   ;;  %v4695_v1 = vld [vmem:[%s6031_s3 + $0x1b0] sm:$0xff]  }
  0x5c   : > { %4287 = vmatpush3.bf16.msra.mxu1 %v4680_v41  ;;  %v499_v41 = vmax.f32 %v5309_v51, 0.0  ;;  %4268 = vmatprep.subr.bf16.mxu0 %v4685_v8  ;;  %v525_v46 = vmax.f32 %v493_v4, 0.0  ;;  %v4693_v51 = vld [vmem:[%s6031_s3 + $0x1b8] sm:$0xff]   ;;  %v4730_v4 = vld [vmem:[%s6034_s6 + $0x8] sm:$0xff]  }
  0x5d   : > { %4288 = vmatprep.subr.bf16.mxu1 %v4682_v10 }
  0x5e   : > { %532 = vst [vmem:[#allocation2 + $0x61] sm:$0xff] %v499_v41  ;;  %558 = vst [vmem:[#allocation2 + $0x231] sm:$0xff] %v525_v46  ;;  %v5375_v16 = vpack.c.bf16 %v525_v46, %v5129_v32  ;;  %v4696_v32 = vld [vmem:[%s6031_s3 + $0x1f0] sm:$0xff]   ;;  %v1155_v53 = vpack.c.bf16 %v499_v41, %v498_v18 }
  0x5f   : > { %4257 = vmatmul.mubr.bf16.gmra.mxu1 %v1006_v42  ;;  %4269 = vmatpush3.bf16.msra.mxu0 %v4685_v8  ;;  %v4692_v42 = vld [vmem:[%s6031_s3 + $0x140] sm:$0xff]   ;;  %v1748_v18 = vld [vmem:[#allocation2 + $0x1d1] sm:$0xff]  ;;  %v4722_v8 = vld [vmem:[%s6034_s6 + $0x28] sm:$0xff]  }
  0x60   : > { %4289 = vmatpush3.bf16.msra.mxu1 %v4682_v10  ;;  %4300 = vmatprep.mubr.bf16.mxu1 %v1303_v59  ;;  %v4690_v10 = vld [vmem:[%s6031_s3 + $0x148] sm:$0xff]   ;;  %v1304_v59 = vpack.c.bf16 %v505_v6, %v504_v5  ;;  %v1597_v5 = vld [vmem:[#allocation2 + $0x131] sm:$0xff]  ;;  %v1156_v6 = vpack.c.bf16 %v501_v22, %v500_v20  ;;  %v1755_v37 = vpack.c.bf16 %v1748_v18, %v1747_v11 }
  0x61   : > { %4290 = vmatprep.subr.bf16.mxu1 %v4684_v2  ;;  %4270 = vmatprep.subr.bf16.mxu0 %v4687_v55  ;;  %v4718_v20 = vld [vmem:[%s6034_s6 + $0x38] sm:$0xff]   ;;  %v4719_v22 = vld [vmem:[%s6034_s6 + $0x70] sm:$0xff]  }
  0x63   : > { %4271 = vmatpush3.bf16.msra.mxu0 %v4687_v55  ;;  %v4724_v55 = vld [vmem:[%s6034_s6 + $0x20] sm:$0xff]  }
  0x64   : > { %4291 = vmatpush3.bf16.msra.mxu1 %v4684_v2  ;;  %4272 = vmatprep.subr.bf16.mxu0 %v4689_v3  ;;  %v1154_v2 = vpack.c.bf16 %v497_v17, %v496_v13  ;;  %v1605_v13 = vpack.c.bf16 %v511_v38, %v1597_v5  ;;  %v4705_v38 = vld [vmem:[%s6031_s3 + $0x188] sm:$0xff]  }
  0x65   : > { %4292 = vmatprep.subr.bf16.mxu1 %v4686_v52  ;;  %v1453_v17 = vld [vmem:[#allocation2 + $0x230] sm:$0xff] }
  0x66   : > { %v1457_v41 = vpack.c.bf16 %v1453_v17, %v5191_v9 }
  0x67   : > { %4273 = vmatpush3.bf16.msra.mxu0 %v4689_v3  ;;  %v4726_v3 = vld [vmem:[%s6034_s6 + $0x18] sm:$0xff]  }
  0x68   : > { %4293 = vmatpush3.bf16.msra.mxu1 %v4686_v52  ;;  %4274 = vmatprep.subr.bf16.mxu0 %v4691_v33  ;;  %v4725_v52 = vld [vmem:[%s6034_s6 + $0x58] sm:$0xff]  }
  0x69   : > { %4294 = vmatprep.subr.bf16.mxu1 %v4688_v61 }
  0x6b   : > { %4275 = vmatpush3.bf16.msra.mxu0 %v4691_v33  ;;  %v5537_v33 = vld [vmem:[%s6034_s6 + $0xb8] sm:$0xff]  }
  0x6c   : > { %4295 = vmatpush3.bf16.msra.mxu1 %v4688_v61  ;;  %4308 = vmatprep.subr.bf16.mxu0 %v4693_v51  ;;  %v4727_v61 = vld [vmem:[%s6034_s6 + $0x50] sm:$0xff]   ;;  %6040 = vst [vmem:[#allocation4_spill] sm:$0xff] %v5537_v33 }
  0x6d   : > { %4296 = vmatprep.subr.bf16.mxu1 %v4690_v10 }
  0x6e   : > { %4277 = vmatmul.mubr.bf16.vlgmr.msra.gmra.mxu0 %v1154_v2 }
  0x6f   : > { %4309 = vmatpush3.bf16.msra.mxu0 %v4693_v51  ;;  %4280 = vmatprep.mubr.bf16.mxu0 %v1155_v53  ;;  %v5546_v51 = vld [vmem:[%s6034_s6 + $0xf8] sm:$0xff]  }
  0x70   : > { %4297 = vmatpush3.bf16.msra.mxu1 %v4690_v10  ;;  %4310 = vmatprep.subr.bf16.mxu0 %v4695_v1  ;;  %6041 = vst [vmem:[#allocation5_spill] sm:$0xff] %v5546_v51 }
  0x71   : > { %4298 = vmatprep.subr.bf16.mxu1 %v4692_v42 }
  0x73   : > { %4311 = vmatpush3.bf16.msra.mxu0 %v4695_v1 }
  0x74   : > { %4299 = vmatpush3.bf16.msra.mxu1 %v4692_v42  ;;  %4312 = vmatprep.subr.bf16.mxu0 %v4697_v60  ;;  %v4732_v42 = vld [vmem:[%s6034_s6] sm:$0xff]  }
  0x75   : > { %4332 = vmatprep.subr.bf16.mxu1 %v4694_v50 }
  0x76   : > { %4281 = vmatmul.mubr.bf16.gmra.mxu0 %v1156_v6 }
  0x77   : > { %4301 = vmatmul.mubr.bf16.vlgmr.msra.gmra.mxu1 %v1304_v59  ;;  %4313 = vmatpush3.bf16.msra.mxu0 %v4697_v60 }
  0x78   : > { %4333 = vmatpush3.bf16.msra.mxu1 %v4694_v50  ;;  %4304 = vmatprep.mubr.bf16.mxu1 %v1305_v56 }
  0x79   : > { %4334 = vmatprep.subr.bf16.mxu1 %v4696_v32  ;;  %4314 = vmatprep.subr.bf16.mxu0 %v4699_v24 }
  0x7a   : > { %4324 = vmatprep.mubr.bf16.mxu0 %v1454_v19  ;;  %v4708_v19 = vld [vmem:[%s6031_s3 + $0x1c0] sm:$0xff]  }
  0x7b   : > { %4315 = vmatpush3.bf16.msra.mxu0 %v4699_v24 }
  0x7c   : > { %4335 = vmatpush3.bf16.msra.mxu1 %v4696_v32  ;;  %4316 = vmatprep.subr.bf16.mxu0 %v4701_v44 }
  0x7d   : > { %4336 = vmatprep.subr.bf16.mxu1 %v4698_v58 }
  0x7f   : > { %4305 = vmatmul.mubr.bf16.gmra.mxu1 %v1306_v25  ;;  %4317 = vmatpush3.bf16.msra.mxu0 %v4701_v44 }
  0x80   : > { %4337 = vmatpush3.bf16.msra.mxu1 %v4698_v58  ;;  %4348 = vmatprep.mubr.bf16.mxu1 %v1605_v13 }
  0x81   : > { %4338 = vmatprep.subr.bf16.mxu1 %v4700_v43  ;;  %4318 = vmatprep.subr.bf16.mxu0 %v4703_v40 }
  0x83   : > { %4319 = vmatpush3.bf16.msra.mxu0 %v4703_v40 }
  0x84   : > { %4339 = vmatpush3.bf16.msra.mxu1 %v4700_v43  ;;  %4320 = vmatprep.subr.bf16.mxu0 %v4705_v38 }
  0x85   : > { %4340 = vmatprep.subr.bf16.mxu1 %v4702_v39 }
  0x87   : > { %4321 = vmatpush3.bf16.msra.mxu0 %v4705_v38 }
  0x88   : > { %4341 = vmatpush3.bf16.msra.mxu1 %v4702_v39  ;;  %4322 = vmatprep.subr.bf16.mxu0 %v4707_v63 }
  0x89   : > { %4342 = vmatprep.subr.bf16.mxu1 %v4704_v31 }
  0x8b   : > { %4323 = vmatpush3.bf16.msra.mxu0 %v4707_v63 }
  0x8c   : > { %4343 = vmatpush3.bf16.msra.mxu1 %v4704_v31  ;;  %4356 = vmatprep.subr.bf16.mxu0 %v4709_v47 }
  0x8d   : > { %4344 = vmatprep.subr.bf16.mxu1 %v4706_v57 }
  0x8e   : > { %4325 = vmatmul.mubr.bf16.vlgmr.msra.gmra.mxu0 %v1455_v62  ;;  %v1749_v62 = vld [vmem:[#allocation2 + $0x1e1] sm:$0xff] }
  0x8f   : > { %4357 = vmatpush3.bf16.msra.mxu0 %v4709_v47  ;;  %4328 = vmatprep.mubr.bf16.mxu0 %v1456_v27  ;;  %v1756_v9 = vpack.c.bf16 %v4797_v7, %v1749_v62  ;;  %v4717_v27 = vld [vmem:[%s6034_s6 + $0x78] sm:$0xff]  }
  0x90   : > { %4345 = vmatpush3.bf16.msra.mxu1 %v4706_v57  ;;  %4358 = vmatprep.subr.bf16.mxu0 %v4710_v48 }
  0x91   : > { %4346 = vmatprep.subr.bf16.mxu1 %v4708_v19 }
  0x93   : > { %4359 = vmatpush3.bf16.msra.mxu0 %v4710_v48 }
  0x94   : > { %4347 = vmatpush3.bf16.msra.mxu1 %v4708_v19  ;;  %4360 = vmatprep.subr.bf16.mxu0 %v4711_v30 }
  0x95   : > { %4380 = vmatprep.subr.bf16.mxu1 %v4717_v27 }
  0x96   : > { %4329 = vmatmul.mubr.bf16.gmra.mxu0 %v1457_v41 }
  0x97   : > { %4349 = vmatmul.mubr.bf16.vlgmr.msra.gmra.mxu1 %v5121_v26  ;;  %v1608_v26 = vpack.c.bf16 %v517_v14, %v516_v28  ;;  %4361 = vmatpush3.bf16.msra.mxu0 %v4711_v30  ;;  %v4716_v28 = vld [vmem:[%s6031_s3 + $0x200] sm:$0xff]  }
  0x98   : > { %4352 = vmatprep.mubr.bf16.mxu1 %v5131_v34  ;;  %4362 = vmatprep.subr.bf16.mxu0 %v4712_v0  ;;  %v4714_v34 = vld [vmem:[%s6031_s3 + $0x210] sm:$0xff]  }
  0x99   : > { %4372 = vmatprep.mubr.bf16.mxu0 %v1755_v37  ;;  %4381 = vmatpush3.bf16.msra.mxu1 %v4717_v27 }
  0x9a   : > { %4382 = vmatprep.subr.bf16.mxu1 %v4719_v22 }
  0x9b   : > { %4363 = vmatpush3.bf16.msra.mxu0 %v4712_v0 }
  0x9c   : > { %4364 = vmatprep.subr.bf16.mxu0 %v4713_v54 }
  0x9d   : > { %4383 = vmatpush3.bf16.msra.mxu1 %v4719_v22 }
  0x9e   : > { %4384 = vmatprep.subr.bf16.mxu1 %v4721_v29 }
  0x9f   : > { %4353 = vmatmul.mubr.bf16.gmra.mxu1 %v1608_v26  ;;  %4365 = vmatpush3.bf16.msra.mxu0 %v4713_v54 }
  0xa0   : > { %4366 = vmatprep.subr.bf16.mxu0 %v4714_v34 }
  0xa1   : > { %4385 = vmatpush3.bf16.msra.mxu1 %v4721_v29 }
  0xa3   : > { %4367 = vmatpush3.bf16.msra.mxu0 %v4714_v34 }
  0xa4   : > { %4368 = vmatprep.subr.bf16.mxu0 %v4715_v21 }
  0xa7   : > { %4369 = vmatpush3.bf16.msra.mxu0 %v4715_v21 }
  0xa8   : > { %4370 = vmatprep.subr.bf16.mxu0 %v4716_v28 }
  0xab   : > { %4371 = vmatpush3.bf16.msra.mxu0 %v4716_v28 }
  0xac   : > { %4404 = vmatprep.subr.bf16.mxu0 %v4718_v20 }
  0xae   : > { %4373 = vmatmul.mubr.bf16.vlgmr.msra.gmra.mxu0 %v1756_v9 }
  0xaf   : > { %4376 = vmatprep.mubr.bf16.mxu0 %v1757_v45  ;;  %4405 = vmatpush3.bf16.msra.mxu0 %v4718_v20  ;;  %v4723_v45 = vld [vmem:[%s6034_s6 + $0x60] sm:$0xff]  }
  0xb0   : > { %4406 = vmatprep.subr.bf16.mxu0 %v4720_v15  ;;  %4386 = vmatprep.subr.bf16.mxu1 %v4723_v45 }
  0xb1   : > { %4387 = vmatpush3.bf16.msra.mxu1 %v4723_v45 }
  0xb2   : > { %4388 = vmatprep.subr.bf16.mxu1 %v4725_v52 }
  0xb3   : > { %4407 = vmatpush3.bf16.msra.mxu0 %v4720_v15 }
  0xb4   : > { %4408 = vmatprep.subr.bf16.mxu0 %v4722_v8 }
  0xb5   : > { %4389 = vmatpush3.bf16.msra.mxu1 %v4725_v52 }
  0xb6   : > { %4377 = vmatmul.mubr.bf16.gmra.mxu0 %v5375_v16  ;;  %4390 = vmatprep.subr.bf16.mxu1 %v4727_v61 }
  0xb7   : > { %4409 = vmatpush3.bf16.msra.mxu0 %v4722_v8 }
  0xb8   : > { %4410 = vmatprep.subr.bf16.mxu0 %v4724_v55 }
  0xb9   : > { %4391 = vmatpush3.bf16.msra.mxu1 %v4727_v61 }
  0xba   : > { %4392 = vmatprep.subr.bf16.mxu1 %v4729_v49 }
  0xbb   : > { %4411 = vmatpush3.bf16.msra.mxu0 %v4724_v55 }
  0xbc   : > { %4412 = vmatprep.subr.bf16.mxu0 %v4726_v3 }
  0xbd   : > { %4393 = vmatpush3.bf16.msra.mxu1 %v4729_v49 }
  0xbe   : > { %4394 = vmatprep.subr.bf16.mxu1 %v4731_v23 }
  0xbf   : > { %4413 = vmatpush3.bf16.msra.mxu0 %v4726_v3 }
  0xc0   : > { %4414 = vmatprep.subr.bf16.mxu0 %v4728_v12 }
  0xc1   : > { %4395 = vmatpush3.bf16.msra.mxu1 %v4731_v23 }
  0xc2   : > { %4428 = vmatprep.subr.bf16.mxu1 %v5537_v33 }
  0xc3   : > { %4415 = vmatpush3.bf16.msra.mxu0 %v4728_v12 }
  0xc4   : > { %4416 = vmatprep.subr.bf16.mxu0 %v4730_v4 }
  0xc7   : > { %4417 = vmatpush3.bf16.msra.mxu0 %v4730_v4 }
  0xc8   : > { %4418 = vmatprep.subr.bf16.mxu0 %v4732_v42 }
  0xcb   : > { %4419 = vmatpush3.bf16.msra.mxu0 %v4732_v42 }
  0xcc   : > { %4452 = vmatprep.subr.bf16.mxu0 %v5546_v51 }
  0xec   : > { %v5521_v10 = vpop.f32.mrf.mxu0 }
  0xee   : > { %v5529_v35 = vpop.f32.mrf.mxu0 }
  0xf0   : > { %v4183_v36 = vpop.f32.mrf.mxu0 }
  0xf2   : > { %v703_v14 = vpop.f32.mrf.mxu0 }
  0xf7   : > { %v4206_v46 = vpop.f32.mrf.mxu1 }
  0xf8   : > { %v822_v45 = vadd.f32 %v4206_v46, %v5521_v10 }
  0xf9   : > { %v813_v16 = vpop.f32.mrf.mxu1 }
  0xfa   : > { %v814_v55 = vadd.f32 %v813_v16, %v5529_v35 }
  0xfb   : > { %v4207_v1 = vpop.f32.mrf.mxu1 }
  0xfc   : > { %v4186_v50 = vpop.f32.mrf.mxu0  ;;  %v825_v3 = vadd.f32 %v4207_v1, %v4183_v36 }
  0xfd   : > { %v816_v32 = vpop.f32.mrf.mxu1 }
  0xfe   : > { %v716_v2 = vpop.f32.mrf.mxu0  ;;  %v817_v4 = vadd.f32 %v816_v32, %v703_v14 }
  0xff   : > { %v4210_v53 = vpop.f32.mrf.mxu1 }
 0x100   : > { %v5549_v59 = vpop.f32.mrf.mxu0  ;;  %v838_v33 = vadd.f32 %v4210_v53, %v4186_v50 }
 0x101   : > { %6042 = vst [vmem:[#allocation6_spill] sm:$0xff] %v5549_v59  ;;  %v829_v58 = vpop.f32.mrf.mxu1 }
 0x102   : > { %v5551_v60 = vpop.f32.mrf.mxu0 }
 0x103   : > { %6043 = vst [vmem:[#allocation7_spill] sm:$0xff] %v5551_v60  ;;  %v4211_v6 = vpop.f32.mrf.mxu1 }
 0x105   : > { %v832_v25 = vpop.f32.mrf.mxu1 }
 0x108   : > { %v6048_v35 = vld [vmem:[#allocation6_spill] sm:$0xff] }
 0x10a   : > { %v6049_v14 = vld [vmem:[#allocation7_spill] sm:$0xff] }
 0x10b   : > { %v833_v32 = vadd.f32 %v832_v25, %v6049_v14 }
 0x10d   : > { %v4230_v56 = vpop.f32.mrf.mxu0 }
 0x10e   : > { %v988_v61 = vadd.f32 %v4230_v56, %v822_v45  ;;  %v841_v45 = vadd.f32 %v4211_v6, %v6048_v35 }
 0x10f   : > { %v955_v5 = vpop.f32.mrf.mxu0 }
 0x110   : > { %v986_v49 = vadd.f32 %v955_v5, %v814_v55 }
 0x111   : > { %v4231_v24 = vpop.f32.mrf.mxu0 }
 0x112   : > { %v989_v51 = vadd.f32 %v4231_v24, %v825_v3 }
 0x113   : > { %v958_v44 = vpop.f32.mrf.mxu0 }
 0x117   : > { %v4254_v43 = vpop.f32.mrf.mxu1 }
 0x118   : > { %v1139_v42 = vadd.f32 %v4254_v43, %v988_v61 }
 0x119   : > { %v1106_v13 = vpop.f32.mrf.mxu1 }
 0x11a   : > { %v4234_v39 = vpop.f32.mrf.mxu0 }
 0x11b   : > { %v4255_v40 = vpop.f32.mrf.mxu1  ;;  %v992_v59 = vadd.f32 %v4234_v39, %v838_v33 }
 0x11c   : > { %v971_v31 = vpop.f32.mrf.mxu0  ;;  %v1140_v46 = vadd.f32 %v4255_v40, %v989_v51 }
 0x11d   : > { %v1109_v38 = vpop.f32.mrf.mxu1 }
 0x11e   : > { %v4235_v57 = vpop.f32.mrf.mxu0 }
 0x11f   : > { %v4258_v63 = vpop.f32.mrf.mxu1  ;;  %v993_v50 = vadd.f32 %v4235_v57, %v841_v45 }
 0x120   : > { %v974_v19 = vpop.f32.mrf.mxu0  ;;  %v1143_v24 = vadd.f32 %v4258_v63, %v992_v59 }
 0x121   : > { %v1122_v48 = vpop.f32.mrf.mxu1  ;;  %v991_v33 = vadd.f32 %v974_v19, %v833_v32  ;;  %v1992_v32 = vld [vmem:[#allocation3 + $0x1] sm:$0xff] }
 0x123   : > { %v4259_v30 = vpop.f32.mrf.mxu1 }
 0x124   : > { %v1144_v6 = vadd.f32 %v4259_v30, %v993_v50 }
 0x125   : > { %v5553_v18 = vpop.f32.mrf.mxu1 }
 0x126   : > { %6044 = vst [vmem:[#allocation8_spill] sm:$0xff] %v5553_v18 }
 0x12e   : > { %v4278_v47 = vpop.f32.mrf.mxu0 }
 0x12f   : > { %v1289_v18 = vadd.f32 %v4278_v47, %v1139_v42 }
 0x130   : > { %v1256_v17 = vpop.f32.mrf.mxu0 }
 0x132   : > { %v4279_v11 = vpop.f32.mrf.mxu0 }
 0x133   : > { %v1290_v5 = vadd.f32 %v4279_v11, %v1140_v46 }
 0x134   : > { %v1259_v0 = vpop.f32.mrf.mxu0 }
 0x136   : > { %v4282_v37 = vpop.f32.mrf.mxu0 }
 0x137   : > { %v4302_v41 = vpop.f32.mrf.mxu1 }
 0x138   : > { %v1272_v34 = vpop.f32.mrf.mxu0  ;;  %v1439_v1 = vadd.f32 %v4302_v41, %v1289_v18  ;;  %v6050_v18 = vld [vmem:[#allocation8_spill] sm:$0xff] }
 0x139   : > { %v1406_v26 = vpop.f32.mrf.mxu1  ;;  %v1142_v25 = vadd.f32 %v6050_v18, %v991_v33 }
 0x13a   : > { %v4283_v28 = vpop.f32.mrf.mxu0 }
 0x13b   : > { %v4303_v54 = vpop.f32.mrf.mxu1  ;;  %v1294_v57 = vadd.f32 %v4283_v28, %v1144_v6 }
 0x13c   : > { %v5555_v7 = vpop.f32.mrf.mxu0  ;;  %v1440_v51 = vadd.f32 %v4303_v54, %v1290_v5 }
 0x13d   : > { %v1409_v21 = vpop.f32.mrf.mxu1  ;;  %6045 = vst [vmem:[#allocation9_spill] sm:$0xff] %v5555_v7  ;;  %v1137_v7 = vadd.f32 %v1106_v13, %v986_v49 }
 0x13f   : > { %v4306_v62 = vpop.f32.mrf.mxu1  ;;  %v1287_v16 = vadd.f32 %v1256_v17, %v1137_v7 }
 0x141   : > { %v1422_v27 = vpop.f32.mrf.mxu1  ;;  %v1437_v43 = vadd.f32 %v1406_v26, %v1287_v16 }
 0x143   : > { %v5557_v22 = vpop.f32.mrf.mxu1 }
 0x144   : > { %6046 = vst [vmem:[#allocation10_spill] sm:$0xff] %v5557_v22  ;;  %v987_v22 = vadd.f32 %v958_v44, %v817_v4 }
 0x145   : > { %v5559_v29 = vpop.f32.mrf.mxu1 }
 0x146   : > { %6047 = vst [vmem:[#allocation11_spill] sm:$0xff] %v5559_v29  ;;  %v830_v29 = vadd.f32 %v829_v58, %v716_v2  ;;  %v1138_v36 = vadd.f32 %v1109_v38, %v987_v22  ;;  %v1293_v58 = vadd.f32 %v4282_v37, %v1143_v24  ;;  %v6051_v37 = vld [vmem:[#allocation9_spill] sm:$0xff] }
 0x147   : > { %v1292_v54 = vadd.f32 %v6051_v37, %v1142_v25 }
 0x148   : > { %v990_v56 = vadd.f32 %v971_v31, %v830_v29  ;;  %v1288_v44 = vadd.f32 %v1259_v0, %v1138_v36  ;;  %v1443_v59 = vadd.f32 %v4306_v62, %v1293_v58 }
 0x14a   : > { %v1141_v2 = vadd.f32 %v1122_v48, %v990_v56  ;;  %v1438_v47 = vadd.f32 %v1409_v21, %v1288_v44  ;;  %v5569_v48 = vld [vmem:[%s6032_s4] ss:$0 sm:$0xff] }
 0x14b   : > { %v5575_v21 = vld [vmem:[%s6033_s5] ss:$0 sm:$0xff] }
 0x14c   : > { %v1291_v31 = vadd.f32 %v1272_v34, %v1141_v2 }
 0x14d   : > { %v6053_v49 = vld [vmem:[#allocation11_spill] sm:$0xff] }
 0x14e   : > { %v4326_v9 = vpop.f32.mrf.mxu0  ;;  %v1441_v30 = vadd.f32 %v1422_v27, %v1291_v31 }
 0x14f   : > { %v1590_v13 = vadd.f32 %v4326_v9, %v1439_v1 }
 0x150   : > { %v1557_v20 = vpop.f32.mrf.mxu0 }
 0x151   : > { %v1588_v39 = vadd.f32 %v1557_v20, %v1437_v43  ;;  %v6052_v20 = vld [vmem:[#allocation10_spill] sm:$0xff] }
 0x152   : > { %v4327_v15 = vpop.f32.mrf.mxu0  ;;  %v1444_v22 = vadd.f32 %v6052_v20, %v1294_v57  ;;  %v4736_v20 = vld [vmem:[%s6034_s6 + $0xf0] sm:$0xff]  }
 0x153   : > { %v1591_v11 = vadd.f32 %v4327_v15, %v1440_v51 }
 0x154   : > { %v1560_v52 = vpop.f32.mrf.mxu0 }
 0x155   : > { %v1589_v41 = vadd.f32 %v1560_v52, %v1438_v47 }
 0x156   : > { %v4330_v23 = vpop.f32.mrf.mxu0 }
 0x157   : > { %v4350_v8 = vpop.f32.mrf.mxu1  ;;  %v1594_v34 = vadd.f32 %v4330_v23, %v1443_v59  ;;  %v4735_v59 = vld [vmem:[%s6034_s6 + $0xb0] sm:$0xff]  }
 0x158   : > { %v1573_v10 = vpop.f32.mrf.mxu0  ;;  %v1741_v17 = vadd.f32 %v4350_v8, %v1590_v13 }
 0x159   : > { %v1708_v12 = vpop.f32.mrf.mxu1  ;;  %v1592_v15 = vadd.f32 %v1573_v10, %v1441_v30  ;;  %v5626_v30 = vld [vmem:[#allocation2] sm:$0xff] }
 0x15a   : > { %v4331_v53 = vpop.f32.mrf.mxu0  ;;  %v1739_v19 = vadd.f32 %v1708_v12, %v1588_v39  ;;  %v1442_v12 = vadd.f32 %v6053_v49, %v1292_v54  ;;  %v6054_v54 = vld [vmem:[#allocation4_spill] sm:$0xff] }
 0x15b   : > { %v4351_v60 = vpop.f32.mrf.mxu1  ;;  %v1595_v4 = vadd.f32 %v4331_v53, %v1444_v22 }
 0x15c   : > { %v1576_v38 = vpop.f32.mrf.mxu0  ;;  %v1742_v62 = vadd.f32 %v4351_v60, %v1591_v11 }
 0x15d   : > { %v1711_v55 = vpop.f32.mrf.mxu1  ;;  %v1593_v45 = vadd.f32 %v1576_v38, %v1442_v12  ;;  %v4738_v12 = vld [vmem:[%s6034_s6 + $0xe8] sm:$0xff]  }
 0x15e   : > { %v1740_v8 = vadd.f32 %v1711_v55, %v1589_v41 }
 0x15f   : > { %v4354_v40 = vpop.f32.mrf.mxu1 }
 0x160   : > { %v1745_v23 = vadd.f32 %v4354_v40, %v1594_v34 }
 0x161   : > { %v1724_v0 = vpop.f32.mrf.mxu1 }
 0x162   : > { %v1743_v35 = vadd.f32 %v1724_v0, %v1592_v15  ;;  %v2247_v15 = vld [vmem:[#allocation3 + $0x2] sm:$0xff] }
 0x163   : > { %v4355_v52 = vpop.f32.mrf.mxu1 }
 0x164   : > { %v1746_v24 = vadd.f32 %v4355_v52, %v1595_v4  ;;  %v6055_v52 = vld [vmem:[#allocation5_spill] sm:$0xff] }
 0x165   : > { %v1727_v36 = vpop.f32.mrf.mxu1 }
 0x166   : > { %v1744_v2 = vadd.f32 %v1727_v36, %v1593_v45  ;;  %v4742_v45 = vld [vmem:[%s6034_s6 + $0xd8] sm:$0xff]   ;;  %v4744_v36 = vld [vmem:[%s6034_s6 + $0xd0] sm:$0xff]  }
 0x16e   : > { %v4374_v63 = vpop.f32.mrf.mxu0 }
 0x16f   : > { %v1891_v26 = vadd.f32 %v4374_v63, %v1741_v17 }
 0x170   : > { %v1858_v28 = vpop.f32.mrf.mxu0 }
 0x171   : > { %v1906_v7 = vmul.f32 %v5569_v48, %v1891_v26  ;;  %v1889_v9 = vadd.f32 %v1858_v28, %v1739_v19 }
 0x172   : > { %v4375_v29 = vpop.f32.mrf.mxu0 }
 0x173   : > { %v1921_v27 = vadd.f32 %v5575_v21, %v1906_v7  ;;  %v1904_v61 = vmul.f32 %v5569_v48, %v1889_v9  ;;  %v1892_v3 = vadd.f32 %v4375_v29, %v1742_v62 }
 0x174   : > { %v1861_v42 = vpop.f32.mrf.mxu0 }
 0x175   : > { %v5582_v60 = vmax.f32 %v1921_v27, 0.0  ;;  %v1919_v46 = vadd.f32 %v5575_v21, %v1904_v61  ;;  %v1907_v16 = vmul.f32 %v5569_v48, %v1892_v3  ;;  %v1890_v10 = vadd.f32 %v1861_v42, %v1740_v8  ;;  %v4739_v8 = vld [vmem:[%s6034_s6 + $0xa0] sm:$0xff]  }
 0x176   : > { %v4378_v56 = vpop.f32.mrf.mxu0 }
 0x177   : > { %1958 = vst [vmem:[#allocation3 + $0x31] sm:$0xff] %v5582_v60  ;;  %v5587_v1 = vmax.f32 %v1919_v46, 0.0  ;;  %v1922_v5 = vadd.f32 %v5575_v21, %v1907_v16  ;;  %v1905_v55 = vmul.f32 %v5569_v48, %v1890_v10  ;;  %v1895_v14 = vadd.f32 %v4378_v56, %v1745_v23  ;;  %v4741_v23 = vld [vmem:[%s6034_s6 + $0x98] sm:$0xff]   ;;  %v4740_v16 = vld [vmem:[%s6034_s6 + $0xe0] sm:$0xff]   ;;  %v4745_v56 = vld [vmem:[%s6034_s6 + $0x88] sm:$0xff]  }
 0x178   : > { %v1874_v50 = vpop.f32.mrf.mxu0 }
 0x179   : > { %1956 = vst [vmem:[#allocation3 + $0x11] sm:$0xff] %v5587_v1  ;;  %v5592_v53 = vmax.f32 %v1922_v5, 0.0  ;;  %v1920_v43 = vadd.f32 %v5575_v21, %v1905_v55  ;;  %v1910_v44 = vmul.f32 %v5569_v48, %v1895_v14  ;;  %v1893_v13 = vadd.f32 %v1874_v50, %v1743_v35  ;;  %v4743_v35 = vld [vmem:[%s6034_s6 + $0x90] sm:$0xff]   ;;  %v4747_v5 = vld [vmem:[%s6034_s6 + $0x80] sm:$0xff]   ;;  %v4746_v55 = vld [vmem:[%s6034_s6 + $0xc8] sm:$0xff]  }
 0x17a   : > { %v4379_v33 = vpop.f32.mrf.mxu0  ;;  %v2000_v58 = vpack.c.bf16 %v5587_v1, %v1992_v32  ;;  %v4749_v14 = vld [vmem:[%s6034_s6 + $0x138] sm:$0xff]   ;;  %v4748_v50 = vld [vmem:[%s6034_s6 + $0xc0] sm:$0xff]  }
 0x17b   : > { %1959 = vst [vmem:[#allocation3 + $0x41] sm:$0xff] %v5592_v53  ;;  %v5598_v51 = vmax.f32 %v1920_v43, 0.0  ;;  %v1925_v39 = vadd.f32 %v5575_v21, %v1910_v44  ;;  %v1908_v40 = vmul.f32 %v5569_v48, %v1893_v13  ;;  %v1896_v6 = vadd.f32 %v4379_v33, %v1746_v24  ;;  %v4751_v33 = vld [vmem:[%s6034_s6 + $0x130] sm:$0xff]  }
 0x17c   : > { %v1877_v31 = vpop.f32.mrf.mxu0  ;;  %4396 = vmatprep.mubr.bf16.mxu1 %v2000_v58  ;;  %v2556_v38 = vpack.c.bf16 %v5592_v53, %v5582_v60  ;;  %v4750_v58 = vld [vmem:[%s6034_s6 + $0x178] sm:$0xff]  }
 0x17d   : > { %1957 = vst [vmem:[#allocation3 + $0x21] sm:$0xff] %v5598_v51  ;;  %v5605_v47 = vmax.f32 %v1925_v39, 0.0  ;;  %v1923_v17 = vadd.f32 %v5575_v21, %v1908_v40  ;;  %v1911_v11 = vmul.f32 %v5569_v48, %v1896_v6  ;;  %v1894_v18 = vadd.f32 %v1877_v31, %v1744_v2  ;;  %v4753_v39 = vld [vmem:[%s6034_s6 + $0x128] sm:$0xff]   ;;  %v4752_v31 = vld [vmem:[%s6034_s6 + $0x170] sm:$0xff]  }
 0x17e   : > { %v5611_v25 = vpack.c.bf16 %v5582_v60, %v5598_v51  ;;  %v5643_v7 = vld [vmem:[#allocation3 + $0x30] sm:$0xff] }
 0x17f   : > { %1962 = vst [vmem:[#allocation3 + $0x71] sm:$0xff] %v5605_v47  ;;  %v5617_v57 = vmax.f32 %v1923_v17, 0.0  ;;  %v1926_v63 = vadd.f32 %v5575_v21, %v1911_v11  ;;  %v1909_v19 = vmul.f32 %v5569_v48, %v1894_v18  ;;  %v4737_v48 = vld [vmem:[%s6034_s6 + $0xa8] sm:$0xff]   ;;  %v5715_v43 = vld [vmem:[#allocation3 + $0x32] sm:$0xff] }
 0x180   : > { %v1965_v41 = vld [vmem:[#allocation3 + $0x10] sm:$0xff]  ;;  %4397 = vmatmul.mubr.bf16.vlgmr.msra.gmra.mxu1 %v5611_v25 }
 0x181   : > { %1960 = vst [vmem:[#allocation3 + $0x51] sm:$0xff] %v5617_v57  ;;  %v5623_v0 = vmax.f32 %v1926_v63, 0.0  ;;  %v1924_v26 = vadd.f32 %v5575_v21, %v1909_v19  ;;  %v1972_v37 = vpack.c.bf16 %v1965_v41, %v5626_v30  ;;  %4429 = vmatpush3.bf16.msra.mxu1 %v6054_v54  ;;  %v5632_v34 = vpack.c.bf16 %v5617_v57, %v5592_v53  ;;  %v5656_v29 = vld [vmem:[#allocation3 + $0x12] sm:$0xff]  ;;  %v4754_v19 = vld [vmem:[%s6034_s6 + $0x168] sm:$0xff]  }
 0x182   : > { %4430 = vmatprep.subr.bf16.mxu1 %v4735_v59  ;;  %v5663_v27 = vld [vmem:[#allocation3 + $0x40] sm:$0xff]  ;;  %v2255_v3 = vpack.c.bf16 %v5656_v29, %v2247_v15  ;;  %v2555_v63 = vpack.c.bf16 %v5598_v51, %v5587_v1  ;;  %v4759_v54 = vld [vmem:[%s6034_s6 + $0x110] sm:$0xff]   ;;  %v4762_v15 = vld [vmem:[%s6034_s6 + $0x148] sm:$0xff]  }
 0x183   : > { %1963 = vst [vmem:[#allocation3 + $0x81] sm:$0xff] %v5623_v0  ;;  %v5638_v28 = vmax.f32 %v1924_v26, 0.0  ;;  %4420 = vmatprep.mubr.bf16.mxu0 %v1972_v37  ;;  %4400 = vmatprep.mubr.bf16.mxu1 %v5632_v34  ;;  %v2558_v21 = vpack.c.bf16 %v5623_v0, %v5605_v47  ;;  %v5720_v13 = vld [vmem:[#allocation3 + $0x42] sm:$0xff]  ;;  %v2406_v6 = vpack.c.bf16 %v5663_v27, %v5643_v7  ;;  %v4757_v26 = vld [vmem:[%s6034_s6 + $0x118] sm:$0xff]   ;;  %v4768_v60 = vld [vmem:[%s6034_s6 + $0x1f0] sm:$0xff]  }
 0x184   : > { %v1966_v62 = vld [vmem:[#allocation3 + $0x20] sm:$0xff] }
 0x185   : > { %1961 = vst [vmem:[#allocation3 + $0x61] sm:$0xff] %v5638_v28  ;;  %v5647_v9 = vpack.c.bf16 %v5643_v7, %v1966_v62  ;;  %4431 = vmatpush3.bf16.msra.mxu1 %v4735_v59  ;;  %v5654_v22 = vpack.c.bf16 %v5605_v47, %v5638_v28  ;;  %v2405_v10 = vpack.c.bf16 %v1966_v62, %v1965_v41  ;;  %v2249_v32 = vld [vmem:[#allocation3 + $0x22] sm:$0xff]  ;;  %v4760_v7 = vld [vmem:[%s6034_s6 + $0x150] sm:$0xff]  }
 0x186   : > { %4432 = vmatprep.subr.bf16.mxu1 %v4737_v48  ;;  %v5680_v42 = vld [vmem:[#allocation3 + $0x70] sm:$0xff]  ;;  %v5718_v44 = vpack.c.bf16 %v5715_v43, %v2249_v32  ;;  %v4755_v59 = vld [vmem:[%s6034_s6 + $0x120] sm:$0xff]   ;;  %v2705_v37 = vpack.c.bf16 %v2249_v32, %v5656_v29  ;;  %v4761_v62 = vld [vmem:[%s6034_s6 + $0x108] sm:$0xff]  }
 0x187   : > { %4421 = vmatmul.mubr.bf16.vlgmr.msra.gmra.mxu0 %v5647_v9  ;;  %v5745_v11 = vld [vmem:[#allocation3 + $0x72] sm:$0xff]  ;;  %v4756_v51 = vld [vmem:[%s6034_s6 + $0x160] sm:$0xff]  }
 0x188   : > { %4453 = vmatpush3.bf16.msra.mxu0 %v6055_v52  ;;  %v5665_v61 = vld [vmem:[#allocation3 + $0x50] sm:$0xff]  ;;  %4401 = vmatmul.mubr.bf16.gmra.mxu1 %v5654_v22  ;;  %v4765_v29 = vld [vmem:[%s6034_s6 + $0x1b8] sm:$0xff]   ;;  %v4772_v47 = vld [vmem:[%s6034_s6 + $0x1e0] sm:$0xff]  }
 0x189   : > { %4454 = vmatprep.subr.bf16.mxu0 %v4736_v20  ;;  %v5671_v49 = vpack.c.bf16 %v5665_v61, %v5663_v27  ;;  %4433 = vmatpush3.bf16.msra.mxu1 %v4737_v48  ;;  %v5710_v24 = vld [vmem:[#allocation3 + $0x52] sm:$0xff]  ;;  %v2557_v27 = vpack.c.bf16 %v5638_v28, %v5617_v57  ;;  %v2706_v57 = vpack.c.bf16 %v5720_v13, %v5715_v43  ;;  %v4770_v28 = vld [vmem:[%s6034_s6 + $0x1e8] sm:$0xff]   ;;  %v4788_v43 = vld [vmem:[%s6035_s7 + $0x20] sm:$0xff]  }
 0x18a   : > { %4444 = vmatprep.mubr.bf16.mxu1 %v2255_v3  ;;  %4434 = vmatprep.subr.bf16.mxu1 %v4739_v8  ;;  %v5724_v2 = vpack.c.bf16 %v5710_v24, %v5720_v13  ;;  %v5760_v41 = vld [vmem:[#allocation3 + $0x80] sm:$0xff]  ;;  %v4758_v48 = vld [vmem:[%s6034_s6 + $0x158] sm:$0xff]   ;;  %v4767_v52 = vld [vmem:[%s6034_s6 + $0x1b0] sm:$0xff]  }
 0x18b   : > { %4424 = vmatprep.mubr.bf16.mxu0 %v5671_v49  ;;  %v2408_v1 = vpack.c.bf16 %v5760_v41, %v5680_v42  ;;  %v4769_v3 = vld [vmem:[%s6034_s6 + $0x1a8] sm:$0xff]   ;;  %v3298_v32 = vld [vmem:[#allocation2 + $0x11] sm:$0xff] }
 0x18c   : > { %4455 = vmatpush3.bf16.msra.mxu0 %v4736_v20  ;;  %v1970_v4 = vld [vmem:[#allocation3 + $0x60] sm:$0xff]  ;;  %v4790_v13 = vld [vmem:[%s6035_s7 + $0x18] sm:$0xff]  }
 0x18d   : > { %4456 = vmatprep.subr.bf16.mxu0 %v4738_v12  ;;  %v5683_v46 = vpack.c.bf16 %v5680_v42, %v1970_v4  ;;  %4435 = vmatpush3.bf16.msra.mxu1 %v4739_v8  ;;  %v5737_v40 = vld [vmem:[#allocation3 + $0x62] sm:$0xff]  ;;  %v2407_v17 = vpack.c.bf16 %v1970_v4, %v5665_v61  ;;  %v4766_v61 = vld [vmem:[%s6034_s6 + $0x1f8] sm:$0xff]  }
 0x18e   : > { %4436 = vmatprep.subr.bf16.mxu1 %v4741_v23  ;;  %v5749_v18 = vpack.c.bf16 %v5745_v11, %v5737_v40  ;;  %v4763_v20 = vld [vmem:[%s6034_s6 + $0x100] sm:$0xff]   ;;  %v2707_v53 = vpack.c.bf16 %v5737_v40, %v5710_v24  ;;  %v4777_v42 = vld [vmem:[%s6034_s6 + $0x188] sm:$0xff]  }
 0x18f   : > { %4425 = vmatmul.mubr.bf16.gmra.mxu0 %v5683_v46  ;;  %v4764_v8 = vld [vmem:[%s6034_s6 + $0x140] sm:$0xff]  }
 0x190   : > { %4457 = vmatpush3.bf16.msra.mxu0 %v4738_v12  ;;  %4468 = vmatprep.mubr.bf16.mxu0 %v2405_v10  ;;  %v5825_v12 = vld [vmem:[#allocation3 + $0x82] sm:$0xff] }
 0x191   : > { %4458 = vmatprep.subr.bf16.mxu0 %v4740_v16  ;;  %4437 = vmatpush3.bf16.msra.mxu1 %v4741_v23  ;;  %v4773_v23 = vld [vmem:[%s6034_s6 + $0x198] sm:$0xff]   ;;  %v2708_v4 = vpack.c.bf16 %v5825_v12, %v5745_v11  ;;  %v4778_v10 = vld [vmem:[%s6034_s6 + $0x1c8] sm:$0xff]   ;;  %v4796_v40 = vld [vmem:[%s6035_s7] sm:$0xff]  }
 0x192   : > { %4438 = vmatprep.subr.bf16.mxu1 %v4743_v35  ;;  %v3299_v24 = vld [vmem:[#allocation2 + $0x21] sm:$0xff]  ;;  %v3302_v11 = vld [vmem:[#allocation2 + $0x51] sm:$0xff] }
 0x194   : > { %4459 = vmatpush3.bf16.msra.mxu0 %v4740_v16  ;;  %v4776_v16 = vld [vmem:[%s6034_s6 + $0x1d0] sm:$0xff]  }
 0x195   : > { %4460 = vmatprep.subr.bf16.mxu0 %v4742_v45  ;;  %4439 = vmatpush3.bf16.msra.mxu1 %v4743_v35  ;;  %v4781_v35 = vld [vmem:[%s6034_s6 + $0x238] sm:$0xff]  }
 0x196   : > { %4440 = vmatprep.subr.bf16.mxu1 %v4745_v56 }
 0x198   : > { %4461 = vmatpush3.bf16.msra.mxu0 %v4742_v45  ;;  %v4780_v45 = vld [vmem:[%s6034_s6 + $0x1c0] sm:$0xff]  }
 0x199   : > { %4462 = vmatprep.subr.bf16.mxu0 %v4744_v36  ;;  %4441 = vmatpush3.bf16.msra.mxu1 %v4745_v56  ;;  %v4783_v56 = vld [vmem:[%s6034_s6 + $0x230] sm:$0xff]  }
 0x19a   : > { %4442 = vmatprep.subr.bf16.mxu1 %v4747_v5 }
 0x19c   : > { %4463 = vmatpush3.bf16.msra.mxu0 %v4744_v36  ;;  %v4782_v36 = vld [vmem:[%s6035_s7 + $0x38] sm:$0xff]  }
 0x19d   : > { %4464 = vmatprep.subr.bf16.mxu0 %v4746_v55  ;;  %4443 = vmatpush3.bf16.msra.mxu1 %v4747_v5  ;;  %v4785_v5 = vld [vmem:[%s6034_s6 + $0x228] sm:$0xff]  }
 0x19e   : > { %4476 = vmatprep.subr.bf16.mxu1 %v4749_v14 }
 0x1a0   : > { %4465 = vmatpush3.bf16.msra.mxu0 %v4746_v55  ;;  %4445 = vmatmul.mubr.bf16.vlgmr.msra.gmra.mxu1 %v5718_v44  ;;  %v4784_v55 = vld [vmem:[%s6035_s7 + $0x30] sm:$0xff]  }
 0x1a1   : > { %4466 = vmatprep.subr.bf16.mxu0 %v4748_v50  ;;  %4448 = vmatprep.mubr.bf16.mxu1 %v5724_v2 }
 0x1a2   : > { %4477 = vmatpush3.bf16.msra.mxu1 %v4749_v14  ;;  %v4786_v14 = vld [vmem:[%s6035_s7 + $0x28] sm:$0xff]  }
 0x1a3   : > { %4478 = vmatprep.subr.bf16.mxu1 %v4751_v33 }
 0x1a4   : > { %4467 = vmatpush3.bf16.msra.mxu0 %v4748_v50 }
 0x1a5   : > { %4500 = vmatprep.subr.bf16.mxu0 %v4750_v58 }
 0x1a6   : > { %4479 = vmatpush3.bf16.msra.mxu1 %v4751_v33  ;;  %v4792_v33 = vld [vmem:[%s6035_s7 + $0x10] sm:$0xff]  }
 0x1a7   : > { %4469 = vmatmul.mubr.bf16.vlgmr.msra.gmra.mxu0 %v2406_v6  ;;  %4480 = vmatprep.subr.bf16.mxu1 %v4753_v39  ;;  %v3300_v6 = vld [vmem:[#allocation2 + $0x31] sm:$0xff] }
 0x1a8   : > { %4472 = vmatprep.mubr.bf16.mxu0 %v2407_v17  ;;  %4501 = vmatpush3.bf16.msra.mxu0 %v4750_v58  ;;  %v4795_v58 = vld [vmem:[%s6034_s6 + $0x200] sm:$0xff]  }
 0x1a9   : > { %4502 = vmatprep.subr.bf16.mxu0 %v4752_v31  ;;  %4449 = vmatmul.mubr.bf16.gmra.mxu1 %v5749_v18 }
 0x1aa   : > { %4481 = vmatpush3.bf16.msra.mxu1 %v4753_v39  ;;  %4492 = vmatprep.mubr.bf16.mxu1 %v2555_v63  ;;  %v4794_v39 = vld [vmem:[%s6035_s7 + $0x8] sm:$0xff]   ;;  %v3155_v63 = vld [vmem:[#allocation3 + $0x92] sm:$0xff] }
 0x1ab   : > { %4482 = vmatprep.subr.bf16.mxu1 %v4755_v59 }
 0x1ac   : > { %4503 = vmatpush3.bf16.msra.mxu0 %v4752_v31  ;;  %v3301_v31 = vld [vmem:[#allocation2 + $0x41] sm:$0xff] }
 0x1ad   : > { %4504 = vmatprep.subr.bf16.mxu0 %v4754_v19  ;;  %v3307_v17 = vpack.c.bf16 %v3301_v31, %v3300_v6 }
 0x1ae   : > { %4483 = vmatpush3.bf16.msra.mxu1 %v4755_v59  ;;  %v3303_v59 = vld [vmem:[#allocation2 + $0x61] sm:$0xff] }
 0x1af   : > { %4473 = vmatmul.mubr.bf16.gmra.mxu0 %v2408_v1  ;;  %4484 = vmatprep.subr.bf16.mxu1 %v4757_v26 }
 0x1b0   : > { %4505 = vmatpush3.bf16.msra.mxu0 %v4754_v19  ;;  %4516 = vmatprep.mubr.bf16.mxu0 %v2705_v37  ;;  %v3308_v19 = vpack.c.bf16 %v3303_v59, %v3302_v11 }
 0x1b1   : > { %4506 = vmatprep.subr.bf16.mxu0 %v4756_v51 }
 0x1b2   : > { %4485 = vmatpush3.bf16.msra.mxu1 %v4757_v26 }
 0x1b3   : > { %4486 = vmatprep.subr.bf16.mxu1 %v4759_v54 }
 0x1b4   : > { %4507 = vmatpush3.bf16.msra.mxu0 %v4756_v51 }
 0x1b5   : > { %4508 = vmatprep.subr.bf16.mxu0 %v4758_v48 }
 0x1b6   : > { %4487 = vmatpush3.bf16.msra.mxu1 %v4759_v54 }
 0x1b7   : > { %4488 = vmatprep.subr.bf16.mxu1 %v4761_v62 }
 0x1b8   : > { %4509 = vmatpush3.bf16.msra.mxu0 %v4758_v48 }
 0x1b9   : > { %4510 = vmatprep.subr.bf16.mxu0 %v4760_v7 }
 0x1ba   : > { %4489 = vmatpush3.bf16.msra.mxu1 %v4761_v62 }
 0x1bb   : > { %4490 = vmatprep.subr.bf16.mxu1 %v4763_v20 }
 0x1bc   : > { %4511 = vmatpush3.bf16.msra.mxu0 %v4760_v7 }
 0x1bd   : > { %4512 = vmatprep.subr.bf16.mxu0 %v4762_v15 }
 0x1be   : > { %4491 = vmatpush3.bf16.msra.mxu1 %v4763_v20 }
 0x1bf   : > { %4524 = vmatprep.subr.bf16.mxu1 %v4765_v29 }
 0x1c0   : > { %4513 = vmatpush3.bf16.msra.mxu0 %v4762_v15 }
 0x1c1   : > { %4514 = vmatprep.subr.bf16.mxu0 %v4764_v8  ;;  %4493 = vmatmul.mubr.bf16.vlgmr.msra.gmra.mxu1 %v2556_v38  ;;  %v4771_v38 = vld [vmem:[%s6034_s6 + $0x1a0] sm:$0xff]  }
 0x1c2   : > { %4496 = vmatprep.mubr.bf16.mxu1 %v2557_v27  ;;  %4525 = vmatpush3.bf16.msra.mxu1 %v4765_v29 }
 0x1c3   : > { %4526 = vmatprep.subr.bf16.mxu1 %v4767_v52 }
 0x1c4   : > { %4515 = vmatpush3.bf16.msra.mxu0 %v4764_v8 }
 0x1c5   : > { %4548 = vmatprep.subr.bf16.mxu0 %v4766_v61 }
 0x1c6   : > { %4527 = vmatpush3.bf16.msra.mxu1 %v4767_v52 }
 0x1c7   : > { %4517 = vmatmul.mubr.bf16.vlgmr.msra.gmra.mxu0 %v2706_v57  ;;  %4528 = vmatprep.subr.bf16.mxu1 %v4769_v3 }
 0x1c8   : > { %4520 = vmatprep.mubr.bf16.mxu0 %v2707_v53  ;;  %4549 = vmatpush3.bf16.msra.mxu0 %v4766_v61 }
 0x1c9   : > { %4550 = vmatprep.subr.bf16.mxu0 %v4768_v60  ;;  %4497 = vmatmul.mubr.bf16.gmra.mxu1 %v2558_v21  ;;  %v4775_v21 = vld [vmem:[%s6034_s6 + $0x190] sm:$0xff]  }
 0x1ca   : > { %4529 = vmatpush3.bf16.msra.mxu1 %v4769_v3  ;;  %4540 = vmatprep.mubr.bf16.mxu1 %v5647_v9  ;;  %v4774_v9 = vld [vmem:[%s6034_s6 + $0x1d8] sm:$0xff]  }
 0x1cb   : > { %4530 = vmatprep.subr.bf16.mxu1 %v4771_v38 }
 0x1cc   : > { %4551 = vmatpush3.bf16.msra.mxu0 %v4768_v60 }
 0x1cd   : > { %4552 = vmatprep.subr.bf16.mxu0 %v4770_v28 }
 0x1ce   : > { %4531 = vmatpush3.bf16.msra.mxu1 %v4771_v38 }
 0x1cf   : > { %4521 = vmatmul.mubr.bf16.gmra.mxu0 %v2708_v4  ;;  %4532 = vmatprep.subr.bf16.mxu1 %v4773_v23 }
 0x1d0   : > { %4553 = vmatpush3.bf16.msra.mxu0 %v4770_v28  ;;  %4564 = vmatprep.mubr.bf16.mxu0 %v5611_v25  ;;  %v4779_v25 = vld [vmem:[%s6034_s6 + $0x180] sm:$0xff]  }
 0x1d1   : > { %4554 = vmatprep.subr.bf16.mxu0 %v4772_v47 }
 0x1d2   : > { %4533 = vmatpush3.bf16.msra.mxu1 %v4773_v23 }
 0x1d3   : > { %4534 = vmatprep.subr.bf16.mxu1 %v4775_v21 }
 0x1d4   : > { %4555 = vmatpush3.bf16.msra.mxu0 %v4772_v47 }
 0x1d5   : > { %4556 = vmatprep.subr.bf16.mxu0 %v4774_v9 }
 0x1d6   : > { %4535 = vmatpush3.bf16.msra.mxu1 %v4775_v21 }
 0x1d7   : > { %4536 = vmatprep.subr.bf16.mxu1 %v4777_v42 }
 0x1d8   : > { %4557 = vmatpush3.bf16.msra.mxu0 %v4774_v9 }
 0x1d9   : > { %4558 = vmatprep.subr.bf16.mxu0 %v4776_v16 }
 0x1da   : > { %4537 = vmatpush3.bf16.msra.mxu1 %v4777_v42 }
 0x1db   : > { %4538 = vmatprep.subr.bf16.mxu1 %v4779_v25 }
 0x1dc   : > { %4559 = vmatpush3.bf16.msra.mxu0 %v4776_v16 }
 0x1dd   : > { %4560 = vmatprep.subr.bf16.mxu0 %v4778_v10 }
 0x1de   : > { %4539 = vmatpush3.bf16.msra.mxu1 %v4779_v25 }
 0x1df   : > { %4572 = vmatprep.subr.bf16.mxu1 %v4781_v35 }
 0x1e0   : > { %4561 = vmatpush3.bf16.msra.mxu0 %v4778_v10 }
 0x1e1   : > { %4562 = vmatprep.subr.bf16.mxu0 %v4780_v45  ;;  %4541 = vmatmul.mubr.bf16.vlgmr.msra.gmra.mxu1 %v5671_v49  ;;  %v2859_v49 = vpack.c.bf16 %v5626_v30, %v5760_v41  ;;  %v4789_v30 = vld [vmem:[%s6034_s6 + $0x218] sm:$0xff]   ;;  %v3159_v41 = vpack.c.bf16 %v3155_v63, %v5825_v12 }
 0x1e2   : > { %4544 = vmatprep.mubr.bf16.mxu1 %v5683_v46  ;;  %4573 = vmatpush3.bf16.msra.mxu1 %v4781_v35  ;;  %v4787_v46 = vld [vmem:[%s6034_s6 + $0x220] sm:$0xff]  }
 0x1e3   : > { %4574 = vmatprep.subr.bf16.mxu1 %v4783_v56 }
 0x1e4   : > { %4563 = vmatpush3.bf16.msra.mxu0 %v4780_v45 }
 0x1e5   : > { %4596 = vmatprep.subr.bf16.mxu0 %v4782_v36 }
 0x1e6   : > { %4575 = vmatpush3.bf16.msra.mxu1 %v4783_v56 }
 0x1e7   : > { %4565 = vmatmul.mubr.bf16.vlgmr.msra.gmra.mxu0 %v5632_v34  ;;  %4576 = vmatprep.subr.bf16.mxu1 %v4785_v5  ;;  %v3005_v34 = vld [vmem:[#allocation3 + $0x91] sm:$0xff] }
 0x1e8   : > { %4568 = vmatprep.mubr.bf16.mxu0 %v5654_v22  ;;  %4597 = vmatpush3.bf16.msra.mxu0 %v4782_v36  ;;  %v3306_v22 = vpack.c.bf16 %v3299_v24, %v3298_v32  ;;  %v3009_v50 = vpack.c.bf16 %v3005_v34, %v5623_v0  ;;  %v4793_v0 = vld [vmem:[%s6034_s6 + $0x208] sm:$0xff]  }
 0x1e9   : > { %4598 = vmatprep.subr.bf16.mxu0 %v4784_v55  ;;  %4545 = vmatmul.mubr.bf16.gmra.mxu1 %v2859_v49 }
 0x1ea   : > { %4577 = vmatpush3.bf16.msra.mxu1 %v4785_v5  ;;  %4588 = vmatprep.mubr.bf16.mxu1 %v5718_v44  ;;  %v4791_v44 = vld [vmem:[%s6034_s6 + $0x210] sm:$0xff]  }
 0x1eb   : > { %4578 = vmatprep.subr.bf16.mxu1 %v4787_v46 }
 0x1ec   : > { %4599 = vmatpush3.bf16.msra.mxu0 %v4784_v55 }
 0x1ed   : > { %4600 = vmatprep.subr.bf16.mxu0 %v4786_v14 }
 0x1ee   : > { %4579 = vmatpush3.bf16.msra.mxu1 %v4787_v46 }
 0x1ef   : > { %4569 = vmatmul.mubr.bf16.gmra.mxu0 %v3009_v50  ;;  %4580 = vmatprep.subr.bf16.mxu1 %v4789_v30 }
 0x1f0   : > { %4601 = vmatpush3.bf16.msra.mxu0 %v4786_v14  ;;  %4612 = vmatprep.mubr.bf16.mxu0 %v3306_v22 }
 0x1f1   : > { %4602 = vmatprep.subr.bf16.mxu0 %v4788_v43 }
 0x1f2   : > { %4581 = vmatpush3.bf16.msra.mxu1 %v4789_v30 }
 0x1f3   : > { %4582 = vmatprep.subr.bf16.mxu1 %v4791_v44 }
 0x1f4   : > { %4603 = vmatpush3.bf16.msra.mxu0 %v4788_v43 }
 0x1f5   : > { %4604 = vmatprep.subr.bf16.mxu0 %v4790_v13 }
 0x1f6   : > { %4583 = vmatpush3.bf16.msra.mxu1 %v4791_v44 }
 0x1f7   : > { %4584 = vmatprep.subr.bf16.mxu1 %v4793_v0 }
 0x1f8   : > { %4605 = vmatpush3.bf16.msra.mxu0 %v4790_v13 }
 0x1f9   : > { %4606 = vmatprep.subr.bf16.mxu0 %v4792_v33 }
 0x1fa   : > { %4585 = vmatpush3.bf16.msra.mxu1 %v4793_v0 }
 0x1fb   : > { %4586 = vmatprep.subr.bf16.mxu1 %v4795_v58 }
 0x1fc   : > { %4607 = vmatpush3.bf16.msra.mxu0 %v4792_v33 }
 0x1fd   : > { %4608 = vmatprep.subr.bf16.mxu0 %v4794_v39 }
 0x1fe   : > { %4587 = vmatpush3.bf16.msra.mxu1 %v4795_v58 }
 0x1ff   : > { %4620 = vmatprep.subr.bf16.mxu1 %v4782_v36 }
 0x200   : > { %4609 = vmatpush3.bf16.msra.mxu0 %v4794_v39 }
 0x201   : > { %4610 = vmatprep.subr.bf16.mxu0 %v4796_v40  ;;  %4589 = vmatmul.mubr.bf16.vlgmr.msra.gmra.mxu1 %v5724_v2  ;;  %v3304_v2 = vld [vmem:[#allocation2 + $0x71] sm:$0xff] }
 0x202   : > { %4592 = vmatprep.mubr.bf16.mxu1 %v5749_v18  ;;  %4628 = vmatpush3.bf16.msra.mxu1 %v4782_v36  ;;  %v3305_v18 = vld [vmem:[#allocation2 + $0x81] sm:$0xff] }
 0x203   : > { %4621 = vmatprep.subr.bf16.mxu1 %v4784_v55  ;;  %v3309_v26 = vpack.c.bf16 %v3305_v18, %v3304_v2 }
 0x204   : > { %4611 = vmatpush3.bf16.msra.mxu0 %v4796_v40 }
 0x206   : > { %4629 = vmatpush3.bf16.msra.mxu1 %v4784_v55 }
 0x207   : > { %4613 = vmatmul.mubr.bf16.vlgmr.msra.gmra.mxu0 %v3307_v17  ;;  %4622 = vmatprep.subr.bf16.mxu1 %v4786_v14 }
 0x209   : > { %4593 = vmatmul.mubr.bf16.gmra.mxu1 %v3159_v41 }
 0x20a   : > { %4630 = vmatpush3.bf16.msra.mxu1 %v4786_v14  ;;  %4616 = vmatprep.mubr.bf16.mxu1 %v3308_v19 }
 0x20b   : > { %4623 = vmatprep.subr.bf16.mxu1 %v4788_v43 }
 0x20e   : > { %4631 = vmatpush3.bf16.msra.mxu1 %v4788_v43 }
 0x20f   : > { %4624 = vmatprep.subr.bf16.mxu1 %v4790_v13 }
 0x212   : > { %4632 = vmatpush3.bf16.msra.mxu1 %v4790_v13 }
 0x213   : > { %4625 = vmatprep.subr.bf16.mxu1 %v4792_v33 }
 0x216   : > { %4633 = vmatpush3.bf16.msra.mxu1 %v4792_v33 }
 0x217   : > { %4626 = vmatprep.subr.bf16.mxu1 %v4794_v39 }
 0x21a   : > { %4634 = vmatpush3.bf16.msra.mxu1 %v4794_v39 }
 0x21b   : > { %4627 = vmatprep.subr.bf16.mxu1 %v4796_v40 }
 0x21e   : > { %4635 = vmatpush3.bf16.msra.mxu1 %v4796_v40 }
 0x221   : > { %4617 = vmatmul.mubr.bf16.vlgmr.msra.gmra.mxu1 %v3309_v26 }
 0x240   : > { %v4398_v1 = vpop.f32.mrf.mxu1 }
 0x242   : > { %v5917_v51 = vpop.f32.mrf.mxu1 }
 0x244   : > { %v5919_v37 = vpop.f32.mrf.mxu1 }
 0x246   : > { %v5921_v54 = vpop.f32.mrf.mxu1 }
 0x247   : > { %v4422_v48 = vpop.f32.mrf.mxu0 }
 0x248   : > { %v4402_v7 = vpop.f32.mrf.mxu1  ;;  %v2225_v18 = vadd.f32 %v4422_v48, %v4398_v1 }
 0x249   : > { %v2216_v62 = vpop.f32.mrf.mxu0 }
 0x24a   : > { %v2119_v29 = vpop.f32.mrf.mxu1 }
 0x24b   : > { %v4423_v20 = vpop.f32.mrf.mxu0 }
 0x24c   : > { %v4403_v61 = vpop.f32.mrf.mxu1 }
 0x24d   : > { %v5923_v15 = vpop.f32.mrf.mxu0 }
 0x24e   : > { %v2122_v53 = vpop.f32.mrf.mxu1 }
 0x24f   : > { %v4426_v8 = vpop.f32.mrf.mxu0 }
 0x250   : > { %v5925_v52 = vadd.f32 %v4426_v8, %v4402_v7  ;;  %v2217_v7 = vadd.f32 %v2216_v62, %v5917_v51 }
 0x251   : > { %v2232_v27 = vpop.f32.mrf.mxu0 }
 0x252   : > { %v5927_v3 = vadd.f32 %v2232_v27, %v2119_v29  ;;  %v2228_v27 = vadd.f32 %v4423_v20, %v5919_v37 }
 0x253   : > { %v4427_v57 = vpop.f32.mrf.mxu0 }
 0x254   : > { %v5929_v60 = vadd.f32 %v4427_v57, %v4403_v61 }
 0x255   : > { %v2235_v38 = vpop.f32.mrf.mxu0 }
 0x256   : > { %v5931_v28 = vadd.f32 %v2235_v38, %v2122_v53  ;;  %v2220_v38 = vadd.f32 %v5923_v15, %v5921_v54 }
 0x260   : > { %v4446_v12 = vpop.f32.mrf.mxu1 }
 0x261   : > { %v2391_v29 = vadd.f32 %v4446_v12, %v2225_v18 }
 0x262   : > { %v2358_v23 = vpop.f32.mrf.mxu1 }
 0x263   : > { %v2389_v57 = vadd.f32 %v2358_v23, %v2217_v7 }
 0x264   : > { %v4447_v47 = vpop.f32.mrf.mxu1 }
 0x265   : > { %v2392_v1 = vadd.f32 %v4447_v47, %v2228_v27 }
 0x266   : > { %v2361_v9 = vpop.f32.mrf.mxu1 }
 0x267   : > { %v4470_v4 = vpop.f32.mrf.mxu0  ;;  %v2390_v62 = vadd.f32 %v2361_v9, %v2220_v38 }
 0x268   : > { %v2541_v61 = vadd.f32 %v4470_v4, %v2391_v29 }
 0x269   : > { %v2508_v21 = vpop.f32.mrf.mxu0  ;;  %v5933_v16 = vpop.f32.mrf.mxu1 }
 0x26b   : > { %v4471_v42 = vpop.f32.mrf.mxu0  ;;  %v5935_v10 = vpop.f32.mrf.mxu1 }
 0x26c   : > { %v2542_v51 = vadd.f32 %v4471_v42, %v2392_v1 }
 0x26d   : > { %v2511_v25 = vpop.f32.mrf.mxu0  ;;  %v5939_v45 = vpop.f32.mrf.mxu1 }
 0x26e   : > { %v2540_v20 = vadd.f32 %v2511_v25, %v2390_v62 }
 0x26f   : > { %v5937_v35 = vpop.f32.mrf.mxu0  ;;  %v5943_v36 = vpop.f32.mrf.mxu1 }
 0x271   : > { %v5941_v56 = vpop.f32.mrf.mxu0 }
 0x273   : > { %v5945_v5 = vpop.f32.mrf.mxu0 }
 0x275   : > { %v5947_v49 = vpop.f32.mrf.mxu0 }
 0x281   : > { %v4494_v55 = vpop.f32.mrf.mxu1 }
 0x282   : > { %v2691_v48 = vadd.f32 %v4494_v55, %v2541_v61 }
 0x283   : > { %v2658_v46 = vpop.f32.mrf.mxu1 }
 0x285   : > { %v4495_v32 = vpop.f32.mrf.mxu1 }
 0x286   : > { %v2692_v4 = vadd.f32 %v4495_v32, %v2542_v51 }
 0x287   : > { %v4518_v14 = vpop.f32.mrf.mxu0  ;;  %v2661_v34 = vpop.f32.mrf.mxu1 }
 0x288   : > { %v2841_v12 = vadd.f32 %v4518_v14, %v2691_v48  ;;  %v2690_v54 = vadd.f32 %v2661_v34, %v2540_v20  ;;  %v2396_v48 = vadd.f32 %v5939_v45, %v5929_v60 }
 0x289   : > { %v2808_v24 = vpop.f32.mrf.mxu0  ;;  %v5949_v22 = vpop.f32.mrf.mxu1 }
 0x28a   : > { %v2546_v62 = vadd.f32 %v5945_v5, %v2396_v48 }
 0x28b   : > { %v4519_v30 = vpop.f32.mrf.mxu0  ;;  %v5951_v43 = vpop.f32.mrf.mxu1 }
 0x28d   : > { %v2811_v50 = vpop.f32.mrf.mxu0  ;;  %v5955_v13 = vpop.f32.mrf.mxu1 }
 0x28e   : > { %v2840_v42 = vadd.f32 %v2811_v50, %v2690_v54 }
 0x28f   : > { %v5953_v44 = vpop.f32.mrf.mxu0  ;;  %v5959_v33 = vpop.f32.mrf.mxu1 }
 0x291   : > { %v5957_v0 = vpop.f32.mrf.mxu0 }
 0x293   : > { %v5961_v58 = vpop.f32.mrf.mxu0 }
 0x295   : > { %v5963_v40 = vpop.f32.mrf.mxu0 }
 0x296   : > { %6056 = vst [vmem:[#allocation6_spill] sm:$0xff] %v5963_v40  ;;  %v2539_v40 = vadd.f32 %v2508_v21, %v2389_v57 }
 0x298   : > { %v2689_v18 = vadd.f32 %v2658_v46, %v2539_v40 }
 0x29a   : > { %v2839_v23 = vadd.f32 %v2808_v24, %v2689_v18 }
 0x2a1   : > { %v4542_v39 = vpop.f32.mrf.mxu1 }
 0x2a2   : > { %v2992_v7 = vadd.f32 %v4542_v39, %v2841_v12  ;;  %v2394_v12 = vadd.f32 %v5943_v36, %v5931_v28 }
 0x2a3   : > { %v2959_v6 = vpop.f32.mrf.mxu1 }
 0x2a4   : > { %v2990_v47 = vadd.f32 %v2959_v6, %v2839_v23 }
 0x2a5   : > { %v4543_v17 = vpop.f32.mrf.mxu1 }
 0x2a7   : > { %v4566_v31 = vpop.f32.mrf.mxu0  ;;  %v2962_v59 = vpop.f32.mrf.mxu1 }
 0x2a8   : > { %v3142_v15 = vadd.f32 %v4566_v31, %v2992_v7  ;;  %v2991_v24 = vadd.f32 %v2962_v59, %v2840_v42  ;;  %v2395_v59 = vadd.f32 %v5933_v16, %v5925_v52 }
 0x2a9   : > { %v3109_v11 = vpop.f32.mrf.mxu0  ;;  %v5965_v19 = vpop.f32.mrf.mxu1 }
 0x2aa   : > { %v3140_v9 = vadd.f32 %v3109_v11, %v2990_v47 }
 0x2ab   : > { %v4567_v63 = vpop.f32.mrf.mxu0  ;;  %v5967_v2 = vpop.f32.mrf.mxu1 }
 0x2ac   : > { %6057 = vst [vmem:[#allocation7_spill] sm:$0xff] %v5967_v2 }
 0x2ad   : > { %v3112_v41 = vpop.f32.mrf.mxu0  ;;  %v5972_v8 = vpop.f32.mrf.mxu1 }
 0x2ae   : > { %6058 = vst [vmem:[#allocation8_spill] sm:$0xff] %v5972_v8  ;;  %v3141_v50 = vadd.f32 %v3112_v41, %v2991_v24  ;;  %v2393_v41 = vadd.f32 %v5935_v10, %v5927_v3  ;;  %v2544_v3 = vadd.f32 %v5947_v49, %v2394_v12 }
 0x2af   : > { %v5969_v26 = vpop.f32.mrf.mxu0  ;;  %v5980_v2 = vpop.f32.mrf.mxu1 }
 0x2b0   : > { %v2543_v1 = vadd.f32 %v5941_v56, %v2393_v41  ;;  %v2696_v56 = vadd.f32 %v5955_v13, %v2546_v62  ;;  %v2694_v5 = vadd.f32 %v5959_v33, %v2544_v3 }
 0x2b1   : > { %v5976_v53 = vpop.f32.mrf.mxu0 }
 0x2b2   : > { %6059 = vst [vmem:[#allocation9_spill] sm:$0xff] %v5976_v53  ;;  %v2842_v53 = vadd.f32 %v4519_v30, %v2692_v4  ;;  %v2693_v16 = vadd.f32 %v5951_v43, %v2543_v1  ;;  %v2846_v45 = vadd.f32 %v5961_v58, %v2696_v56  ;;  %v6061_v43 = vld [vmem:[#allocation6_spill] sm:$0xff] }
 0x2b3   : > { %v5983_v8 = vpop.f32.mrf.mxu0  ;;  %v6060_v36 = vld [vmem:[#allocation7_spill] sm:$0xff]  ;;  %v2844_v18 = vadd.f32 %v6061_v43, %v2694_v5 }
 0x2b4   : > { %v2993_v14 = vadd.f32 %v4543_v17, %v2842_v53  ;;  %v2843_v10 = vadd.f32 %v5957_v0, %v2693_v16 }
 0x2b5   : > { %v3128_v21 = vpop.f32.mrf.mxu0  ;;  %v6063_v0 = vld [vmem:[#allocation8_spill] sm:$0xff]  ;;  %v2995_v33 = vadd.f32 %v5980_v2, %v2844_v18 }
 0x2b6   : > { %v3143_v32 = vadd.f32 %v4567_v63, %v2993_v14  ;;  %v2545_v63 = vadd.f32 %v5937_v35, %v2395_v59  ;;  %v2997_v20 = vadd.f32 %v6063_v0, %v2846_v45 }
 0x2b7   : > { %v3145_v7 = vadd.f32 %v3128_v21, %v2995_v33 }
 0x2b8   : > { %v2695_v51 = vadd.f32 %v5949_v22, %v2545_v63  ;;  %v2994_v22 = vadd.f32 %v6060_v36, %v2843_v10  ;;  %v3147_v58 = vadd.f32 %v5983_v8, %v2997_v20 }
 0x2ba   : > { %v2845_v52 = vadd.f32 %v5953_v44, %v2695_v51 }
 0x2bc   : > { %v2996_v60 = vadd.f32 %v5965_v19, %v2845_v52 }
 0x2be   : > { %v3146_v28 = vadd.f32 %v5969_v26, %v2996_v60 }
 0x2c1   : > { %v4590_v37 = vpop.f32.mrf.mxu1 }
 0x2c2   : > { %v3292_v46 = vadd.f32 %v4590_v37, %v3142_v15  ;;  %v6062_v37 = vld [vmem:[#allocation9_spill] sm:$0xff] }
 0x2c3   : > { %v3259_v29 = vpop.f32.mrf.mxu1  ;;  %v3144_v49 = vadd.f32 %v6062_v37, %v2994_v22 }
 0x2c4   : > { %v3290_v34 = vadd.f32 %v3259_v29, %v3140_v9 }
 0x2c5   : > { %v4591_v55 = vpop.f32.mrf.mxu1 }
 0x2c6   : > { %v3293_v6 = vadd.f32 %v4591_v55, %v3143_v32 }
 0x2c7   : > { %v4614_v25 = vpop.f32.mrf.mxu0  ;;  %v3262_v40 = vpop.f32.mrf.mxu1 }
 0x2c8   : > { %v3441_v30 = vadd.f32 %v4614_v25, %v3292_v46  ;;  %v3291_v11 = vadd.f32 %v3262_v40, %v3141_v50 }
 0x2c9   : > { %v3408_v39 = vpop.f32.mrf.mxu0  ;;  %v4594_v53 = vpop.f32.mrf.mxu1 }
 0x2ca   : > { %3449 = vst [vmem:[%s5988_s12 + $0x10] sm:$0xff] %v3441_v30  ;;  %v3439_v31 = vadd.f32 %v3408_v39, %v3290_v34  ;;  %v3296_v13 = vadd.f32 %v4594_v53, %v3146_v28 }
 0x2cb   : > { %v4615_v17 = vpop.f32.mrf.mxu0  ;;  %v3275_v38 = vpop.f32.mrf.mxu1 }
 0x2cc   : > { %3447 = vst [vmem:[%s5988_s12] sm:$0xff] %v3439_v31  ;;  %v3442_v27 = vadd.f32 %v4615_v17, %v3293_v6  ;;  %v3294_v23 = vadd.f32 %v3275_v38, %v3144_v49 }
 0x2cd   : > { %v3411_v61 = vpop.f32.mrf.mxu0  ;;  %v4595_v35 = vpop.f32.mrf.mxu1 }
 0x2ce   : > { %3450 = vst [vmem:[%s5988_s12 + $0x18] sm:$0xff] %v3442_v27  ;;  %v3440_v57 = vadd.f32 %v3411_v61, %v3291_v11  ;;  %v3297_v29 = vadd.f32 %v4595_v35, %v3147_v58 }
 0x2cf   : > { %v3278_v44 = vpop.f32.mrf.mxu1 }
 0x2d0   : > { %3448 = vst [vmem:[%s5988_s12 + $0x8] sm:$0xff] %v3440_v57  ;;  %v3295_v47 = vadd.f32 %v3278_v44, %v3145_v7 }
 0x2e1   : > { %v4618_v19 = vpop.f32.mrf.mxu1 }
 0x2e2   : > { %v3445_v26 = vadd.f32 %v4618_v19, %v3296_v13 }
 0x2e3   : > { %v3424_v4 = vpop.f32.mrf.mxu1 }
 0x2e4   : > { %3453 = vst [vmem:[%s5988_s12 + $0x30] sm:$0xff] %v3445_v26  ;;  %v3443_v54 = vadd.f32 %v3424_v4, %v3294_v23 }
 0x2e5   : > { %v4619_v15 = vpop.f32.mrf.mxu1 }
 0x2e6   : > { %3451 = vst [vmem:[%s5988_s12 + $0x20] sm:$0xff] %v3443_v54  ;;  %v3446_v55 = vadd.f32 %v4619_v15, %v3297_v29 }
 0x2e7   : > { %v3427_v42 = vpop.f32.mrf.mxu1 }
 0x2e8   : > { %3454 = vst [vmem:[%s5988_s12 + $0x38] sm:$0xff] %v3446_v55  ;;  %v3444_v9 = vadd.f32 %v3427_v42, %v3295_v47 }
 0x2ea   : > { %3452 = vst [vmem:[%s5988_s12 + $0x28] sm:$0xff] %v3444_v9 }
 0x2eb PF: > { %s18_s27 = sadd.s32 1, %s4805_s27  }
 0x2ec   : > { %p15_p5 = scmp.ge.s32.totalorder %s18_s27, 4  }
 0x2ee   :  { %17 = sbr.rel (!%p15_p5) target bundleno = 1 (0x1), region = 106 }

</bundles_post_ra>
